<compile_context>
chip_gen: v6e
topology: v6e:2x2x1
jax: 0.10.0
libtpu: 0.0.40
codegen_flags: <defaults>
</compile_context>

<pallas_src>
import functools
import math

import jax
import jax.numpy as jnp
from jax.experimental import pallas as pl
from jax.experimental.pallas import tpu as pltpu

# ----------------------------- config ---------------------------------------
EMBED = 16          # config.embed
HIDDEN = 32         # config.hidden_size
NUM_LAYERS = 2      # config.num_layers
HIDDEN2 = 64        # config.hidden_size2
NUM_CLASSES = 10    # config.num_classes
BATCH = 2
SEQ = 8


# --------------------------- fused forward kernel ---------------------------
def _fused_kernel(*refs, num_layers, hidden, seq, batch):
    """Entire TextRNN_Att forward in one kernel invocation (grid=(1,)).

    ref order: x2d, [wih, whh, bias] * (num_layers*2), w_att, fc1_w, fc1_b,
               fc_w, fc_b, out, 2D layer buffers..., final (T, B, 2H) buffer.
    x2d is time-major flattened: row index = t * B + b.
    Gate order matches PyTorch: i, f, g, o.
    """
    T, B, H = seq, batch, hidden
    two_h = 2 * H

    it = iter(refs)
    x2d_ref = next(it)                                   # (T*B, E)
    lstm = []
    for _l in range(num_layers):
        dirs = []
        for _d in range(2):
            dirs.append((next(it), next(it), next(it)))  # wih, whh, bias
        lstm.append(dirs)
    w_att_ref = next(it)                                 # (1, 2H)
    fc1w_ref = next(it)                                  # (2H, H2)
    fc1b_ref = next(it)                                  # (1, H2)
    fcw_ref = next(it)                                   # (H2, C)
    fcb_ref = next(it)                                   # (1, C)
    out_ref = next(it)                                   # (B, C)
    rest = list(it)
    buf3d = rest[-1]                                     # (T, B, 2H) final layer out
    bufs2d = tuple(rest[:-1])                            # (T*B, 2H) intermediates

    def run_direction(inp2d, wih_ref, whh_ref, b_ref, forward, write_h):
        # Hoisted input projection for ALL timesteps (bias folded in); only the
        # h_prev @ W_hh matmul stays inside the serial recurrence.
        xg = (jnp.dot(inp2d, wih_ref[...], preferred_element_type=jnp.float32)
              + b_ref[...])                              # (T*B, 4H)
        whh = whh_ref[...]                               # (H, 4H)
        h = jnp.zeros((B, H), jnp.float32)
        c = jnp.zeros((B, H), jnp.float32)
        for step in range(T):                            # fully unrolled, static T
            t = step if forward else T - 1 - step
            gates = xg[t * B:(t + 1) * B] + jnp.dot(
                h, whh, preferred_element_type=jnp.float32)       # (B, 4H)
            sg = jax.nn.sigmoid(gates)                   # one pass over full vreg
            tg = jnp.tanh(gates)
            i_g = sg[:, 0 * H:1 * H]
            f_g = sg[:, 1 * H:2 * H]
            g_g = tg[:, 2 * H:3 * H]
            o_g = sg[:, 3 * H:4 * H]
            c = f_g * c + i_g * g_g
            h = o_g * jnp.tanh(c)
            write_h(t, h)

    # --------------- stacked bidirectional LSTM (all in VMEM) ----------------
    layer_in = x2d_ref[...]                              # (T*B, E)
    for l in range(num_layers):
        last = l == num_layers - 1
        if last:
            # final layer -> (T, B, 2H) buffer consumed by attention
            def wf(t, h, _b=buf3d):
                _b[t, :, 0:H] = h

            def wb(t, h, _b=buf3d):
                _b[t, :, H:2 * H] = h
        else:
            obuf = bufs2d[l % len(bufs2d)]

            def wf(t, h, _b=obuf):
                _b[t * B:(t + 1) * B, 0:H] = h

            def wb(t, h, _b=obuf):
                _b[t * B:(t + 1) * B, H:2 * H] = h

        (wih_f, whh_f, b_f), (wih_bk, whh_bk, b_bk) = lstm[l]
        run_direction(layer_in, wih_f, whh_f, b_f, True, wf)
        run_direction(layer_in, wih_bk, whh_bk, b_bk, False, wb)
        if not last:
            layer_in = bufs2d[l % len(bufs2d)][...]      # (T*B, 2H)

    # -------------------- attention pooling + fc1 + fc -----------------------
    Hseq = buf3d[...]                                    # (T, B, 2H)
    M = jnp.tanh(Hseq)
    w = w_att_ref[...].reshape(1, 1, two_h)
    scores = jnp.sum(M * w, axis=-1, keepdims=True)      # (T, B, 1)
    scores = scores - jnp.max(scores, axis=0, keepdims=True)
    e = jnp.exp(scores)
    denom = jnp.sum(e, axis=0, keepdims=True)            # (1, B, 1)
    alpha = e * pl.reciprocal(denom, approx=True)        # softmax over time
    ctx = jnp.sum(Hseq * alpha, axis=0)                  # (B, 2H)
    ctx = jnp.maximum(ctx, 0.0)                          # relu
    h1 = (jnp.dot(ctx, fc1w_ref[...], preferred_element_type=jnp.float32)
          + fc1b_ref[...])
    out_ref[...] = (jnp.dot(h1, fcw_ref[...], preferred_element_type=jnp.float32)
                    + fcb_ref[...])


def _full_spec(shape):
    rank = len(shape)
    return pl.BlockSpec(tuple(shape), lambda i, _r=rank: (0,) * _r)


# ----------------------------- full forward ---------------------------------
def model_forward(x_tuple, params):
    x, _ = x_tuple                       # mirrors `x, _ = x` in the module
    B, T, E = x.shape
    H = params["lstm"][0][0][1].shape[0]           # whh: (H, 4H)
    C = params["fc_b"].shape[1]

    # Single layout-prep op: time-major flatten so the whole forward is one kernel.
    x2d = jnp.transpose(x, (1, 0, 2)).reshape(T * B, E)

    args = [x2d]
    for layer in params["lstm"]:
        for (wih, whh, b) in layer:
            args += [wih, whh, b]
    args += [params["w"], params["fc1_w"], params["fc1_b"],
             params["fc_w"], params["fc_b"]]

    num_layers = len(params["lstm"])
    n2d = 2 if num_layers > 2 else 1               # ping-pong buffers for deep stacks
    kernel = functools.partial(_fused_kernel, num_layers=num_layers,
                               hidden=H, seq=T, batch=B)
    return pl.pallas_call(
        kernel,
        grid=(1,),
        in_specs=[_full_spec(a.shape) for a in args],
        out_specs=pl.BlockSpec((B, C), lambda i: (0, 0)),
        out_shape=jax.ShapeDtypeStruct((B, C), jnp.float32),
        scratch_shapes=(
            [pltpu.VMEM((T * B, 2 * H), jnp.float32) for _ in range(n2d)]
            + [pltpu.VMEM((T, B, 2 * H), jnp.float32)]),
        compiler_params=pltpu.CompilerParams(
            dimension_semantics=("arbitrary",)),
    )(*args)
    # TODO(synk): on v7x the two LSTM directions could be split across the two
    # TensorCores (grid over direction + "parallel"); kept single-core for
    # portability.


# ------------------------- deterministic param init -------------------------
def init_params(key):
    params = {"lstm": []}
    k = 1.0 / math.sqrt(HIDDEN)
    in_size = EMBED
    for _ in range(NUM_LAYERS):
        layer = []
        for _direction in range(2):
            key, k1, k2, k3, k4 = jax.random.split(key, 5)
            # stored pre-transposed: (in, 4H), (H, 4H); gate order i, f, g, o
            w_ih = jax.random.uniform(k1, (in_size, 4 * HIDDEN),
                                      minval=-k, maxval=k, dtype=jnp.float32)
            w_hh = jax.random.uniform(k2, (HIDDEN, 4 * HIDDEN),
                                      minval=-k, maxval=k, dtype=jnp.float32)
            b_ih = jax.random.uniform(k3, (4 * HIDDEN,),
                                      minval=-k, maxval=k, dtype=jnp.float32)
            b_hh = jax.random.uniform(k4, (4 * HIDDEN,),
                                      minval=-k, maxval=k, dtype=jnp.float32)
            layer.append((w_ih, w_hh, (b_ih + b_hh).reshape(1, 4 * HIDDEN)))
        params["lstm"].append(tuple(layer))
        in_size = 2 * HIDDEN

    D2 = 2 * HIDDEN
    key, k5, k6, k7, k8 = jax.random.split(key, 5)
    # Matches the module: self.w = nn.Parameter(torch.zeros(hidden_size * 2)).
    params["w"] = jnp.zeros((1, D2), dtype=jnp.float32)
    k1f = 1.0 / math.sqrt(D2)
    params["fc1_w"] = jax.random.uniform(k5, (D2, HIDDEN2),
                                         minval=-k1f, maxval=k1f,
                                         dtype=jnp.float32)
    params["fc1_b"] = jax.random.uniform(k6, (1, HIDDEN2),
                                         minval=-k1f, maxval=k1f,
                                         dtype=jnp.float32)
    k2f = 1.0 / math.sqrt(HIDDEN2)
    params["fc_w"] = jax.random.uniform(k7, (HIDDEN2, NUM_CLASSES),
                                        minval=-k2f, maxval=k2f,
                                        dtype=jnp.float32)
    params["fc_b"] = jax.random.uniform(k8, (1, NUM_CLASSES),
                                        minval=-k2f, maxval=k2f,
                                        dtype=jnp.float32)
    return params


if __name__ == "__main__":
    key = jax.random.PRNGKey(0)
    key, kx = jax.random.split(key)
    params = init_params(key)

    x = jax.random.normal(kx, (BATCH, SEQ, EMBED), dtype=jnp.float32)
    seq_len = jnp.full((BATCH,), SEQ, dtype=jnp.int32)   # unused, mirrors (x, seq_len)

    out = model_forward((x, seq_len), params)
    out = jax.block_until_ready(out)
    assert out.shape == (BATCH, NUM_CLASSES), out.shape
    assert bool(jnp.all(jnp.isfinite(out)))
    print("KERNEL_OK")
</pallas_src>

<mosaic_0001>
module attributes {stable_mosaic.version = 11 : i64} {
  func.func @_fused_kernel(%arg0: i32, %arg1: memref<16x16xf32, #tpu.memory_space<vmem>>, %arg2: memref<16x128xf32, #tpu.memory_space<vmem>>, %arg3: memref<32x128xf32, #tpu.memory_space<vmem>>, %arg4: memref<1x128xf32, #tpu.memory_space<vmem>>, %arg5: memref<16x128xf32, #tpu.memory_space<vmem>>, %arg6: memref<32x128xf32, #tpu.memory_space<vmem>>, %arg7: memref<1x128xf32, #tpu.memory_space<vmem>>, %arg8: memref<64x128xf32, #tpu.memory_space<vmem>>, %arg9: memref<32x128xf32, #tpu.memory_space<vmem>>, %arg10: memref<1x128xf32, #tpu.memory_space<vmem>>, %arg11: memref<64x128xf32, #tpu.memory_space<vmem>>, %arg12: memref<32x128xf32, #tpu.memory_space<vmem>>, %arg13: memref<1x128xf32, #tpu.memory_space<vmem>>, %arg14: memref<1x64xf32, #tpu.memory_space<vmem>>, %arg15: memref<64x64xf32, #tpu.memory_space<vmem>>, %arg16: memref<1x64xf32, #tpu.memory_space<vmem>>, %arg17: memref<64x10xf32, #tpu.memory_space<vmem>>, %arg18: memref<1x10xf32, #tpu.memory_space<vmem>>, %arg19: memref<2x10xf32, #tpu.memory_space<vmem>>, %arg20: memref<16x64xf32, #tpu.memory_space<vmem>>, %arg21: memref<8x2x64xf32, #tpu.memory_space<vmem>>) attributes {dimension_semantics = [#tpu.dimension_semantics<arbitrary>], iteration_bounds = array<i64: 1>, scalar_prefetch = 0 : i64, scratch_operands = 2 : i64, tpu.core_type = #tpu.core_type<tc>, window_params = [{pipeline_mode = #tpu.pipeline_mode<synchronous>, transform_indices = @transform_0, window_bounds = array<i64: 16, 16>}, {pipeline_mode = #tpu.pipeline_mode<synchronous>, transform_indices = @transform_1, window_bounds = array<i64: 16, 128>}, {pipeline_mode = #tpu.pipeline_mode<synchronous>, transform_indices = @transform_2, window_bounds = array<i64: 32, 128>}, {pipeline_mode = #tpu.pipeline_mode<synchronous>, transform_indices = @transform_3, window_bounds = array<i64: 1, 128>}, {pipeline_mode = #tpu.pipeline_mode<synchronous>, transform_indices = @transform_4, window_bounds = array<i64: 16, 128>}, {pipeline_mode = #tpu.pipeline_mode<synchronous>, transform_indices = @transform_5, window_bounds = array<i64: 32, 128>}, {pipeline_mode = #tpu.pipeline_mode<synchronous>, transform_indices = @transform_6, window_bounds = array<i64: 1, 128>}, {pipeline_mode = #tpu.pipeline_mode<synchronous>, transform_indices = @transform_7, window_bounds = array<i64: 64, 128>}, {pipeline_mode = #tpu.pipeline_mode<synchronous>, transform_indices = @transform_8, window_bounds = array<i64: 32, 128>}, {pipeline_mode = #tpu.pipeline_mode<synchronous>, transform_indices = @transform_9, window_bounds = array<i64: 1, 128>}, {pipeline_mode = #tpu.pipeline_mode<synchronous>, transform_indices = @transform_10, window_bounds = array<i64: 64, 128>}, {pipeline_mode = #tpu.pipeline_mode<synchronous>, transform_indices = @transform_11, window_bounds = array<i64: 32, 128>}, {pipeline_mode = #tpu.pipeline_mode<synchronous>, transform_indices = @transform_12, window_bounds = array<i64: 1, 128>}, {pipeline_mode = #tpu.pipeline_mode<synchronous>, transform_indices = @transform_13, window_bounds = array<i64: 1, 64>}, {pipeline_mode = #tpu.pipeline_mode<synchronous>, transform_indices = @transform_14, window_bounds = array<i64: 64, 64>}, {pipeline_mode = #tpu.pipeline_mode<synchronous>, transform_indices = @transform_15, window_bounds = array<i64: 1, 64>}, {pipeline_mode = #tpu.pipeline_mode<synchronous>, transform_indices = @transform_16, window_bounds = array<i64: 64, 10>}, {pipeline_mode = #tpu.pipeline_mode<synchronous>, transform_indices = @transform_17, window_bounds = array<i64: 1, 10>}, {pipeline_mode = #tpu.pipeline_mode<synchronous>, transform_indices = @transform_18, window_bounds = array<i64: 2, 10>}]} {
    %c0 = arith.constant 0 : index
    %c0_0 = arith.constant 0 : index
    %0 = vector.load %arg1[%c0, %c0_0] : memref<16x16xf32, #tpu.memory_space<vmem>>, vector<16x16xf32>
    %c0_1 = arith.constant 0 : index
    %c0_2 = arith.constant 0 : index
    %1 = vector.load %arg2[%c0_1, %c0_2] : memref<16x128xf32, #tpu.memory_space<vmem>>, vector<16x128xf32>
    %cst = arith.constant dense<0.000000e+00> : vector<16x128xf32>
    %2 = tpu.matmul %0, %1, %cst {dimension_numbers = #tpu.dot_dimension_numbers<[1], [0], [0], [1], [0, 0, 1, 1], [], []>} : vector<16x16xf32>, vector<16x128xf32>, vector<16x128xf32> -> vector<16x128xf32>
    %c0_3 = arith.constant 0 : index
    %c0_4 = arith.constant 0 : index
    %3 = vector.load %arg4[%c0_3, %c0_4] : memref<1x128xf32, #tpu.memory_space<vmem>>, vector<1x128xf32>
    %4 = vector.broadcast %3 : vector<1x128xf32> to vector<16x128xf32>
    %5 = arith.addf %2, %4 : vector<16x128xf32>
    %c0_5 = arith.constant 0 : index
    %c0_6 = arith.constant 0 : index
    %6 = vector.load %arg3[%c0_5, %c0_6] : memref<32x128xf32, #tpu.memory_space<vmem>>, vector<32x128xf32>
    %cst_7 = arith.constant 0.000000e+00 : f32
    %7 = vector.broadcast %cst_7 : f32 to vector<2x32xf32>
    %cst_8 = arith.constant 0.000000e+00 : f32
    %8 = vector.broadcast %cst_8 : f32 to vector<2x32xf32>
    %9 = vector.extract_strided_slice %5 {offsets = [0, 0], sizes = [2, 128], strides = [1, 1]} : vector<16x128xf32> to vector<2x128xf32>
    %cst_9 = arith.constant dense<0.000000e+00> : vector<2x128xf32>
    %10 = tpu.matmul %7, %6, %cst_9 {dimension_numbers = #tpu.dot_dimension_numbers<[1], [0], [0], [1], [0, 0, 1, 1], [], []>} : vector<2x32xf32>, vector<32x128xf32>, vector<2x128xf32> -> vector<2x128xf32>
    %11 = arith.addf %9, %10 : vector<2x128xf32>
    %12 = arith.negf %11 : vector<2x128xf32>
    %13 = math.exp %12 : vector<2x128xf32>
    %cst_10 = arith.constant 1.000000e+00 : f32
    %14 = vector.broadcast %cst_10 : f32 to vector<2x128xf32>
    %15 = arith.addf %14, %13 : vector<2x128xf32>
    %16 = arith.divf %14, %15 : vector<2x128xf32>
    %17 = math.tanh %11 : vector<2x128xf32>
    %18 = vector.extract_strided_slice %16 {offsets = [0, 0], sizes = [2, 32], strides = [1, 1]} : vector<2x128xf32> to vector<2x32xf32>
    %19 = vector.extract_strided_slice %16 {offsets = [0, 32], sizes = [2, 32], strides = [1, 1]} : vector<2x128xf32> to vector<2x32xf32>
    %20 = vector.extract_strided_slice %17 {offsets = [0, 64], sizes = [2, 32], strides = [1, 1]} : vector<2x128xf32> to vector<2x32xf32>
    %21 = vector.extract_strided_slice %16 {offsets = [0, 96], sizes = [2, 32], strides = [1, 1]} : vector<2x128xf32> to vector<2x32xf32>
    %22 = arith.mulf %19, %8 : vector<2x32xf32>
    %23 = arith.mulf %18, %20 : vector<2x32xf32>
    %24 = arith.addf %22, %23 : vector<2x32xf32>
    %25 = math.tanh %24 : vector<2x32xf32>
    %26 = arith.mulf %21, %25 : vector<2x32xf32>
    %c0_11 = arith.constant 0 : index
    %c0_12 = arith.constant 0 : index
    %27 = vector.load %arg20[%c0_11, %c0_12] : memref<16x64xf32, #tpu.memory_space<vmem>>, vector<2x32xf32>
    tpu.vector_store %arg20[%c0_11, %c0_12], %26 {strides = array<i32>} : memref<16x64xf32, #tpu.memory_space<vmem>>, vector<2x32xf32>,
    %28 = vector.extract_strided_slice %5 {offsets = [2, 0], sizes = [2, 128], strides = [1, 1]} : vector<16x128xf32> to vector<2x128xf32>
    %cst_13 = arith.constant dense<0.000000e+00> : vector<2x128xf32>
    %29 = tpu.matmul %26, %6, %cst_13 {dimension_numbers = #tpu.dot_dimension_numbers<[1], [0], [0], [1], [0, 0, 1, 1], [], []>} : vector<2x32xf32>, vector<32x128xf32>, vector<2x128xf32> -> vector<2x128xf32>
    %30 = arith.addf %28, %29 : vector<2x128xf32>
    %31 = arith.negf %30 : vector<2x128xf32>
    %32 = math.exp %31 : vector<2x128xf32>
    %cst_14 = arith.constant 1.000000e+00 : f32
    %33 = vector.broadcast %cst_14 : f32 to vector<2x128xf32>
    %34 = arith.addf %33, %32 : vector<2x128xf32>
    %35 = arith.divf %33, %34 : vector<2x128xf32>
    %36 = math.tanh %30 : vector<2x128xf32>
    %37 = vector.extract_strided_slice %35 {offsets = [0, 0], sizes = [2, 32], strides = [1, 1]} : vector<2x128xf32> to vector<2x32xf32>
    %38 = vector.extract_strided_slice %35 {offsets = [0, 32], sizes = [2, 32], strides = [1, 1]} : vector<2x128xf32> to vector<2x32xf32>
    %39 = vector.extract_strided_slice %36 {offsets = [0, 64], sizes = [2, 32], strides = [1, 1]} : vector<2x128xf32> to vector<2x32xf32>
    %40 = vector.extract_strided_slice %35 {offsets = [0, 96], sizes = [2, 32], strides = [1, 1]} : vector<2x128xf32> to vector<2x32xf32>
    %41 = arith.mulf %38, %24 : vector<2x32xf32>
    %42 = arith.mulf %37, %39 : vector<2x32xf32>
    %43 = arith.addf %41, %42 : vector<2x32xf32>
    %44 = math.tanh %43 : vector<2x32xf32>
    %45 = arith.mulf %40, %44 : vector<2x32xf32>
    %c2 = arith.constant 2 : index
    %c0_15 = arith.constant 0 : index
    %46 = vector.load %arg20[%c2, %c0_15] : memref<16x64xf32, #tpu.memory_space<vmem>>, vector<2x32xf32>
    tpu.vector_store %arg20[%c2, %c0_15], %45 {strides = array<i32>} : memref<16x64xf32, #tpu.memory_space<vmem>>, vector<2x32xf32>,
    %47 = vector.extract_strided_slice %5 {offsets = [4, 0], sizes = [2, 128], strides = [1, 1]} : vector<16x128xf32> to vector<2x128xf32>
    %cst_16 = arith.constant dense<0.000000e+00> : vector<2x128xf32>
    %48 = tpu.matmul %45, %6, %cst_16 {dimension_numbers = #tpu.dot_dimension_numbers<[1], [0], [0], [1], [0, 0, 1, 1], [], []>} : vector<2x32xf32>, vector<32x128xf32>, vector<2x128xf32> -> vector<2x128xf32>
    %49 = arith.addf %47, %48 : vector<2x128xf32>
    %50 = arith.negf %49 : vector<2x128xf32>
    %51 = math.exp %50 : vector<2x128xf32>
    %cst_17 = arith.constant 1.000000e+00 : f32
    %52 = vector.broadcast %cst_17 : f32 to vector<2x128xf32>
    %53 = arith.addf %52, %51 : vector<2x128xf32>
    %54 = arith.divf %52, %53 : vector<2x128xf32>
    %55 = math.tanh %49 : vector<2x128xf32>
    %56 = vector.extract_strided_slice %54 {offsets = [0, 0], sizes = [2, 32], strides = [1, 1]} : vector<2x128xf32> to vector<2x32xf32>
    %57 = vector.extract_strided_slice %54 {offsets = [0, 32], sizes = [2, 32], strides = [1, 1]} : vector<2x128xf32> to vector<2x32xf32>
    %58 = vector.extract_strided_slice %55 {offsets = [0, 64], sizes = [2, 32], strides = [1, 1]} : vector<2x128xf32> to vector<2x32xf32>
    %59 = vector.extract_strided_slice %54 {offsets = [0, 96], sizes = [2, 32], strides = [1, 1]} : vector<2x128xf32> to vector<2x32xf32>
    %60 = arith.mulf %57, %43 : vector<2x32xf32>
    %61 = arith.mulf %56, %58 : vector<2x32xf32>
    %62 = arith.addf %60, %61 : vector<2x32xf32>
    %63 = math.tanh %62 : vector<2x32xf32>
    %64 = arith.mulf %59, %63 : vector<2x32xf32>
    %c4 = arith.constant 4 : index
    %c0_18 = arith.constant 0 : index
    %65 = vector.load %arg20[%c4, %c0_18] : memref<16x64xf32, #tpu.memory_space<vmem>>, vector<2x32xf32>
    tpu.vector_store %arg20[%c4, %c0_18], %64 {strides = array<i32>} : memref<16x64xf32, #tpu.memory_space<vmem>>, vector<2x32xf32>,
    %66 = vector.extract_strided_slice %5 {offsets = [6, 0], sizes = [2, 128], strides = [1, 1]} : vector<16x128xf32> to vector<2x128xf32>
    %cst_19 = arith.constant dense<0.000000e+00> : vector<2x128xf32>
    %67 = tpu.matmul %64, %6, %cst_19 {dimension_numbers = #tpu.dot_dimension_numbers<[1], [0], [0], [1], [0, 0, 1, 1], [], []>} : vector<2x32xf32>, vector<32x128xf32>, vector<2x128xf32> -> vector<2x128xf32>
    %68 = arith.addf %66, %67 : vector<2x128xf32>
    %69 = arith.negf %68 : vector<2x128xf32>
    %70 = math.exp %69 : vector<2x128xf32>
    %cst_20 = arith.constant 1.000000e+00 : f32
    %71 = vector.broadcast %cst_20 : f32 to vector<2x128xf32>
    %72 = arith.addf %71, %70 : vector<2x128xf32>
    %73 = arith.divf %71, %72 : vector<2x128xf32>
    %74 = math.tanh %68 : vector<2x128xf32>
    %75 = vector.extract_strided_slice %73 {offsets = [0, 0], sizes = [2, 32], strides = [1, 1]} : vector<2x128xf32> to vector<2x32xf32>
    %76 = vector.extract_strided_slice %73 {offsets = [0, 32], sizes = [2, 32], strides = [1, 1]} : vector<2x128xf32> to vector<2x32xf32>
    %77 = vector.extract_strided_slice %74 {offsets = [0, 64], sizes = [2, 32], strides = [1, 1]} : vector<2x128xf32> to vector<2x32xf32>
    %78 = vector.extract_strided_slice %73 {offsets = [0, 96], sizes = [2, 32], strides = [1, 1]} : vector<2x128xf32> to vector<2x32xf32>
    %79 = arith.mulf %76, %62 : vector<2x32xf32>
    %80 = arith.mulf %75, %77 : vector<2x32xf32>
    %81 = arith.addf %79, %80 : vector<2x32xf32>
    %82 = math.tanh %81 : vector<2x32xf32>
    %83 = arith.mulf %78, %82 : vector<2x32xf32>
    %c6 = arith.constant 6 : index
    %c0_21 = arith.constant 0 : index
    %84 = vector.load %arg20[%c6, %c0_21] : memref<16x64xf32, #tpu.memory_space<vmem>>, vector<2x32xf32>
    tpu.vector_store %arg20[%c6, %c0_21], %83 {strides = array<i32>} : memref<16x64xf32, #tpu.memory_space<vmem>>, vector<2x32xf32>,
    %85 = vector.extract_strided_slice %5 {offsets = [8, 0], sizes = [2, 128], strides = [1, 1]} : vector<16x128xf32> to vector<2x128xf32>
    %cst_22 = arith.constant dense<0.000000e+00> : vector<2x128xf32>
    %86 = tpu.matmul %83, %6, %cst_22 {dimension_numbers = #tpu.dot_dimension_numbers<[1], [0], [0], [1], [0, 0, 1, 1], [], []>} : vector<2x32xf32>, vector<32x128xf32>, vector<2x128xf32> -> vector<2x128xf32>
    %87 = arith.addf %85, %86 : vector<2x128xf32>
    %88 = arith.negf %87 : vector<2x128xf32>
    %89 = math.exp %88 : vector<2x128xf32>
    %cst_23 = arith.constant 1.000000e+00 : f32
    %90 = vector.broadcast %cst_23 : f32 to vector<2x128xf32>
    %91 = arith.addf %90, %89 : vector<2x128xf32>
    %92 = arith.divf %90, %91 : vector<2x128xf32>
    %93 = math.tanh %87 : vector<2x128xf32>
    %94 = vector.extract_strided_slice %92 {offsets = [0, 0], sizes = [2, 32], strides = [1, 1]} : vector<2x128xf32> to vector<2x32xf32>
    %95 = vector.extract_strided_slice %92 {offsets = [0, 32], sizes = [2, 32], strides = [1, 1]} : vector<2x128xf32> to vector<2x32xf32>
    %96 = vector.extract_strided_slice %93 {offsets = [0, 64], sizes = [2, 32], strides = [1, 1]} : vector<2x128xf32> to vector<2x32xf32>
    %97 = vector.extract_strided_slice %92 {offsets = [0, 96], sizes = [2, 32], strides = [1, 1]} : vector<2x128xf32> to vector<2x32xf32>
    %98 = arith.mulf %95, %81 : vector<2x32xf32>
    %99 = arith.mulf %94, %96 : vector<2x32xf32>
    %100 = arith.addf %98, %99 : vector<2x32xf32>
    %101 = math.tanh %100 : vector<2x32xf32>
    %102 = arith.mulf %97, %101 : vector<2x32xf32>
    %c8 = arith.constant 8 : index
    %c0_24 = arith.constant 0 : index
    %103 = vector.load %arg20[%c8, %c0_24] : memref<16x64xf32, #tpu.memory_space<vmem>>, vector<2x32xf32>
    tpu.vector_store %arg20[%c8, %c0_24], %102 {strides = array<i32>} : memref<16x64xf32, #tpu.memory_space<vmem>>, vector<2x32xf32>,
    %104 = vector.extract_strided_slice %5 {offsets = [10, 0], sizes = [2, 128], strides = [1, 1]} : vector<16x128xf32> to vector<2x128xf32>
    %cst_25 = arith.constant dense<0.000000e+00> : vector<2x128xf32>
    %105 = tpu.matmul %102, %6, %cst_25 {dimension_numbers = #tpu.dot_dimension_numbers<[1], [0], [0], [1], [0, 0, 1, 1], [], []>} : vector<2x32xf32>, vector<32x128xf32>, vector<2x128xf32> -> vector<2x128xf32>
    %106 = arith.addf %104, %105 : vector<2x128xf32>
    %107 = arith.negf %106 : vector<2x128xf32>
    %108 = math.exp %107 : vector<2x128xf32>
    %cst_26 = arith.constant 1.000000e+00 : f32
    %109 = vector.broadcast %cst_26 : f32 to vector<2x128xf32>
    %110 = arith.addf %109, %108 : vector<2x128xf32>
    %111 = arith.divf %109, %110 : vector<2x128xf32>
    %112 = math.tanh %106 : vector<2x128xf32>
    %113 = vector.extract_strided_slice %111 {offsets = [0, 0], sizes = [2, 32], strides = [1, 1]} : vector<2x128xf32> to vector<2x32xf32>
    %114 = vector.extract_strided_slice %111 {offsets = [0, 32], sizes = [2, 32], strides = [1, 1]} : vector<2x128xf32> to vector<2x32xf32>
    %115 = vector.extract_strided_slice %112 {offsets = [0, 64], sizes = [2, 32], strides = [1, 1]} : vector<2x128xf32> to vector<2x32xf32>
    %116 = vector.extract_strided_slice %111 {offsets = [0, 96], sizes = [2, 32], strides = [1, 1]} : vector<2x128xf32> to vector<2x32xf32>
    %117 = arith.mulf %114, %100 : vector<2x32xf32>
    %118 = arith.mulf %113, %115 : vector<2x32xf32>
    %119 = arith.addf %117, %118 : vector<2x32xf32>
    %120 = math.tanh %119 : vector<2x32xf32>
    %121 = arith.mulf %116, %120 : vector<2x32xf32>
    %c10 = arith.constant 10 : index
    %c0_27 = arith.constant 0 : index
    %122 = vector.load %arg20[%c10, %c0_27] : memref<16x64xf32, #tpu.memory_space<vmem>>, vector<2x32xf32>
    tpu.vector_store %arg20[%c10, %c0_27], %121 {strides = array<i32>} : memref<16x64xf32, #tpu.memory_space<vmem>>, vector<2x32xf32>,
    %123 = vector.extract_strided_slice %5 {offsets = [12, 0], sizes = [2, 128], strides = [1, 1]} : vector<16x128xf32> to vector<2x128xf32>
    %cst_28 = arith.constant dense<0.000000e+00> : vector<2x128xf32>
    %124 = tpu.matmul %121, %6, %cst_28 {dimension_numbers = #tpu.dot_dimension_numbers<[1], [0], [0], [1], [0, 0, 1, 1], [], []>} : vector<2x32xf32>, vector<32x128xf32>, vector<2x128xf32> -> vector<2x128xf32>
    %125 = arith.addf %123, %124 : vector<2x128xf32>
    %126 = arith.negf %125 : vector<2x128xf32>
    %127 = math.exp %126 : vector<2x128xf32>
    %cst_29 = arith.constant 1.000000e+00 : f32
    %128 = vector.broadcast %cst_29 : f32 to vector<2x128xf32>
    %129 = arith.addf %128, %127 : vector<2x128xf32>
    %130 = arith.divf %128, %129 : vector<2x128xf32>
    %131 = math.tanh %125 : vector<2x128xf32>
    %132 = vector.extract_strided_slice %130 {offsets = [0, 0], sizes = [2, 32], strides = [1, 1]} : vector<2x128xf32> to vector<2x32xf32>
    %133 = vector.extract_strided_slice %130 {offsets = [0, 32], sizes = [2, 32], strides = [1, 1]} : vector<2x128xf32> to vector<2x32xf32>
    %134 = vector.extract_strided_slice %131 {offsets = [0, 64], sizes = [2, 32], strides = [1, 1]} : vector<2x128xf32> to vector<2x32xf32>
    %135 = vector.extract_strided_slice %130 {offsets = [0, 96], sizes = [2, 32], strides = [1, 1]} : vector<2x128xf32> to vector<2x32xf32>
    %136 = arith.mulf %133, %119 : vector<2x32xf32>
    %137 = arith.mulf %132, %134 : vector<2x32xf32>
    %138 = arith.addf %136, %137 : vector<2x32xf32>
    %139 = math.tanh %138 : vector<2x32xf32>
    %140 = arith.mulf %135, %139 : vector<2x32xf32>
    %c12 = arith.constant 12 : index
    %c0_30 = arith.constant 0 : index
    %141 = vector.load %arg20[%c12, %c0_30] : memref<16x64xf32, #tpu.memory_space<vmem>>, vector<2x32xf32>
    tpu.vector_store %arg20[%c12, %c0_30], %140 {strides = array<i32>} : memref<16x64xf32, #tpu.memory_space<vmem>>, vector<2x32xf32>,
    %142 = vector.extract_strided_slice %5 {offsets = [14, 0], sizes = [2, 128], strides = [1, 1]} : vector<16x128xf32> to vector<2x128xf32>
    %cst_31 = arith.constant dense<0.000000e+00> : vector<2x128xf32>
    %143 = tpu.matmul %140, %6, %cst_31 {dimension_numbers = #tpu.dot_dimension_numbers<[1], [0], [0], [1], [0, 0, 1, 1], [], []>} : vector<2x32xf32>, vector<32x128xf32>, vector<2x128xf32> -> vector<2x128xf32>
    %144 = arith.addf %142, %143 : vector<2x128xf32>
    %145 = arith.negf %144 : vector<2x128xf32>
    %146 = math.exp %145 : vector<2x128xf32>
    %cst_32 = arith.constant 1.000000e+00 : f32
    %147 = vector.broadcast %cst_32 : f32 to vector<2x128xf32>
    %148 = arith.addf %147, %146 : vector<2x128xf32>
    %149 = arith.divf %147, %148 : vector<2x128xf32>
    %150 = math.tanh %144 : vector<2x128xf32>
    %151 = vector.extract_strided_slice %149 {offsets = [0, 0], sizes = [2, 32], strides = [1, 1]} : vector<2x128xf32> to vector<2x32xf32>
    %152 = vector.extract_strided_slice %149 {offsets = [0, 32], sizes = [2, 32], strides = [1, 1]} : vector<2x128xf32> to vector<2x32xf32>
    %153 = vector.extract_strided_slice %150 {offsets = [0, 64], sizes = [2, 32], strides = [1, 1]} : vector<2x128xf32> to vector<2x32xf32>
    %154 = vector.extract_strided_slice %149 {offsets = [0, 96], sizes = [2, 32], strides = [1, 1]} : vector<2x128xf32> to vector<2x32xf32>
    %155 = arith.mulf %152, %138 : vector<2x32xf32>
    %156 = arith.mulf %151, %153 : vector<2x32xf32>
    %157 = arith.addf %155, %156 : vector<2x32xf32>
    %158 = math.tanh %157 : vector<2x32xf32>
    %159 = arith.mulf %154, %158 : vector<2x32xf32>
    %c14 = arith.constant 14 : index
    %c0_33 = arith.constant 0 : index
    %160 = vector.load %arg20[%c14, %c0_33] : memref<16x64xf32, #tpu.memory_space<vmem>>, vector<2x32xf32>
    tpu.vector_store %arg20[%c14, %c0_33], %159 {strides = array<i32>} : memref<16x64xf32, #tpu.memory_space<vmem>>, vector<2x32xf32>,
    %c0_34 = arith.constant 0 : index
    %c0_35 = arith.constant 0 : index
    %161 = vector.load %arg5[%c0_34, %c0_35] : memref<16x128xf32, #tpu.memory_space<vmem>>, vector<16x128xf32>
    %cst_36 = arith.constant dense<0.000000e+00> : vector<16x128xf32>
    %162 = tpu.matmul %0, %161, %cst_36 {dimension_numbers = #tpu.dot_dimension_numbers<[1], [0], [0], [1], [0, 0, 1, 1], [], []>} : vector<16x16xf32>, vector<16x128xf32>, vector<16x128xf32> -> vector<16x128xf32>
    %c0_37 = arith.constant 0 : index
    %c0_38 = arith.constant 0 : index
    %163 = vector.load %arg7[%c0_37, %c0_38] : memref<1x128xf32, #tpu.memory_space<vmem>>, vector<1x128xf32>
    %164 = vector.broadcast %163 : vector<1x128xf32> to vector<16x128xf32>
    %165 = arith.addf %162, %164 : vector<16x128xf32>
    %c0_39 = arith.constant 0 : index
    %c0_40 = arith.constant 0 : index
    %166 = vector.load %arg6[%c0_39, %c0_40] : memref<32x128xf32, #tpu.memory_space<vmem>>, vector<32x128xf32>
    %cst_41 = arith.constant 0.000000e+00 : f32
    %167 = vector.broadcast %cst_41 : f32 to vector<2x32xf32>
    %cst_42 = arith.constant 0.000000e+00 : f32
    %168 = vector.broadcast %cst_42 : f32 to vector<2x32xf32>
    %169 = vector.extract_strided_slice %165 {offsets = [14, 0], sizes = [2, 128], strides = [1, 1]} : vector<16x128xf32> to vector<2x128xf32>
    %cst_43 = arith.constant dense<0.000000e+00> : vector<2x128xf32>
    %170 = tpu.matmul %167, %166, %cst_43 {dimension_numbers = #tpu.dot_dimension_numbers<[1], [0], [0], [1], [0, 0, 1, 1], [], []>} : vector<2x32xf32>, vector<32x128xf32>, vector<2x128xf32> -> vector<2x128xf32>
    %171 = arith.addf %169, %170 : vector<2x128xf32>
    %172 = arith.negf %171 : vector<2x128xf32>
    %173 = math.exp %172 : vector<2x128xf32>
    %cst_44 = arith.constant 1.000000e+00 : f32
    %174 = vector.broadcast %cst_44 : f32 to vector<2x128xf32>
    %175 = arith.addf %174, %173 : vector<2x128xf32>
    %176 = arith.divf %174, %175 : vector<2x128xf32>
    %177 = math.tanh %171 : vector<2x128xf32>
    %178 = vector.extract_strided_slice %176 {offsets = [0, 0], sizes = [2, 32], strides = [1, 1]} : vector<2x128xf32> to vector<2x32xf32>
    %179 = vector.extract_strided_slice %176 {offsets = [0, 32], sizes = [2, 32], strides = [1, 1]} : vector<2x128xf32> to vector<2x32xf32>
    %180 = vector.extract_strided_slice %177 {offsets = [0, 64], sizes = [2, 32], strides = [1, 1]} : vector<2x128xf32> to vector<2x32xf32>
    %181 = vector.extract_strided_slice %176 {offsets = [0, 96], sizes = [2, 32], strides = [1, 1]} : vector<2x128xf32> to vector<2x32xf32>
    %182 = arith.mulf %179, %168 : vector<2x32xf32>
    %183 = arith.mulf %178, %180 : vector<2x32xf32>
    %184 = arith.addf %182, %183 : vector<2x32xf32>
    %185 = math.tanh %184 : vector<2x32xf32>
    %186 = arith.mulf %181, %185 : vector<2x32xf32>
    %c14_45 = arith.constant 14 : index
    %c32 = arith.constant 32 : index
    %187 = vector.load %arg20[%c14_45, %c32] : memref<16x64xf32, #tpu.memory_space<vmem>>, vector<2x32xf32>
    tpu.vector_store %arg20[%c14_45, %c32], %186 {strides = array<i32>} : memref<16x64xf32, #tpu.memory_space<vmem>>, vector<2x32xf32>,
    %188 = vector.extract_strided_slice %165 {offsets = [12, 0], sizes = [2, 128], strides = [1, 1]} : vector<16x128xf32> to vector<2x128xf32>
    %cst_46 = arith.constant dense<0.000000e+00> : vector<2x128xf32>
    %189 = tpu.matmul %186, %166, %cst_46 {dimension_numbers = #tpu.dot_dimension_numbers<[1], [0], [0], [1], [0, 0, 1, 1], [], []>} : vector<2x32xf32>, vector<32x128xf32>, vector<2x128xf32> -> vector<2x128xf32>
    %190 = arith.addf %188, %189 : vector<2x128xf32>
    %191 = arith.negf %190 : vector<2x128xf32>
    %192 = math.exp %191 : vector<2x128xf32>
    %cst_47 = arith.constant 1.000000e+00 : f32
    %193 = vector.broadcast %cst_47 : f32 to vector<2x128xf32>
    %194 = arith.addf %193, %192 : vector<2x128xf32>
    %195 = arith.divf %193, %194 : vector<2x128xf32>
    %196 = math.tanh %190 : vector<2x128xf32>
    %197 = vector.extract_strided_slice %195 {offsets = [0, 0], sizes = [2, 32], strides = [1, 1]} : vector<2x128xf32> to vector<2x32xf32>
    %198 = vector.extract_strided_slice %195 {offsets = [0, 32], sizes = [2, 32], strides = [1, 1]} : vector<2x128xf32> to vector<2x32xf32>
    %199 = vector.extract_strided_slice %196 {offsets = [0, 64], sizes = [2, 32], strides = [1, 1]} : vector<2x128xf32> to vector<2x32xf32>
    %200 = vector.extract_strided_slice %195 {offsets = [0, 96], sizes = [2, 32], strides = [1, 1]} : vector<2x128xf32> to vector<2x32xf32>
    %201 = arith.mulf %198, %184 : vector<2x32xf32>
    %202 = arith.mulf %197, %199 : vector<2x32xf32>
    %203 = arith.addf %201, %202 : vector<2x32xf32>
    %204 = math.tanh %203 : vector<2x32xf32>
    %205 = arith.mulf %200, %204 : vector<2x32xf32>
    %c12_48 = arith.constant 12 : index
    %c32_49 = arith.constant 32 : index
    %206 = vector.load %arg20[%c12_48, %c32_49] : memref<16x64xf32, #tpu.memory_space<vmem>>, vector<2x32xf32>
    tpu.vector_store %arg20[%c12_48, %c32_49], %205 {strides = array<i32>} : memref<16x64xf32, #tpu.memory_space<vmem>>, vector<2x32xf32>,
    %207 = vector.extract_strided_slice %165 {offsets = [10, 0], sizes = [2, 128], strides = [1, 1]} : vector<16x128xf32> to vector<2x128xf32>
    %cst_50 = arith.constant dense<0.000000e+00> : vector<2x128xf32>
    %208 = tpu.matmul %205, %166, %cst_50 {dimension_numbers = #tpu.dot_dimension_numbers<[1], [0], [0], [1], [0, 0, 1, 1], [], []>} : vector<2x32xf32>, vector<32x128xf32>, vector<2x128xf32> -> vector<2x128xf32>
    %209 = arith.addf %207, %208 : vector<2x128xf32>
    %210 = arith.negf %209 : vector<2x128xf32>
    %211 = math.exp %210 : vector<2x128xf32>
    %cst_51 = arith.constant 1.000000e+00 : f32
    %212 = vector.broadcast %cst_51 : f32 to vector<2x128xf32>
    %213 = arith.addf %212, %211 : vector<2x128xf32>
    %214 = arith.divf %212, %213 : vector<2x128xf32>
    %215 = math.tanh %209 : vector<2x128xf32>
    %216 = vector.extract_strided_slice %214 {offsets = [0, 0], sizes = [2, 32], strides = [1, 1]} : vector<2x128xf32> to vector<2x32xf32>
    %217 = vector.extract_strided_slice %214 {offsets = [0, 32], sizes = [2, 32], strides = [1, 1]} : vector<2x128xf32> to vector<2x32xf32>
    %218 = vector.extract_strided_slice %215 {offsets = [0, 64], sizes = [2, 32], strides = [1, 1]} : vector<2x128xf32> to vector<2x32xf32>
    %219 = vector.extract_strided_slice %214 {offsets = [0, 96], sizes = [2, 32], strides = [1, 1]} : vector<2x128xf32> to vector<2x32xf32>
    %220 = arith.mulf %217, %203 : vector<2x32xf32>
    %221 = arith.mulf %216, %218 : vector<2x32xf32>
    %222 = arith.addf %220, %221 : vector<2x32xf32>
    %223 = math.tanh %222 : vector<2x32xf32>
    %224 = arith.mulf %219, %223 : vector<2x32xf32>
    %c10_52 = arith.constant 10 : index
    %c32_53 = arith.constant 32 : index
    %225 = vector.load %arg20[%c10_52, %c32_53] : memref<16x64xf32, #tpu.memory_space<vmem>>, vector<2x32xf32>
    tpu.vector_store %arg20[%c10_52, %c32_53], %224 {strides = array<i32>} : memref<16x64xf32, #tpu.memory_space<vmem>>, vector<2x32xf32>,
    %226 = vector.extract_strided_slice %165 {offsets = [8, 0], sizes = [2, 128], strides = [1, 1]} : vector<16x128xf32> to vector<2x128xf32>
    %cst_54 = arith.constant dense<0.000000e+00> : vector<2x128xf32>
    %227 = tpu.matmul %224, %166, %cst_54 {dimension_numbers = #tpu.dot_dimension_numbers<[1], [0], [0], [1], [0, 0, 1, 1], [], []>} : vector<2x32xf32>, vector<32x128xf32>, vector<2x128xf32> -> vector<2x128xf32>
    %228 = arith.addf %226, %227 : vector<2x128xf32>
    %229 = arith.negf %228 : vector<2x128xf32>
    %230 = math.exp %229 : vector<2x128xf32>
    %cst_55 = arith.constant 1.000000e+00 : f32
    %231 = vector.broadcast %cst_55 : f32 to vector<2x128xf32>
    %232 = arith.addf %231, %230 : vector<2x128xf32>
    %233 = arith.divf %231, %232 : vector<2x128xf32>
    %234 = math.tanh %228 : vector<2x128xf32>
    %235 = vector.extract_strided_slice %233 {offsets = [0, 0], sizes = [2, 32], strides = [1, 1]} : vector<2x128xf32> to vector<2x32xf32>
    %236 = vector.extract_strided_slice %233 {offsets = [0, 32], sizes = [2, 32], strides = [1, 1]} : vector<2x128xf32> to vector<2x32xf32>
    %237 = vector.extract_strided_slice %234 {offsets = [0, 64], sizes = [2, 32], strides = [1, 1]} : vector<2x128xf32> to vector<2x32xf32>
    %238 = vector.extract_strided_slice %233 {offsets = [0, 96], sizes = [2, 32], strides = [1, 1]} : vector<2x128xf32> to vector<2x32xf32>
    %239 = arith.mulf %236, %222 : vector<2x32xf32>
    %240 = arith.mulf %235, %237 : vector<2x32xf32>
    %241 = arith.addf %239, %240 : vector<2x32xf32>
    %242 = math.tanh %241 : vector<2x32xf32>
    %243 = arith.mulf %238, %242 : vector<2x32xf32>
    %c8_56 = arith.constant 8 : index
    %c32_57 = arith.constant 32 : index
    %244 = vector.load %arg20[%c8_56, %c32_57] : memref<16x64xf32, #tpu.memory_space<vmem>>, vector<2x32xf32>
    tpu.vector_store %arg20[%c8_56, %c32_57], %243 {strides = array<i32>} : memref<16x64xf32, #tpu.memory_space<vmem>>, vector<2x32xf32>,
    %245 = vector.extract_strided_slice %165 {offsets = [6, 0], sizes = [2, 128], strides = [1, 1]} : vector<16x128xf32> to vector<2x128xf32>
    %cst_58 = arith.constant dense<0.000000e+00> : vector<2x128xf32>
    %246 = tpu.matmul %243, %166, %cst_58 {dimension_numbers = #tpu.dot_dimension_numbers<[1], [0], [0], [1], [0, 0, 1, 1], [], []>} : vector<2x32xf32>, vector<32x128xf32>, vector<2x128xf32> -> vector<2x128xf32>
    %247 = arith.addf %245, %246 : vector<2x128xf32>
    %248 = arith.negf %247 : vector<2x128xf32>
    %249 = math.exp %248 : vector<2x128xf32>
    %cst_59 = arith.constant 1.000000e+00 : f32
    %250 = vector.broadcast %cst_59 : f32 to vector<2x128xf32>
    %251 = arith.addf %250, %249 : vector<2x128xf32>
    %252 = arith.divf %250, %251 : vector<2x128xf32>
    %253 = math.tanh %247 : vector<2x128xf32>
    %254 = vector.extract_strided_slice %252 {offsets = [0, 0], sizes = [2, 32], strides = [1, 1]} : vector<2x128xf32> to vector<2x32xf32>
    %255 = vector.extract_strided_slice %252 {offsets = [0, 32], sizes = [2, 32], strides = [1, 1]} : vector<2x128xf32> to vector<2x32xf32>
    %256 = vector.extract_strided_slice %253 {offsets = [0, 64], sizes = [2, 32], strides = [1, 1]} : vector<2x128xf32> to vector<2x32xf32>
    %257 = vector.extract_strided_slice %252 {offsets = [0, 96], sizes = [2, 32], strides = [1, 1]} : vector<2x128xf32> to vector<2x32xf32>
    %258 = arith.mulf %255, %241 : vector<2x32xf32>
    %259 = arith.mulf %254, %256 : vector<2x32xf32>
    %260 = arith.addf %258, %259 : vector<2x32xf32>
    %261 = math.tanh %260 : vector<2x32xf32>
    %262 = arith.mulf %257, %261 : vector<2x32xf32>
    %c6_60 = arith.constant 6 : index
    %c32_61 = arith.constant 32 : index
    %263 = vector.load %arg20[%c6_60, %c32_61] : memref<16x64xf32, #tpu.memory_space<vmem>>, vector<2x32xf32>
    tpu.vector_store %arg20[%c6_60, %c32_61], %262 {strides = array<i32>} : memref<16x64xf32, #tpu.memory_space<vmem>>, vector<2x32xf32>,
    %264 = vector.extract_strided_slice %165 {offsets = [4, 0], sizes = [2, 128], strides = [1, 1]} : vector<16x128xf32> to vector<2x128xf32>
    %cst_62 = arith.constant dense<0.000000e+00> : vector<2x128xf32>
    %265 = tpu.matmul %262, %166, %cst_62 {dimension_numbers = #tpu.dot_dimension_numbers<[1], [0], [0], [1], [0, 0, 1, 1], [], []>} : vector<2x32xf32>, vector<32x128xf32>, vector<2x128xf32> -> vector<2x128xf32>
    %266 = arith.addf %264, %265 : vector<2x128xf32>
    %267 = arith.negf %266 : vector<2x128xf32>
    %268 = math.exp %267 : vector<2x128xf32>
    %cst_63 = arith.constant 1.000000e+00 : f32
    %269 = vector.broadcast %cst_63 : f32 to vector<2x128xf32>
    %270 = arith.addf %269, %268 : vector<2x128xf32>
    %271 = arith.divf %269, %270 : vector<2x128xf32>
    %272 = math.tanh %266 : vector<2x128xf32>
    %273 = vector.extract_strided_slice %271 {offsets = [0, 0], sizes = [2, 32], strides = [1, 1]} : vector<2x128xf32> to vector<2x32xf32>
    %274 = vector.extract_strided_slice %271 {offsets = [0, 32], sizes = [2, 32], strides = [1, 1]} : vector<2x128xf32> to vector<2x32xf32>
    %275 = vector.extract_strided_slice %272 {offsets = [0, 64], sizes = [2, 32], strides = [1, 1]} : vector<2x128xf32> to vector<2x32xf32>
    %276 = vector.extract_strided_slice %271 {offsets = [0, 96], sizes = [2, 32], strides = [1, 1]} : vector<2x128xf32> to vector<2x32xf32>
    %277 = arith.mulf %274, %260 : vector<2x32xf32>
    %278 = arith.mulf %273, %275 : vector<2x32xf32>
    %279 = arith.addf %277, %278 : vector<2x32xf32>
    %280 = math.tanh %279 : vector<2x32xf32>
    %281 = arith.mulf %276, %280 : vector<2x32xf32>
    %c4_64 = arith.constant 4 : index
    %c32_65 = arith.constant 32 : index
    %282 = vector.load %arg20[%c4_64, %c32_65] : memref<16x64xf32, #tpu.memory_space<vmem>>, vector<2x32xf32>
    tpu.vector_store %arg20[%c4_64, %c32_65], %281 {strides = array<i32>} : memref<16x64xf32, #tpu.memory_space<vmem>>, vector<2x32xf32>,
    %283 = vector.extract_strided_slice %165 {offsets = [2, 0], sizes = [2, 128], strides = [1, 1]} : vector<16x128xf32> to vector<2x128xf32>
    %cst_66 = arith.constant dense<0.000000e+00> : vector<2x128xf32>
    %284 = tpu.matmul %281, %166, %cst_66 {dimension_numbers = #tpu.dot_dimension_numbers<[1], [0], [0], [1], [0, 0, 1, 1], [], []>} : vector<2x32xf32>, vector<32x128xf32>, vector<2x128xf32> -> vector<2x128xf32>
    %285 = arith.addf %283, %284 : vector<2x128xf32>
    %286 = arith.negf %285 : vector<2x128xf32>
    %287 = math.exp %286 : vector<2x128xf32>
    %cst_67 = arith.constant 1.000000e+00 : f32
    %288 = vector.broadcast %cst_67 : f32 to vector<2x128xf32>
    %289 = arith.addf %288, %287 : vector<2x128xf32>
    %290 = arith.divf %288, %289 : vector<2x128xf32>
    %291 = math.tanh %285 : vector<2x128xf32>
    %292 = vector.extract_strided_slice %290 {offsets = [0, 0], sizes = [2, 32], strides = [1, 1]} : vector<2x128xf32> to vector<2x32xf32>
    %293 = vector.extract_strided_slice %290 {offsets = [0, 32], sizes = [2, 32], strides = [1, 1]} : vector<2x128xf32> to vector<2x32xf32>
    %294 = vector.extract_strided_slice %291 {offsets = [0, 64], sizes = [2, 32], strides = [1, 1]} : vector<2x128xf32> to vector<2x32xf32>
    %295 = vector.extract_strided_slice %290 {offsets = [0, 96], sizes = [2, 32], strides = [1, 1]} : vector<2x128xf32> to vector<2x32xf32>
    %296 = arith.mulf %293, %279 : vector<2x32xf32>
    %297 = arith.mulf %292, %294 : vector<2x32xf32>
    %298 = arith.addf %296, %297 : vector<2x32xf32>
    %299 = math.tanh %298 : vector<2x32xf32>
    %300 = arith.mulf %295, %299 : vector<2x32xf32>
    %c2_68 = arith.constant 2 : index
    %c32_69 = arith.constant 32 : index
    %301 = vector.load %arg20[%c2_68, %c32_69] : memref<16x64xf32, #tpu.memory_space<vmem>>, vector<2x32xf32>
    tpu.vector_store %arg20[%c2_68, %c32_69], %300 {strides = array<i32>} : memref<16x64xf32, #tpu.memory_space<vmem>>, vector<2x32xf32>,
    %302 = vector.extract_strided_slice %165 {offsets = [0, 0], sizes = [2, 128], strides = [1, 1]} : vector<16x128xf32> to vector<2x128xf32>
    %cst_70 = arith.constant dense<0.000000e+00> : vector<2x128xf32>
    %303 = tpu.matmul %300, %166, %cst_70 {dimension_numbers = #tpu.dot_dimension_numbers<[1], [0], [0], [1], [0, 0, 1, 1], [], []>} : vector<2x32xf32>, vector<32x128xf32>, vector<2x128xf32> -> vector<2x128xf32>
    %304 = arith.addf %302, %303 : vector<2x128xf32>
    %305 = arith.negf %304 : vector<2x128xf32>
    %306 = math.exp %305 : vector<2x128xf32>
    %cst_71 = arith.constant 1.000000e+00 : f32
    %307 = vector.broadcast %cst_71 : f32 to vector<2x128xf32>
    %308 = arith.addf %307, %306 : vector<2x128xf32>
    %309 = arith.divf %307, %308 : vector<2x128xf32>
    %310 = math.tanh %304 : vector<2x128xf32>
    %311 = vector.extract_strided_slice %309 {offsets = [0, 0], sizes = [2, 32], strides = [1, 1]} : vector<2x128xf32> to vector<2x32xf32>
    %312 = vector.extract_strided_slice %309 {offsets = [0, 32], sizes = [2, 32], strides = [1, 1]} : vector<2x128xf32> to vector<2x32xf32>
    %313 = vector.extract_strided_slice %310 {offsets = [0, 64], sizes = [2, 32], strides = [1, 1]} : vector<2x128xf32> to vector<2x32xf32>
    %314 = vector.extract_strided_slice %309 {offsets = [0, 96], sizes = [2, 32], strides = [1, 1]} : vector<2x128xf32> to vector<2x32xf32>
    %315 = arith.mulf %312, %298 : vector<2x32xf32>
    %316 = arith.mulf %311, %313 : vector<2x32xf32>
    %317 = arith.addf %315, %316 : vector<2x32xf32>
    %318 = math.tanh %317 : vector<2x32xf32>
    %319 = arith.mulf %314, %318 : vector<2x32xf32>
    %c0_72 = arith.constant 0 : index
    %c32_73 = arith.constant 32 : index
    %320 = vector.load %arg20[%c0_72, %c32_73] : memref<16x64xf32, #tpu.memory_space<vmem>>, vector<2x32xf32>
    tpu.vector_store %arg20[%c0_72, %c32_73], %319 {strides = array<i32>} : memref<16x64xf32, #tpu.memory_space<vmem>>, vector<2x32xf32>,
    %c0_74 = arith.constant 0 : index
    %c0_75 = arith.constant 0 : index
    %321 = vector.load %arg20[%c0_74, %c0_75] : memref<16x64xf32, #tpu.memory_space<vmem>>, vector<16x64xf32>
    %c0_76 = arith.constant 0 : index
    %c0_77 = arith.constant 0 : index
    %322 = vector.load %arg8[%c0_76, %c0_77] : memref<64x128xf32, #tpu.memory_space<vmem>>, vector<64x128xf32>
    %cst_78 = arith.constant dense<0.000000e+00> : vector<16x128xf32>
    %323 = tpu.matmul %321, %322, %cst_78 {dimension_numbers = #tpu.dot_dimension_numbers<[1], [0], [0], [1], [0, 0, 1, 1], [], []>} : vector<16x64xf32>, vector<64x128xf32>, vector<16x128xf32> -> vector<16x128xf32>
    %c0_79 = arith.constant 0 : index
    %c0_80 = arith.constant 0 : index
    %324 = vector.load %arg10[%c0_79, %c0_80] : memref<1x128xf32, #tpu.memory_space<vmem>>, vector<1x128xf32>
    %325 = vector.broadcast %324 : vector<1x128xf32> to vector<16x128xf32>
    %326 = arith.addf %323, %325 : vector<16x128xf32>
    %c0_81 = arith.constant 0 : index
    %c0_82 = arith.constant 0 : index
    %327 = vector.load %arg9[%c0_81, %c0_82] : memref<32x128xf32, #tpu.memory_space<vmem>>, vector<32x128xf32>
    %cst_83 = arith.constant 0.000000e+00 : f32
    %328 = vector.broadcast %cst_83 : f32 to vector<2x32xf32>
    %cst_84 = arith.constant 0.000000e+00 : f32
    %329 = vector.broadcast %cst_84 : f32 to vector<2x32xf32>
    %330 = vector.extract_strided_slice %326 {offsets = [0, 0], sizes = [2, 128], strides = [1, 1]} : vector<16x128xf32> to vector<2x128xf32>
    %cst_85 = arith.constant dense<0.000000e+00> : vector<2x128xf32>
    %331 = tpu.matmul %328, %327, %cst_85 {dimension_numbers = #tpu.dot_dimension_numbers<[1], [0], [0], [1], [0, 0, 1, 1], [], []>} : vector<2x32xf32>, vector<32x128xf32>, vector<2x128xf32> -> vector<2x128xf32>
    %332 = arith.addf %330, %331 : vector<2x128xf32>
    %333 = arith.negf %332 : vector<2x128xf32>
    %334 = math.exp %333 : vector<2x128xf32>
    %cst_86 = arith.constant 1.000000e+00 : f32
    %335 = vector.broadcast %cst_86 : f32 to vector<2x128xf32>
    %336 = arith.addf %335, %334 : vector<2x128xf32>
    %337 = arith.divf %335, %336 : vector<2x128xf32>
    %338 = math.tanh %332 : vector<2x128xf32>
    %339 = vector.extract_strided_slice %337 {offsets = [0, 0], sizes = [2, 32], strides = [1, 1]} : vector<2x128xf32> to vector<2x32xf32>
    %340 = vector.extract_strided_slice %337 {offsets = [0, 32], sizes = [2, 32], strides = [1, 1]} : vector<2x128xf32> to vector<2x32xf32>
    %341 = vector.extract_strided_slice %338 {offsets = [0, 64], sizes = [2, 32], strides = [1, 1]} : vector<2x128xf32> to vector<2x32xf32>
    %342 = vector.extract_strided_slice %337 {offsets = [0, 96], sizes = [2, 32], strides = [1, 1]} : vector<2x128xf32> to vector<2x32xf32>
    %343 = arith.mulf %340, %329 : vector<2x32xf32>
    %344 = arith.mulf %339, %341 : vector<2x32xf32>
    %345 = arith.addf %343, %344 : vector<2x32xf32>
    %346 = math.tanh %345 : vector<2x32xf32>
    %347 = arith.mulf %342, %346 : vector<2x32xf32>
    %c0_87 = arith.constant 0 : index
    %c0_88 = arith.constant 0 : index
    %c0_89 = arith.constant 0 : index
    %348 = vector.load %arg21[%c0_87, %c0_88, %c0_89] : memref<8x2x64xf32, #tpu.memory_space<vmem>>, vector<1x2x32xf32>
    %349 = vector.shape_cast %348 : vector<1x2x32xf32> to vector<2x32xf32>
    %350 = vector.shape_cast %347 : vector<2x32xf32> to vector<1x2x32xf32>
    tpu.vector_store %arg21[%c0_87, %c0_88, %c0_89], %350 {strides = array<i32>} : memref<8x2x64xf32, #tpu.memory_space<vmem>>, vector<1x2x32xf32>,
    %351 = vector.extract_strided_slice %326 {offsets = [2, 0], sizes = [2, 128], strides = [1, 1]} : vector<16x128xf32> to vector<2x128xf32>
    %cst_90 = arith.constant dense<0.000000e+00> : vector<2x128xf32>
    %352 = tpu.matmul %347, %327, %cst_90 {dimension_numbers = #tpu.dot_dimension_numbers<[1], [0], [0], [1], [0, 0, 1, 1], [], []>} : vector<2x32xf32>, vector<32x128xf32>, vector<2x128xf32> -> vector<2x128xf32>
    %353 = arith.addf %351, %352 : vector<2x128xf32>
    %354 = arith.negf %353 : vector<2x128xf32>
    %355 = math.exp %354 : vector<2x128xf32>
    %cst_91 = arith.constant 1.000000e+00 : f32
    %356 = vector.broadcast %cst_91 : f32 to vector<2x128xf32>
    %357 = arith.addf %356, %355 : vector<2x128xf32>
    %358 = arith.divf %356, %357 : vector<2x128xf32>
    %359 = math.tanh %353 : vector<2x128xf32>
    %360 = vector.extract_strided_slice %358 {offsets = [0, 0], sizes = [2, 32], strides = [1, 1]} : vector<2x128xf32> to vector<2x32xf32>
    %361 = vector.extract_strided_slice %358 {offsets = [0, 32], sizes = [2, 32], strides = [1, 1]} : vector<2x128xf32> to vector<2x32xf32>
    %362 = vector.extract_strided_slice %359 {offsets = [0, 64], sizes = [2, 32], strides = [1, 1]} : vector<2x128xf32> to vector<2x32xf32>
    %363 = vector.extract_strided_slice %358 {offsets = [0, 96], sizes = [2, 32], strides = [1, 1]} : vector<2x128xf32> to vector<2x32xf32>
    %364 = arith.mulf %361, %345 : vector<2x32xf32>
    %365 = arith.mulf %360, %362 : vector<2x32xf32>
    %366 = arith.addf %364, %365 : vector<2x32xf32>
    %367 = math.tanh %366 : vector<2x32xf32>
    %368 = arith.mulf %363, %367 : vector<2x32xf32>
    %c1 = arith.constant 1 : index
    %c0_92 = arith.constant 0 : index
    %c0_93 = arith.constant 0 : index
    %369 = vector.load %arg21[%c1, %c0_92, %c0_93] : memref<8x2x64xf32, #tpu.memory_space<vmem>>, vector<1x2x32xf32>
    %370 = vector.shape_cast %369 : vector<1x2x32xf32> to vector<2x32xf32>
    %371 = vector.shape_cast %368 : vector<2x32xf32> to vector<1x2x32xf32>
    tpu.vector_store %arg21[%c1, %c0_92, %c0_93], %371 {strides = array<i32>} : memref<8x2x64xf32, #tpu.memory_space<vmem>>, vector<1x2x32xf32>,
    %372 = vector.extract_strided_slice %326 {offsets = [4, 0], sizes = [2, 128], strides = [1, 1]} : vector<16x128xf32> to vector<2x128xf32>
    %cst_94 = arith.constant dense<0.000000e+00> : vector<2x128xf32>
    %373 = tpu.matmul %368, %327, %cst_94 {dimension_numbers = #tpu.dot_dimension_numbers<[1], [0], [0], [1], [0, 0, 1, 1], [], []>} : vector<2x32xf32>, vector<32x128xf32>, vector<2x128xf32> -> vector<2x128xf32>
    %374 = arith.addf %372, %373 : vector<2x128xf32>
    %375 = arith.negf %374 : vector<2x128xf32>
    %376 = math.exp %375 : vector<2x128xf32>
    %cst_95 = arith.constant 1.000000e+00 : f32
    %377 = vector.broadcast %cst_95 : f32 to vector<2x128xf32>
    %378 = arith.addf %377, %376 : vector<2x128xf32>
    %379 = arith.divf %377, %378 : vector<2x128xf32>
    %380 = math.tanh %374 : vector<2x128xf32>
    %381 = vector.extract_strided_slice %379 {offsets = [0, 0], sizes = [2, 32], strides = [1, 1]} : vector<2x128xf32> to vector<2x32xf32>
    %382 = vector.extract_strided_slice %379 {offsets = [0, 32], sizes = [2, 32], strides = [1, 1]} : vector<2x128xf32> to vector<2x32xf32>
    %383 = vector.extract_strided_slice %380 {offsets = [0, 64], sizes = [2, 32], strides = [1, 1]} : vector<2x128xf32> to vector<2x32xf32>
    %384 = vector.extract_strided_slice %379 {offsets = [0, 96], sizes = [2, 32], strides = [1, 1]} : vector<2x128xf32> to vector<2x32xf32>
    %385 = arith.mulf %382, %366 : vector<2x32xf32>
    %386 = arith.mulf %381, %383 : vector<2x32xf32>
    %387 = arith.addf %385, %386 : vector<2x32xf32>
    %388 = math.tanh %387 : vector<2x32xf32>
    %389 = arith.mulf %384, %388 : vector<2x32xf32>
    %c2_96 = arith.constant 2 : index
    %c0_97 = arith.constant 0 : index
    %c0_98 = arith.constant 0 : index
    %390 = vector.load %arg21[%c2_96, %c0_97, %c0_98] : memref<8x2x64xf32, #tpu.memory_space<vmem>>, vector<1x2x32xf32>
    %391 = vector.shape_cast %390 : vector<1x2x32xf32> to vector<2x32xf32>
    %392 = vector.shape_cast %389 : vector<2x32xf32> to vector<1x2x32xf32>
    tpu.vector_store %arg21[%c2_96, %c0_97, %c0_98], %392 {strides = array<i32>} : memref<8x2x64xf32, #tpu.memory_space<vmem>>, vector<1x2x32xf32>,
    %393 = vector.extract_strided_slice %326 {offsets = [6, 0], sizes = [2, 128], strides = [1, 1]} : vector<16x128xf32> to vector<2x128xf32>
    %cst_99 = arith.constant dense<0.000000e+00> : vector<2x128xf32>
    %394 = tpu.matmul %389, %327, %cst_99 {dimension_numbers = #tpu.dot_dimension_numbers<[1], [0], [0], [1], [0, 0, 1, 1], [], []>} : vector<2x32xf32>, vector<32x128xf32>, vector<2x128xf32> -> vector<2x128xf32>
    %395 = arith.addf %393, %394 : vector<2x128xf32>
    %396 = arith.negf %395 : vector<2x128xf32>
    %397 = math.exp %396 : vector<2x128xf32>
    %cst_100 = arith.constant 1.000000e+00 : f32
    %398 = vector.broadcast %cst_100 : f32 to vector<2x128xf32>
    %399 = arith.addf %398, %397 : vector<2x128xf32>
    %400 = arith.divf %398, %399 : vector<2x128xf32>
    %401 = math.tanh %395 : vector<2x128xf32>
    %402 = vector.extract_strided_slice %400 {offsets = [0, 0], sizes = [2, 32], strides = [1, 1]} : vector<2x128xf32> to vector<2x32xf32>
    %403 = vector.extract_strided_slice %400 {offsets = [0, 32], sizes = [2, 32], strides = [1, 1]} : vector<2x128xf32> to vector<2x32xf32>
    %404 = vector.extract_strided_slice %401 {offsets = [0, 64], sizes = [2, 32], strides = [1, 1]} : vector<2x128xf32> to vector<2x32xf32>
    %405 = vector.extract_strided_slice %400 {offsets = [0, 96], sizes = [2, 32], strides = [1, 1]} : vector<2x128xf32> to vector<2x32xf32>
    %406 = arith.mulf %403, %387 : vector<2x32xf32>
    %407 = arith.mulf %402, %404 : vector<2x32xf32>
    %408 = arith.addf %406, %407 : vector<2x32xf32>
    %409 = math.tanh %408 : vector<2x32xf32>
    %410 = arith.mulf %405, %409 : vector<2x32xf32>
    %c3 = arith.constant 3 : index
    %c0_101 = arith.constant 0 : index
    %c0_102 = arith.constant 0 : index
    %411 = vector.load %arg21[%c3, %c0_101, %c0_102] : memref<8x2x64xf32, #tpu.memory_space<vmem>>, vector<1x2x32xf32>
    %412 = vector.shape_cast %411 : vector<1x2x32xf32> to vector<2x32xf32>
    %413 = vector.shape_cast %410 : vector<2x32xf32> to vector<1x2x32xf32>
    tpu.vector_store %arg21[%c3, %c0_101, %c0_102], %413 {strides = array<i32>} : memref<8x2x64xf32, #tpu.memory_space<vmem>>, vector<1x2x32xf32>,
    %414 = vector.extract_strided_slice %326 {offsets = [8, 0], sizes = [2, 128], strides = [1, 1]} : vector<16x128xf32> to vector<2x128xf32>
    %cst_103 = arith.constant dense<0.000000e+00> : vector<2x128xf32>
    %415 = tpu.matmul %410, %327, %cst_103 {dimension_numbers = #tpu.dot_dimension_numbers<[1], [0], [0], [1], [0, 0, 1, 1], [], []>} : vector<2x32xf32>, vector<32x128xf32>, vector<2x128xf32> -> vector<2x128xf32>
    %416 = arith.addf %414, %415 : vector<2x128xf32>
    %417 = arith.negf %416 : vector<2x128xf32>
    %418 = math.exp %417 : vector<2x128xf32>
    %cst_104 = arith.constant 1.000000e+00 : f32
    %419 = vector.broadcast %cst_104 : f32 to vector<2x128xf32>
    %420 = arith.addf %419, %418 : vector<2x128xf32>
    %421 = arith.divf %419, %420 : vector<2x128xf32>
    %422 = math.tanh %416 : vector<2x128xf32>
    %423 = vector.extract_strided_slice %421 {offsets = [0, 0], sizes = [2, 32], strides = [1, 1]} : vector<2x128xf32> to vector<2x32xf32>
    %424 = vector.extract_strided_slice %421 {offsets = [0, 32], sizes = [2, 32], strides = [1, 1]} : vector<2x128xf32> to vector<2x32xf32>
    %425 = vector.extract_strided_slice %422 {offsets = [0, 64], sizes = [2, 32], strides = [1, 1]} : vector<2x128xf32> to vector<2x32xf32>
    %426 = vector.extract_strided_slice %421 {offsets = [0, 96], sizes = [2, 32], strides = [1, 1]} : vector<2x128xf32> to vector<2x32xf32>
    %427 = arith.mulf %424, %408 : vector<2x32xf32>
    %428 = arith.mulf %423, %425 : vector<2x32xf32>
    %429 = arith.addf %427, %428 : vector<2x32xf32>
    %430 = math.tanh %429 : vector<2x32xf32>
    %431 = arith.mulf %426, %430 : vector<2x32xf32>
    %c4_105 = arith.constant 4 : index
    %c0_106 = arith.constant 0 : index
    %c0_107 = arith.constant 0 : index
    %432 = vector.load %arg21[%c4_105, %c0_106, %c0_107] : memref<8x2x64xf32, #tpu.memory_space<vmem>>, vector<1x2x32xf32>
    %433 = vector.shape_cast %432 : vector<1x2x32xf32> to vector<2x32xf32>
    %434 = vector.shape_cast %431 : vector<2x32xf32> to vector<1x2x32xf32>
    tpu.vector_store %arg21[%c4_105, %c0_106, %c0_107], %434 {strides = array<i32>} : memref<8x2x64xf32, #tpu.memory_space<vmem>>, vector<1x2x32xf32>,
    %435 = vector.extract_strided_slice %326 {offsets = [10, 0], sizes = [2, 128], strides = [1, 1]} : vector<16x128xf32> to vector<2x128xf32>
    %cst_108 = arith.constant dense<0.000000e+00> : vector<2x128xf32>
    %436 = tpu.matmul %431, %327, %cst_108 {dimension_numbers = #tpu.dot_dimension_numbers<[1], [0], [0], [1], [0, 0, 1, 1], [], []>} : vector<2x32xf32>, vector<32x128xf32>, vector<2x128xf32> -> vector<2x128xf32>
    %437 = arith.addf %435, %436 : vector<2x128xf32>
    %438 = arith.negf %437 : vector<2x128xf32>
    %439 = math.exp %438 : vector<2x128xf32>
    %cst_109 = arith.constant 1.000000e+00 : f32
    %440 = vector.broadcast %cst_109 : f32 to vector<2x128xf32>
    %441 = arith.addf %440, %439 : vector<2x128xf32>
    %442 = arith.divf %440, %441 : vector<2x128xf32>
    %443 = math.tanh %437 : vector<2x128xf32>
    %444 = vector.extract_strided_slice %442 {offsets = [0, 0], sizes = [2, 32], strides = [1, 1]} : vector<2x128xf32> to vector<2x32xf32>
    %445 = vector.extract_strided_slice %442 {offsets = [0, 32], sizes = [2, 32], strides = [1, 1]} : vector<2x128xf32> to vector<2x32xf32>
    %446 = vector.extract_strided_slice %443 {offsets = [0, 64], sizes = [2, 32], strides = [1, 1]} : vector<2x128xf32> to vector<2x32xf32>
    %447 = vector.extract_strided_slice %442 {offsets = [0, 96], sizes = [2, 32], strides = [1, 1]} : vector<2x128xf32> to vector<2x32xf32>
    %448 = arith.mulf %445, %429 : vector<2x32xf32>
    %449 = arith.mulf %444, %446 : vector<2x32xf32>
    %450 = arith.addf %448, %449 : vector<2x32xf32>
    %451 = math.tanh %450 : vector<2x32xf32>
    %452 = arith.mulf %447, %451 : vector<2x32xf32>
    %c5 = arith.constant 5 : index
    %c0_110 = arith.constant 0 : index
    %c0_111 = arith.constant 0 : index
    %453 = vector.load %arg21[%c5, %c0_110, %c0_111] : memref<8x2x64xf32, #tpu.memory_space<vmem>>, vector<1x2x32xf32>
    %454 = vector.shape_cast %453 : vector<1x2x32xf32> to vector<2x32xf32>
    %455 = vector.shape_cast %452 : vector<2x32xf32> to vector<1x2x32xf32>
    tpu.vector_store %arg21[%c5, %c0_110, %c0_111], %455 {strides = array<i32>} : memref<8x2x64xf32, #tpu.memory_space<vmem>>, vector<1x2x32xf32>,
    %456 = vector.extract_strided_slice %326 {offsets = [12, 0], sizes = [2, 128], strides = [1, 1]} : vector<16x128xf32> to vector<2x128xf32>
    %cst_112 = arith.constant dense<0.000000e+00> : vector<2x128xf32>
    %457 = tpu.matmul %452, %327, %cst_112 {dimension_numbers = #tpu.dot_dimension_numbers<[1], [0], [0], [1], [0, 0, 1, 1], [], []>} : vector<2x32xf32>, vector<32x128xf32>, vector<2x128xf32> -> vector<2x128xf32>
    %458 = arith.addf %456, %457 : vector<2x128xf32>
    %459 = arith.negf %458 : vector<2x128xf32>
    %460 = math.exp %459 : vector<2x128xf32>
    %cst_113 = arith.constant 1.000000e+00 : f32
    %461 = vector.broadcast %cst_113 : f32 to vector<2x128xf32>
    %462 = arith.addf %461, %460 : vector<2x128xf32>
    %463 = arith.divf %461, %462 : vector<2x128xf32>
    %464 = math.tanh %458 : vector<2x128xf32>
    %465 = vector.extract_strided_slice %463 {offsets = [0, 0], sizes = [2, 32], strides = [1, 1]} : vector<2x128xf32> to vector<2x32xf32>
    %466 = vector.extract_strided_slice %463 {offsets = [0, 32], sizes = [2, 32], strides = [1, 1]} : vector<2x128xf32> to vector<2x32xf32>
    %467 = vector.extract_strided_slice %464 {offsets = [0, 64], sizes = [2, 32], strides = [1, 1]} : vector<2x128xf32> to vector<2x32xf32>
    %468 = vector.extract_strided_slice %463 {offsets = [0, 96], sizes = [2, 32], strides = [1, 1]} : vector<2x128xf32> to vector<2x32xf32>
    %469 = arith.mulf %466, %450 : vector<2x32xf32>
    %470 = arith.mulf %465, %467 : vector<2x32xf32>
    %471 = arith.addf %469, %470 : vector<2x32xf32>
    %472 = math.tanh %471 : vector<2x32xf32>
    %473 = arith.mulf %468, %472 : vector<2x32xf32>
    %c6_114 = arith.constant 6 : index
    %c0_115 = arith.constant 0 : index
    %c0_116 = arith.constant 0 : index
    %474 = vector.load %arg21[%c6_114, %c0_115, %c0_116] : memref<8x2x64xf32, #tpu.memory_space<vmem>>, vector<1x2x32xf32>
    %475 = vector.shape_cast %474 : vector<1x2x32xf32> to vector<2x32xf32>
    %476 = vector.shape_cast %473 : vector<2x32xf32> to vector<1x2x32xf32>
    tpu.vector_store %arg21[%c6_114, %c0_115, %c0_116], %476 {strides = array<i32>} : memref<8x2x64xf32, #tpu.memory_space<vmem>>, vector<1x2x32xf32>,
    %477 = vector.extract_strided_slice %326 {offsets = [14, 0], sizes = [2, 128], strides = [1, 1]} : vector<16x128xf32> to vector<2x128xf32>
    %cst_117 = arith.constant dense<0.000000e+00> : vector<2x128xf32>
    %478 = tpu.matmul %473, %327, %cst_117 {dimension_numbers = #tpu.dot_dimension_numbers<[1], [0], [0], [1], [0, 0, 1, 1], [], []>} : vector<2x32xf32>, vector<32x128xf32>, vector<2x128xf32> -> vector<2x128xf32>
    %479 = arith.addf %477, %478 : vector<2x128xf32>
    %480 = arith.negf %479 : vector<2x128xf32>
    %481 = math.exp %480 : vector<2x128xf32>
    %cst_118 = arith.constant 1.000000e+00 : f32
    %482 = vector.broadcast %cst_118 : f32 to vector<2x128xf32>
    %483 = arith.addf %482, %481 : vector<2x128xf32>
    %484 = arith.divf %482, %483 : vector<2x128xf32>
    %485 = math.tanh %479 : vector<2x128xf32>
    %486 = vector.extract_strided_slice %484 {offsets = [0, 0], sizes = [2, 32], strides = [1, 1]} : vector<2x128xf32> to vector<2x32xf32>
    %487 = vector.extract_strided_slice %484 {offsets = [0, 32], sizes = [2, 32], strides = [1, 1]} : vector<2x128xf32> to vector<2x32xf32>
    %488 = vector.extract_strided_slice %485 {offsets = [0, 64], sizes = [2, 32], strides = [1, 1]} : vector<2x128xf32> to vector<2x32xf32>
    %489 = vector.extract_strided_slice %484 {offsets = [0, 96], sizes = [2, 32], strides = [1, 1]} : vector<2x128xf32> to vector<2x32xf32>
    %490 = arith.mulf %487, %471 : vector<2x32xf32>
    %491 = arith.mulf %486, %488 : vector<2x32xf32>
    %492 = arith.addf %490, %491 : vector<2x32xf32>
    %493 = math.tanh %492 : vector<2x32xf32>
    %494 = arith.mulf %489, %493 : vector<2x32xf32>
    %c7 = arith.constant 7 : index
    %c0_119 = arith.constant 0 : index
    %c0_120 = arith.constant 0 : index
    %495 = vector.load %arg21[%c7, %c0_119, %c0_120] : memref<8x2x64xf32, #tpu.memory_space<vmem>>, vector<1x2x32xf32>
    %496 = vector.shape_cast %495 : vector<1x2x32xf32> to vector<2x32xf32>
    %497 = vector.shape_cast %494 : vector<2x32xf32> to vector<1x2x32xf32>
    tpu.vector_store %arg21[%c7, %c0_119, %c0_120], %497 {strides = array<i32>} : memref<8x2x64xf32, #tpu.memory_space<vmem>>, vector<1x2x32xf32>,
    %c0_121 = arith.constant 0 : index
    %c0_122 = arith.constant 0 : index
    %498 = vector.load %arg11[%c0_121, %c0_122] : memref<64x128xf32, #tpu.memory_space<vmem>>, vector<64x128xf32>
    %cst_123 = arith.constant dense<0.000000e+00> : vector<16x128xf32>
    %499 = tpu.matmul %321, %498, %cst_123 {dimension_numbers = #tpu.dot_dimension_numbers<[1], [0], [0], [1], [0, 0, 1, 1], [], []>} : vector<16x64xf32>, vector<64x128xf32>, vector<16x128xf32> -> vector<16x128xf32>
    %c0_124 = arith.constant 0 : index
    %c0_125 = arith.constant 0 : index
    %500 = vector.load %arg13[%c0_124, %c0_125] : memref<1x128xf32, #tpu.memory_space<vmem>>, vector<1x128xf32>
    %501 = vector.broadcast %500 : vector<1x128xf32> to vector<16x128xf32>
    %502 = arith.addf %499, %501 : vector<16x128xf32>
    %c0_126 = arith.constant 0 : index
    %c0_127 = arith.constant 0 : index
    %503 = vector.load %arg12[%c0_126, %c0_127] : memref<32x128xf32, #tpu.memory_space<vmem>>, vector<32x128xf32>
    %cst_128 = arith.constant 0.000000e+00 : f32
    %504 = vector.broadcast %cst_128 : f32 to vector<2x32xf32>
    %cst_129 = arith.constant 0.000000e+00 : f32
    %505 = vector.broadcast %cst_129 : f32 to vector<2x32xf32>
    %506 = vector.extract_strided_slice %502 {offsets = [14, 0], sizes = [2, 128], strides = [1, 1]} : vector<16x128xf32> to vector<2x128xf32>
    %cst_130 = arith.constant dense<0.000000e+00> : vector<2x128xf32>
    %507 = tpu.matmul %504, %503, %cst_130 {dimension_numbers = #tpu.dot_dimension_numbers<[1], [0], [0], [1], [0, 0, 1, 1], [], []>} : vector<2x32xf32>, vector<32x128xf32>, vector<2x128xf32> -> vector<2x128xf32>
    %508 = arith.addf %506, %507 : vector<2x128xf32>
    %509 = arith.negf %508 : vector<2x128xf32>
    %510 = math.exp %509 : vector<2x128xf32>
    %cst_131 = arith.constant 1.000000e+00 : f32
    %511 = vector.broadcast %cst_131 : f32 to vector<2x128xf32>
    %512 = arith.addf %511, %510 : vector<2x128xf32>
    %513 = arith.divf %511, %512 : vector<2x128xf32>
    %514 = math.tanh %508 : vector<2x128xf32>
    %515 = vector.extract_strided_slice %513 {offsets = [0, 0], sizes = [2, 32], strides = [1, 1]} : vector<2x128xf32> to vector<2x32xf32>
    %516 = vector.extract_strided_slice %513 {offsets = [0, 32], sizes = [2, 32], strides = [1, 1]} : vector<2x128xf32> to vector<2x32xf32>
    %517 = vector.extract_strided_slice %514 {offsets = [0, 64], sizes = [2, 32], strides = [1, 1]} : vector<2x128xf32> to vector<2x32xf32>
    %518 = vector.extract_strided_slice %513 {offsets = [0, 96], sizes = [2, 32], strides = [1, 1]} : vector<2x128xf32> to vector<2x32xf32>
    %519 = arith.mulf %516, %505 : vector<2x32xf32>
    %520 = arith.mulf %515, %517 : vector<2x32xf32>
    %521 = arith.addf %519, %520 : vector<2x32xf32>
    %522 = math.tanh %521 : vector<2x32xf32>
    %523 = arith.mulf %518, %522 : vector<2x32xf32>
    %c7_132 = arith.constant 7 : index
    %c0_133 = arith.constant 0 : index
    %c32_134 = arith.constant 32 : index
    %524 = vector.load %arg21[%c7_132, %c0_133, %c32_134] : memref<8x2x64xf32, #tpu.memory_space<vmem>>, vector<1x2x32xf32>
    %525 = vector.shape_cast %524 : vector<1x2x32xf32> to vector<2x32xf32>
    %526 = vector.shape_cast %523 : vector<2x32xf32> to vector<1x2x32xf32>
    tpu.vector_store %arg21[%c7_132, %c0_133, %c32_134], %526 {strides = array<i32>} : memref<8x2x64xf32, #tpu.memory_space<vmem>>, vector<1x2x32xf32>,
    %527 = vector.extract_strided_slice %502 {offsets = [12, 0], sizes = [2, 128], strides = [1, 1]} : vector<16x128xf32> to vector<2x128xf32>
    %cst_135 = arith.constant dense<0.000000e+00> : vector<2x128xf32>
    %528 = tpu.matmul %523, %503, %cst_135 {dimension_numbers = #tpu.dot_dimension_numbers<[1], [0], [0], [1], [0, 0, 1, 1], [], []>} : vector<2x32xf32>, vector<32x128xf32>, vector<2x128xf32> -> vector<2x128xf32>
    %529 = arith.addf %527, %528 : vector<2x128xf32>
    %530 = arith.negf %529 : vector<2x128xf32>
    %531 = math.exp %530 : vector<2x128xf32>
    %cst_136 = arith.constant 1.000000e+00 : f32
    %532 = vector.broadcast %cst_136 : f32 to vector<2x128xf32>
    %533 = arith.addf %532, %531 : vector<2x128xf32>
    %534 = arith.divf %532, %533 : vector<2x128xf32>
    %535 = math.tanh %529 : vector<2x128xf32>
    %536 = vector.extract_strided_slice %534 {offsets = [0, 0], sizes = [2, 32], strides = [1, 1]} : vector<2x128xf32> to vector<2x32xf32>
    %537 = vector.extract_strided_slice %534 {offsets = [0, 32], sizes = [2, 32], strides = [1, 1]} : vector<2x128xf32> to vector<2x32xf32>
    %538 = vector.extract_strided_slice %535 {offsets = [0, 64], sizes = [2, 32], strides = [1, 1]} : vector<2x128xf32> to vector<2x32xf32>
    %539 = vector.extract_strided_slice %534 {offsets = [0, 96], sizes = [2, 32], strides = [1, 1]} : vector<2x128xf32> to vector<2x32xf32>
    %540 = arith.mulf %537, %521 : vector<2x32xf32>
    %541 = arith.mulf %536, %538 : vector<2x32xf32>
    %542 = arith.addf %540, %541 : vector<2x32xf32>
    %543 = math.tanh %542 : vector<2x32xf32>
    %544 = arith.mulf %539, %543 : vector<2x32xf32>
    %c6_137 = arith.constant 6 : index
    %c0_138 = arith.constant 0 : index
    %c32_139 = arith.constant 32 : index
    %545 = vector.load %arg21[%c6_137, %c0_138, %c32_139] : memref<8x2x64xf32, #tpu.memory_space<vmem>>, vector<1x2x32xf32>
    %546 = vector.shape_cast %545 : vector<1x2x32xf32> to vector<2x32xf32>
    %547 = vector.shape_cast %544 : vector<2x32xf32> to vector<1x2x32xf32>
    tpu.vector_store %arg21[%c6_137, %c0_138, %c32_139], %547 {strides = array<i32>} : memref<8x2x64xf32, #tpu.memory_space<vmem>>, vector<1x2x32xf32>,
    %548 = vector.extract_strided_slice %502 {offsets = [10, 0], sizes = [2, 128], strides = [1, 1]} : vector<16x128xf32> to vector<2x128xf32>
    %cst_140 = arith.constant dense<0.000000e+00> : vector<2x128xf32>
    %549 = tpu.matmul %544, %503, %cst_140 {dimension_numbers = #tpu.dot_dimension_numbers<[1], [0], [0], [1], [0, 0, 1, 1], [], []>} : vector<2x32xf32>, vector<32x128xf32>, vector<2x128xf32> -> vector<2x128xf32>
    %550 = arith.addf %548, %549 : vector<2x128xf32>
    %551 = arith.negf %550 : vector<2x128xf32>
    %552 = math.exp %551 : vector<2x128xf32>
    %cst_141 = arith.constant 1.000000e+00 : f32
    %553 = vector.broadcast %cst_141 : f32 to vector<2x128xf32>
    %554 = arith.addf %553, %552 : vector<2x128xf32>
    %555 = arith.divf %553, %554 : vector<2x128xf32>
    %556 = math.tanh %550 : vector<2x128xf32>
    %557 = vector.extract_strided_slice %555 {offsets = [0, 0], sizes = [2, 32], strides = [1, 1]} : vector<2x128xf32> to vector<2x32xf32>
    %558 = vector.extract_strided_slice %555 {offsets = [0, 32], sizes = [2, 32], strides = [1, 1]} : vector<2x128xf32> to vector<2x32xf32>
    %559 = vector.extract_strided_slice %556 {offsets = [0, 64], sizes = [2, 32], strides = [1, 1]} : vector<2x128xf32> to vector<2x32xf32>
    %560 = vector.extract_strided_slice %555 {offsets = [0, 96], sizes = [2, 32], strides = [1, 1]} : vector<2x128xf32> to vector<2x32xf32>
    %561 = arith.mulf %558, %542 : vector<2x32xf32>
    %562 = arith.mulf %557, %559 : vector<2x32xf32>
    %563 = arith.addf %561, %562 : vector<2x32xf32>
    %564 = math.tanh %563 : vector<2x32xf32>
    %565 = arith.mulf %560, %564 : vector<2x32xf32>
    %c5_142 = arith.constant 5 : index
    %c0_143 = arith.constant 0 : index
    %c32_144 = arith.constant 32 : index
    %566 = vector.load %arg21[%c5_142, %c0_143, %c32_144] : memref<8x2x64xf32, #tpu.memory_space<vmem>>, vector<1x2x32xf32>
    %567 = vector.shape_cast %566 : vector<1x2x32xf32> to vector<2x32xf32>
    %568 = vector.shape_cast %565 : vector<2x32xf32> to vector<1x2x32xf32>
    tpu.vector_store %arg21[%c5_142, %c0_143, %c32_144], %568 {strides = array<i32>} : memref<8x2x64xf32, #tpu.memory_space<vmem>>, vector<1x2x32xf32>,
    %569 = vector.extract_strided_slice %502 {offsets = [8, 0], sizes = [2, 128], strides = [1, 1]} : vector<16x128xf32> to vector<2x128xf32>
    %cst_145 = arith.constant dense<0.000000e+00> : vector<2x128xf32>
    %570 = tpu.matmul %565, %503, %cst_145 {dimension_numbers = #tpu.dot_dimension_numbers<[1], [0], [0], [1], [0, 0, 1, 1], [], []>} : vector<2x32xf32>, vector<32x128xf32>, vector<2x128xf32> -> vector<2x128xf32>
    %571 = arith.addf %569, %570 : vector<2x128xf32>
    %572 = arith.negf %571 : vector<2x128xf32>
    %573 = math.exp %572 : vector<2x128xf32>
    %cst_146 = arith.constant 1.000000e+00 : f32
    %574 = vector.broadcast %cst_146 : f32 to vector<2x128xf32>
    %575 = arith.addf %574, %573 : vector<2x128xf32>
    %576 = arith.divf %574, %575 : vector<2x128xf32>
    %577 = math.tanh %571 : vector<2x128xf32>
    %578 = vector.extract_strided_slice %576 {offsets = [0, 0], sizes = [2, 32], strides = [1, 1]} : vector<2x128xf32> to vector<2x32xf32>
    %579 = vector.extract_strided_slice %576 {offsets = [0, 32], sizes = [2, 32], strides = [1, 1]} : vector<2x128xf32> to vector<2x32xf32>
    %580 = vector.extract_strided_slice %577 {offsets = [0, 64], sizes = [2, 32], strides = [1, 1]} : vector<2x128xf32> to vector<2x32xf32>
    %581 = vector.extract_strided_slice %576 {offsets = [0, 96], sizes = [2, 32], strides = [1, 1]} : vector<2x128xf32> to vector<2x32xf32>
    %582 = arith.mulf %579, %563 : vector<2x32xf32>
    %583 = arith.mulf %578, %580 : vector<2x32xf32>
    %584 = arith.addf %582, %583 : vector<2x32xf32>
    %585 = math.tanh %584 : vector<2x32xf32>
    %586 = arith.mulf %581, %585 : vector<2x32xf32>
    %c4_147 = arith.constant 4 : index
    %c0_148 = arith.constant 0 : index
    %c32_149 = arith.constant 32 : index
    %587 = vector.load %arg21[%c4_147, %c0_148, %c32_149] : memref<8x2x64xf32, #tpu.memory_space<vmem>>, vector<1x2x32xf32>
    %588 = vector.shape_cast %587 : vector<1x2x32xf32> to vector<2x32xf32>
    %589 = vector.shape_cast %586 : vector<2x32xf32> to vector<1x2x32xf32>
    tpu.vector_store %arg21[%c4_147, %c0_148, %c32_149], %589 {strides = array<i32>} : memref<8x2x64xf32, #tpu.memory_space<vmem>>, vector<1x2x32xf32>,
    %590 = vector.extract_strided_slice %502 {offsets = [6, 0], sizes = [2, 128], strides = [1, 1]} : vector<16x128xf32> to vector<2x128xf32>
    %cst_150 = arith.constant dense<0.000000e+00> : vector<2x128xf32>
    %591 = tpu.matmul %586, %503, %cst_150 {dimension_numbers = #tpu.dot_dimension_numbers<[1], [0], [0], [1], [0, 0, 1, 1], [], []>} : vector<2x32xf32>, vector<32x128xf32>, vector<2x128xf32> -> vector<2x128xf32>
    %592 = arith.addf %590, %591 : vector<2x128xf32>
    %593 = arith.negf %592 : vector<2x128xf32>
    %594 = math.exp %593 : vector<2x128xf32>
    %cst_151 = arith.constant 1.000000e+00 : f32
    %595 = vector.broadcast %cst_151 : f32 to vector<2x128xf32>
    %596 = arith.addf %595, %594 : vector<2x128xf32>
    %597 = arith.divf %595, %596 : vector<2x128xf32>
    %598 = math.tanh %592 : vector<2x128xf32>
    %599 = vector.extract_strided_slice %597 {offsets = [0, 0], sizes = [2, 32], strides = [1, 1]} : vector<2x128xf32> to vector<2x32xf32>
    %600 = vector.extract_strided_slice %597 {offsets = [0, 32], sizes = [2, 32], strides = [1, 1]} : vector<2x128xf32> to vector<2x32xf32>
    %601 = vector.extract_strided_slice %598 {offsets = [0, 64], sizes = [2, 32], strides = [1, 1]} : vector<2x128xf32> to vector<2x32xf32>
    %602 = vector.extract_strided_slice %597 {offsets = [0, 96], sizes = [2, 32], strides = [1, 1]} : vector<2x128xf32> to vector<2x32xf32>
    %603 = arith.mulf %600, %584 : vector<2x32xf32>
    %604 = arith.mulf %599, %601 : vector<2x32xf32>
    %605 = arith.addf %603, %604 : vector<2x32xf32>
    %606 = math.tanh %605 : vector<2x32xf32>
    %607 = arith.mulf %602, %606 : vector<2x32xf32>
    %c3_152 = arith.constant 3 : index
    %c0_153 = arith.constant 0 : index
    %c32_154 = arith.constant 32 : index
    %608 = vector.load %arg21[%c3_152, %c0_153, %c32_154] : memref<8x2x64xf32, #tpu.memory_space<vmem>>, vector<1x2x32xf32>
    %609 = vector.shape_cast %608 : vector<1x2x32xf32> to vector<2x32xf32>
    %610 = vector.shape_cast %607 : vector<2x32xf32> to vector<1x2x32xf32>
    tpu.vector_store %arg21[%c3_152, %c0_153, %c32_154], %610 {strides = array<i32>} : memref<8x2x64xf32, #tpu.memory_space<vmem>>, vector<1x2x32xf32>,
    %611 = vector.extract_strided_slice %502 {offsets = [4, 0], sizes = [2, 128], strides = [1, 1]} : vector<16x128xf32> to vector<2x128xf32>
    %cst_155 = arith.constant dense<0.000000e+00> : vector<2x128xf32>
    %612 = tpu.matmul %607, %503, %cst_155 {dimension_numbers = #tpu.dot_dimension_numbers<[1], [0], [0], [1], [0, 0, 1, 1], [], []>} : vector<2x32xf32>, vector<32x128xf32>, vector<2x128xf32> -> vector<2x128xf32>
    %613 = arith.addf %611, %612 : vector<2x128xf32>
    %614 = arith.negf %613 : vector<2x128xf32>
    %615 = math.exp %614 : vector<2x128xf32>
    %cst_156 = arith.constant 1.000000e+00 : f32
    %616 = vector.broadcast %cst_156 : f32 to vector<2x128xf32>
    %617 = arith.addf %616, %615 : vector<2x128xf32>
    %618 = arith.divf %616, %617 : vector<2x128xf32>
    %619 = math.tanh %613 : vector<2x128xf32>
    %620 = vector.extract_strided_slice %618 {offsets = [0, 0], sizes = [2, 32], strides = [1, 1]} : vector<2x128xf32> to vector<2x32xf32>
    %621 = vector.extract_strided_slice %618 {offsets = [0, 32], sizes = [2, 32], strides = [1, 1]} : vector<2x128xf32> to vector<2x32xf32>
    %622 = vector.extract_strided_slice %619 {offsets = [0, 64], sizes = [2, 32], strides = [1, 1]} : vector<2x128xf32> to vector<2x32xf32>
    %623 = vector.extract_strided_slice %618 {offsets = [0, 96], sizes = [2, 32], strides = [1, 1]} : vector<2x128xf32> to vector<2x32xf32>
    %624 = arith.mulf %621, %605 : vector<2x32xf32>
    %625 = arith.mulf %620, %622 : vector<2x32xf32>
    %626 = arith.addf %624, %625 : vector<2x32xf32>
    %627 = math.tanh %626 : vector<2x32xf32>
    %628 = arith.mulf %623, %627 : vector<2x32xf32>
    %c2_157 = arith.constant 2 : index
    %c0_158 = arith.constant 0 : index
    %c32_159 = arith.constant 32 : index
    %629 = vector.load %arg21[%c2_157, %c0_158, %c32_159] : memref<8x2x64xf32, #tpu.memory_space<vmem>>, vector<1x2x32xf32>
    %630 = vector.shape_cast %629 : vector<1x2x32xf32> to vector<2x32xf32>
    %631 = vector.shape_cast %628 : vector<2x32xf32> to vector<1x2x32xf32>
    tpu.vector_store %arg21[%c2_157, %c0_158, %c32_159], %631 {strides = array<i32>} : memref<8x2x64xf32, #tpu.memory_space<vmem>>, vector<1x2x32xf32>,
    %632 = vector.extract_strided_slice %502 {offsets = [2, 0], sizes = [2, 128], strides = [1, 1]} : vector<16x128xf32> to vector<2x128xf32>
    %cst_160 = arith.constant dense<0.000000e+00> : vector<2x128xf32>
    %633 = tpu.matmul %628, %503, %cst_160 {dimension_numbers = #tpu.dot_dimension_numbers<[1], [0], [0], [1], [0, 0, 1, 1], [], []>} : vector<2x32xf32>, vector<32x128xf32>, vector<2x128xf32> -> vector<2x128xf32>
    %634 = arith.addf %632, %633 : vector<2x128xf32>
    %635 = arith.negf %634 : vector<2x128xf32>
    %636 = math.exp %635 : vector<2x128xf32>
    %cst_161 = arith.constant 1.000000e+00 : f32
    %637 = vector.broadcast %cst_161 : f32 to vector<2x128xf32>
    %638 = arith.addf %637, %636 : vector<2x128xf32>
    %639 = arith.divf %637, %638 : vector<2x128xf32>
    %640 = math.tanh %634 : vector<2x128xf32>
    %641 = vector.extract_strided_slice %639 {offsets = [0, 0], sizes = [2, 32], strides = [1, 1]} : vector<2x128xf32> to vector<2x32xf32>
    %642 = vector.extract_strided_slice %639 {offsets = [0, 32], sizes = [2, 32], strides = [1, 1]} : vector<2x128xf32> to vector<2x32xf32>
    %643 = vector.extract_strided_slice %640 {offsets = [0, 64], sizes = [2, 32], strides = [1, 1]} : vector<2x128xf32> to vector<2x32xf32>
    %644 = vector.extract_strided_slice %639 {offsets = [0, 96], sizes = [2, 32], strides = [1, 1]} : vector<2x128xf32> to vector<2x32xf32>
    %645 = arith.mulf %642, %626 : vector<2x32xf32>
    %646 = arith.mulf %641, %643 : vector<2x32xf32>
    %647 = arith.addf %645, %646 : vector<2x32xf32>
    %648 = math.tanh %647 : vector<2x32xf32>
    %649 = arith.mulf %644, %648 : vector<2x32xf32>
    %c1_162 = arith.constant 1 : index
    %c0_163 = arith.constant 0 : index
    %c32_164 = arith.constant 32 : index
    %650 = vector.load %arg21[%c1_162, %c0_163, %c32_164] : memref<8x2x64xf32, #tpu.memory_space<vmem>>, vector<1x2x32xf32>
    %651 = vector.shape_cast %650 : vector<1x2x32xf32> to vector<2x32xf32>
    %652 = vector.shape_cast %649 : vector<2x32xf32> to vector<1x2x32xf32>
    tpu.vector_store %arg21[%c1_162, %c0_163, %c32_164], %652 {strides = array<i32>} : memref<8x2x64xf32, #tpu.memory_space<vmem>>, vector<1x2x32xf32>,
    %653 = vector.extract_strided_slice %502 {offsets = [0, 0], sizes = [2, 128], strides = [1, 1]} : vector<16x128xf32> to vector<2x128xf32>
    %cst_165 = arith.constant dense<0.000000e+00> : vector<2x128xf32>
    %654 = tpu.matmul %649, %503, %cst_165 {dimension_numbers = #tpu.dot_dimension_numbers<[1], [0], [0], [1], [0, 0, 1, 1], [], []>} : vector<2x32xf32>, vector<32x128xf32>, vector<2x128xf32> -> vector<2x128xf32>
    %655 = arith.addf %653, %654 : vector<2x128xf32>
    %656 = arith.negf %655 : vector<2x128xf32>
    %657 = math.exp %656 : vector<2x128xf32>
    %cst_166 = arith.constant 1.000000e+00 : f32
    %658 = vector.broadcast %cst_166 : f32 to vector<2x128xf32>
    %659 = arith.addf %658, %657 : vector<2x128xf32>
    %660 = arith.divf %658, %659 : vector<2x128xf32>
    %661 = math.tanh %655 : vector<2x128xf32>
    %662 = vector.extract_strided_slice %660 {offsets = [0, 0], sizes = [2, 32], strides = [1, 1]} : vector<2x128xf32> to vector<2x32xf32>
    %663 = vector.extract_strided_slice %660 {offsets = [0, 32], sizes = [2, 32], strides = [1, 1]} : vector<2x128xf32> to vector<2x32xf32>
    %664 = vector.extract_strided_slice %661 {offsets = [0, 64], sizes = [2, 32], strides = [1, 1]} : vector<2x128xf32> to vector<2x32xf32>
    %665 = vector.extract_strided_slice %660 {offsets = [0, 96], sizes = [2, 32], strides = [1, 1]} : vector<2x128xf32> to vector<2x32xf32>
    %666 = arith.mulf %663, %647 : vector<2x32xf32>
    %667 = arith.mulf %662, %664 : vector<2x32xf32>
    %668 = arith.addf %666, %667 : vector<2x32xf32>
    %669 = math.tanh %668 : vector<2x32xf32>
    %670 = arith.mulf %665, %669 : vector<2x32xf32>
    %c0_167 = arith.constant 0 : index
    %c0_168 = arith.constant 0 : index
    %c32_169 = arith.constant 32 : index
    %671 = vector.load %arg21[%c0_167, %c0_168, %c32_169] : memref<8x2x64xf32, #tpu.memory_space<vmem>>, vector<1x2x32xf32>
    %672 = vector.shape_cast %671 : vector<1x2x32xf32> to vector<2x32xf32>
    %673 = vector.shape_cast %670 : vector<2x32xf32> to vector<1x2x32xf32>
    tpu.vector_store %arg21[%c0_167, %c0_168, %c32_169], %673 {strides = array<i32>} : memref<8x2x64xf32, #tpu.memory_space<vmem>>, vector<1x2x32xf32>,
    %c0_170 = arith.constant 0 : index
    %c0_171 = arith.constant 0 : index
    %c0_172 = arith.constant 0 : index
    %674 = vector.load %arg21[%c0_170, %c0_171, %c0_172] : memref<8x2x64xf32, #tpu.memory_space<vmem>>, vector<8x2x64xf32>
    %675 = math.tanh %674 : vector<8x2x64xf32>
    %c0_173 = arith.constant 0 : index
    %c0_174 = arith.constant 0 : index
    %676 = vector.load %arg14[%c0_173, %c0_174] : memref<1x64xf32, #tpu.memory_space<vmem>>, vector<1x64xf32>
    %677 = vector.shape_cast %676 : vector<1x64xf32> to vector<1x1x64xf32>
    %678 = vector.broadcast %677 : vector<1x1x64xf32> to vector<8x2x64xf32>
    %679 = arith.mulf %675, %678 : vector<8x2x64xf32>
    %cst_175 = arith.constant dense<0.000000e+00> : vector<8x2xf32>
    %680 = vector.multi_reduction <add>, %679, %cst_175 [2] : vector<8x2x64xf32> to vector<8x2xf32>
    %681 = vector.shape_cast %680 : vector<8x2xf32> to vector<8x2x1xf32>
    %cst_176 = arith.constant dense<0xFF800000> : vector<2x1xf32>
    %682 = vector.multi_reduction <maximumf>, %681, %cst_176 [0] : vector<8x2x1xf32> to vector<2x1xf32>
    %683 = vector.shape_cast %682 : vector<2x1xf32> to vector<1x2x1xf32>
    %684 = vector.broadcast %683 : vector<1x2x1xf32> to vector<8x2x1xf32>
    %685 = arith.subf %681, %684 : vector<8x2x1xf32>
    %686 = math.exp %685 : vector<8x2x1xf32>
    %cst_177 = arith.constant dense<0.000000e+00> : vector<2x1xf32>
    %687 = vector.multi_reduction <add>, %686, %cst_177 [0] : vector<8x2x1xf32> to vector<2x1xf32>
    %688 = vector.shape_cast %687 : vector<2x1xf32> to vector<1x2x1xf32>
    %689 = tpu.reciprocal %688 {approx = true} : vector<1x2x1xf32> -> vector<1x2x1xf32>
    %690 = vector.broadcast %689 : vector<1x2x1xf32> to vector<8x2x1xf32>
    %691 = arith.mulf %686, %690 : vector<8x2x1xf32>
    %692 = vector.broadcast %691 : vector<8x2x1xf32> to vector<8x2x64xf32>
    %693 = arith.mulf %674, %692 : vector<8x2x64xf32>
    %cst_178 = arith.constant dense<0.000000e+00> : vector<2x64xf32>
    %694 = vector.multi_reduction <add>, %693, %cst_178 [0] : vector<8x2x64xf32> to vector<2x64xf32>
    %cst_179 = arith.constant 0.000000e+00 : f32
    %695 = vector.broadcast %cst_179 : f32 to vector<2x64xf32>
    %696 = arith.maximumf %694, %695 : vector<2x64xf32>
    %c0_180 = arith.constant 0 : index
    %c0_181 = arith.constant 0 : index
    %697 = vector.load %arg15[%c0_180, %c0_181] : memref<64x64xf32, #tpu.memory_space<vmem>>, vector<64x64xf32>
    %cst_182 = arith.constant dense<0.000000e+00> : vector<2x64xf32>
    %698 = tpu.matmul %696, %697, %cst_182 {dimension_numbers = #tpu.dot_dimension_numbers<[1], [0], [0], [1], [0, 0, 1, 1], [], []>} : vector<2x64xf32>, vector<64x64xf32>, vector<2x64xf32> -> vector<2x64xf32>
    %c0_183 = arith.constant 0 : index
    %c0_184 = arith.constant 0 : index
    %699 = vector.load %arg16[%c0_183, %c0_184] : memref<1x64xf32, #tpu.memory_space<vmem>>, vector<1x64xf32>
    %700 = vector.broadcast %699 : vector<1x64xf32> to vector<2x64xf32>
    %701 = arith.addf %698, %700 : vector<2x64xf32>
    %c0_185 = arith.constant 0 : index
    %c0_186 = arith.constant 0 : index
    %702 = vector.load %arg17[%c0_185, %c0_186] : memref<64x10xf32, #tpu.memory_space<vmem>>, vector<64x10xf32>
    %cst_187 = arith.constant dense<0.000000e+00> : vector<2x10xf32>
    %703 = tpu.matmul %701, %702, %cst_187 {dimension_numbers = #tpu.dot_dimension_numbers<[1], [0], [0], [1], [0, 0, 1, 1], [], []>} : vector<2x64xf32>, vector<64x10xf32>, vector<2x10xf32> -> vector<2x10xf32>
    %c0_188 = arith.constant 0 : index
    %c0_189 = arith.constant 0 : index
    %704 = vector.load %arg18[%c0_188, %c0_189] : memref<1x10xf32, #tpu.memory_space<vmem>>, vector<1x10xf32>
    %705 = vector.broadcast %704 : vector<1x10xf32> to vector<2x10xf32>
    %706 = arith.addf %703, %705 : vector<2x10xf32>
    %c0_190 = arith.constant 0 : index
    %c0_191 = arith.constant 0 : index
    %707 = vector.load %arg19[%c0_190, %c0_191] : memref<2x10xf32, #tpu.memory_space<vmem>>, vector<2x10xf32>
    tpu.vector_store %arg19[%c0_190, %c0_191], %706 {strides = array<i32>} : memref<2x10xf32, #tpu.memory_space<vmem>>, vector<2x10xf32>,
    return
  }
  func.func @transform_0(%arg0: i32) -> (i32, i32) {
    %c0_i32 = arith.constant 0 : i32
    %c0_i32_0 = arith.constant 0 : i32
    %c0_i32_1 = arith.constant 0 : i32
    return %c0_i32, %c0_i32_0 : i32, i32
  }
  func.func @transform_1(%arg0: i32) -> (i32, i32) {
    %c0_i32 = arith.constant 0 : i32
    %c0_i32_0 = arith.constant 0 : i32
    %c0_i32_1 = arith.constant 0 : i32
    return %c0_i32, %c0_i32_0 : i32, i32
  }
  func.func @transform_2(%arg0: i32) -> (i32, i32) {
    %c0_i32 = arith.constant 0 : i32
    %c0_i32_0 = arith.constant 0 : i32
    %c0_i32_1 = arith.constant 0 : i32
    return %c0_i32, %c0_i32_0 : i32, i32
  }
  func.func @transform_3(%arg0: i32) -> (i32, i32) {
    %c0_i32 = arith.constant 0 : i32
    %c0_i32_0 = arith.constant 0 : i32
    %c0_i32_1 = arith.constant 0 : i32
    return %c0_i32, %c0_i32_0 : i32, i32
  }
  func.func @transform_4(%arg0: i32) -> (i32, i32) {
    %c0_i32 = arith.constant 0 : i32
    %c0_i32_0 = arith.constant 0 : i32
    %c0_i32_1 = arith.constant 0 : i32
    return %c0_i32, %c0_i32_0 : i32, i32
  }
  func.func @transform_5(%arg0: i32) -> (i32, i32) {
    %c0_i32 = arith.constant 0 : i32
    %c0_i32_0 = arith.constant 0 : i32
    %c0_i32_1 = arith.constant 0 : i32
    return %c0_i32, %c0_i32_0 : i32, i32
  }
  func.func @transform_6(%arg0: i32) -> (i32, i32) {
    %c0_i32 = arith.constant 0 : i32
    %c0_i32_0 = arith.constant 0 : i32
    %c0_i32_1 = arith.constant 0 : i32
    return %c0_i32, %c0_i32_0 : i32, i32
  }
  func.func @transform_7(%arg0: i32) -> (i32, i32) {
    %c0_i32 = arith.constant 0 : i32
    %c0_i32_0 = arith.constant 0 : i32
    %c0_i32_1 = arith.constant 0 : i32
    return %c0_i32, %c0_i32_0 : i32, i32
  }
  func.func @transform_8(%arg0: i32) -> (i32, i32) {
    %c0_i32 = arith.constant 0 : i32
    %c0_i32_0 = arith.constant 0 : i32
    %c0_i32_1 = arith.constant 0 : i32
    return %c0_i32, %c0_i32_0 : i32, i32
  }
  func.func @transform_9(%arg0: i32) -> (i32, i32) {
    %c0_i32 = arith.constant 0 : i32
    %c0_i32_0 = arith.constant 0 : i32
    %c0_i32_1 = arith.constant 0 : i32
    return %c0_i32, %c0_i32_0 : i32, i32
  }
  func.func @transform_10(%arg0: i32) -> (i32, i32) {
    %c0_i32 = arith.constant 0 : i32
    %c0_i32_0 = arith.constant 0 : i32
    %c0_i32_1 = arith.constant 0 : i32
    return %c0_i32, %c0_i32_0 : i32, i32
  }
  func.func @transform_11(%arg0: i32) -> (i32, i32) {
    %c0_i32 = arith.constant 0 : i32
    %c0_i32_0 = arith.constant 0 : i32
    %c0_i32_1 = arith.constant 0 : i32
    return %c0_i32, %c0_i32_0 : i32, i32
  }
  func.func @transform_12(%arg0: i32) -> (i32, i32) {
    %c0_i32 = arith.constant 0 : i32
    %c0_i32_0 = arith.constant 0 : i32
    %c0_i32_1 = arith.constant 0 : i32
    return %c0_i32, %c0_i32_0 : i32, i32
  }
  func.func @transform_13(%arg0: i32) -> (i32, i32) {
    %c0_i32 = arith.constant 0 : i32
    %c0_i32_0 = arith.constant 0 : i32
    %c0_i32_1 = arith.constant 0 : i32
    return %c0_i32, %c0_i32_0 : i32, i32
  }
  func.func @transform_14(%arg0: i32) -> (i32, i32) {
    %c0_i32 = arith.constant 0 : i32
    %c0_i32_0 = arith.constant 0 : i32
    %c0_i32_1 = arith.constant 0 : i32
    return %c0_i32, %c0_i32_0 : i32, i32
  }
  func.func @transform_15(%arg0: i32) -> (i32, i32) {
    %c0_i32 = arith.constant 0 : i32
    %c0_i32_0 = arith.constant 0 : i32
    %c0_i32_1 = arith.constant 0 : i32
    return %c0_i32, %c0_i32_0 : i32, i32
  }
  func.func @transform_16(%arg0: i32) -> (i32, i32) {
    %c0_i32 = arith.constant 0 : i32
    %c0_i32_0 = arith.constant 0 : i32
    %c0_i32_1 = arith.constant 0 : i32
    return %c0_i32, %c0_i32_0 : i32, i32
  }
  func.func @transform_17(%arg0: i32) -> (i32, i32) {
    %c0_i32 = arith.constant 0 : i32
    %c0_i32_0 = arith.constant 0 : i32
    %c0_i32_1 = arith.constant 0 : i32
    return %c0_i32, %c0_i32_0 : i32, i32
  }
  func.func @transform_18(%arg0: i32) -> (i32, i32) {
    %c0_i32 = arith.constant 0 : i32
    %c0_i32_0 = arith.constant 0 : i32
    %c0_i32_1 = arith.constant 0 : i32
    return %c0_i32, %c0_i32_0 : i32, i32
  }
}

</mosaic_0001>

<bundles_post_ra>
// kernel: tpu_custom_call.1
= control target key start
LH: loop header
LB: loop body
LE: loop exit
PB: predicated region body
PF: predicated region fallthrough
CT: control target
= control target key end

     0   :  { %s6815_s0 = inlined_call_operand.hbm [shape: f32[16,16], index: 0, kind: input, shape index: {}]   ;;  %s6816_s1 = inlined_call_operand.hbm [shape: f32[16,128], index: 1, kind: input, shape index: {}]   ;;  %s6817_s2 = inlined_call_operand.hbm [shape: f32[32,128], index: 2, kind: input, shape index: {}]   ;;  %s6818_s3 = inlined_call_operand.hbm [shape: f32[1,128], index: 3, kind: input, shape index: {}]   ;;  %s6819_s4 = inlined_call_operand.hbm [shape: f32[16,128], index: 4, kind: input, shape index: {}]   ;;  %s6820_s5 = inlined_call_operand.hbm [shape: f32[32,128], index: 5, kind: input, shape index: {}]   ;;  %s6821_s6 = inlined_call_operand.hbm [shape: f32[1,128], index: 6, kind: input, shape index: {}]   ;;  %s6822_s7 = inlined_call_operand.vmem [shape: f32[64,128], index: 7, kind: input, shape index: {}]   ;;  %s6823_s8 = inlined_call_operand.hbm [shape: f32[32,128], index: 8, kind: input, shape index: {}]   ;;  %s6824_s9 = inlined_call_operand.hbm [shape: f32[1,128], index: 9, kind: input, shape index: {}]   ;;  %s6825_s10 = inlined_call_operand.hbm [shape: f32[64,128], index: 10, kind: input, shape index: {}]   ;;  %s6826_s11 = inlined_call_operand.vmem [shape: f32[32,128], index: 11, kind: input, shape index: {}]   ;;  %s6827_s12 = inlined_call_operand.vmem [shape: f32[1,128], index: 12, kind: input, shape index: {}]   ;;  %s6828_s13 = inlined_call_operand.vmem [shape: f32[1,64], index: 13, kind: input, shape index: {}]   ;;  %s6829_s14 = inlined_call_operand.hbm [shape: f32[64,64], index: 14, kind: input, shape index: {}]   ;;  %s6830_s15 = inlined_call_operand.vmem [shape: f32[1,64], index: 15, kind: input, shape index: {}]   ;;  %s6831_s16 = inlined_call_operand.vmem [shape: f32[64,10], index: 16, kind: input, shape index: {}]   ;;  %s6832_s17 = inlined_call_operand.vmem [shape: f32[1,10], index: 17, kind: input, shape index: {}]   ;;  %s6833_s18 = inlined_call_operand.hbm [shape: f32[2,10], index: 18, kind: output, shape index: {}]  }
   0x1   :  { %6834 = sst [smem:[#allocation30_spill]] %s6815_s0 }
   0x2   :  { %6835 = sst [smem:[#allocation31_spill]] %s6816_s1 }
   0x3   :  { %6836 = sst [smem:[#allocation32_spill]] %s6817_s2 }
   0x4   :  { %23 = vsyncpa [#allocation5], 0 }
   0x5   :  { %24 = vsyncpa [#allocation8], 0 }
   0x6   :  { %25 = vsyncpa [#allocation11], 0 }
   0x7   :  { %26 = vsyncpa [#allocation14], 0 }
   0x8   :  { %27 = vsyncpa [#allocation17], 0 }
   0x9   :  { %28 = vsyncpa [#allocation20], 0 }
   0xa   :  { %29 = vsyncpa [#allocation6], 0  ;;  %s5715_s27 = smov [#allocation7]   ;;  %s5716_s29 = smov [#allocation10]  }
   0xb   :  { %s47_s28 = sshll.u32 %s5715_s27, 4  ;;  %s72_s30 = sshll.u32 %s5716_s29, 4  ;;  %s48_s28 = int_to_ptr.vmem [resolvable:$true] %s47_s28  ;;  %s73_s30 = int_to_ptr.vmem [resolvable:$true] %s72_s30 }
   0xc   :  { %s5469_s0 = scalar_lea.vmem %s48_s28, 256  ;;  %p5474_p1 = scmp.lt.s32.totalorder %s48_s28, %s48_s28 }
   0xd   :  { %p5470_p0 = scmp.ne.s32.totalorder %s48_s28, %s5469_s0  ;;  %p5475_p2 = scmp.lt.s32.totalorder %s5469_s0, %s5469_s0 }
   0xf   :  { %p5476_p3 = por %p5475_p2, %p5474_p1 }
  0x11   :  { %p5477_p4 = pnand %p5476_p3, %p5470_p0 }
  0x13   :  { %5480 = shalt.err (!%p5477_p4)
}
  0x14   :  { %s5717_s19 = smov 128   ;;  %s5718_s1 = smov 8  }
  0x15   :  { %s6837_s22 = sld [smem:[#allocation31_spill]]  ;;  %s5489_s2 = scalar_lea.vmem %s73_s30, 16 }
  0x16   :  { %p5490_p5 = scmp.ne.s32.totalorder %s73_s30, %s5489_s2  ;;  %s5493_s23 = scalar_lea.vmem %s73_s30, 32 }
  0x17   :  { %p5494_p6 = scmp.lt.s32.totalorder %s73_s30, %s73_s30  ;;  %p5495_p7 = scmp.lt.s32.totalorder %s5493_s23, %s5489_s2 }
  0x19   :  { %p5496_p8 = por %p5495_p7, %p5494_p6 }
  0x1b   :  { %53 = dma.hbm_to_vmem [thread:$0]  %s6837_s22, 256, %s48_s28, [#allocation8], %s5717_s19, %s5717_s19, %s5718_s1  }
  0x1c   :  { %p5497_p9 = pnand %p5496_p8, %p5490_p5 }
  0x1e   :  { %5500 = shalt.err (!%p5497_p9)
}
  0x1f   :  { %75 = dma.hbm_to_vmem [thread:$0]  %s6818_s3, 16, %s73_s30, [#allocation11]  }
  0x20   :  { %s5719_s26 = smov [#allocation13]   ;;  %s5720_s29 = smov [#allocation16]  }
  0x21   :  { %s93_s27 = sshll.u32 %s5719_s26, 4  ;;  %s117_s0 = sshll.u32 %s5720_s29, 4  ;;  %s94_s27 = int_to_ptr.vmem [resolvable:$true] %s93_s27  ;;  %s118_s0 = int_to_ptr.vmem [resolvable:$true] %s117_s0 }
  0x22   :  { %s5509_s20 = scalar_lea.vmem %s94_s27, 512  ;;  %p5514_p11 = scmp.lt.s32.totalorder %s94_s27, %s94_s27 }
  0x23   :  { %p5510_p10 = scmp.ne.s32.totalorder %s94_s27, %s5509_s20  ;;  %p5515_p12 = scmp.lt.s32.totalorder %s5509_s20, %s5509_s20 }
  0x25   :  { %p5516_p13 = por %p5515_p12, %p5514_p11 }
  0x27   :  { %p5517_p0 = pnand %p5516_p13, %p5510_p10 }
  0x29   :  { %5520 = shalt.err (!%p5517_p0)
}
  0x2a   :  { %99 = dma.hbm_to_vmem [thread:$0]  %s6820_s5, 512, %s94_s27, [#allocation14], %s5717_s19, %s5717_s19, %s5718_s1  }
  0x2b   :  { %s5529_s3 = scalar_lea.vmem %s118_s0, 512  ;;  %p5534_p2 = scmp.lt.s32.totalorder %s118_s0, %s118_s0 }
  0x2c   :  { %p5530_p1 = scmp.ne.s32.totalorder %s118_s0, %s5529_s3  ;;  %p5535_p3 = scmp.lt.s32.totalorder %s5529_s3, %s5529_s3 }
  0x2e   :  { %p5536_p4 = por %p5535_p3, %p5534_p2 }
  0x30   :  { %p5537_p5 = pnand %p5536_p4, %p5530_p1 }
  0x32   :  { %5540 = shalt.err (!%p5537_p5)
}
  0x33   :  { %123 = dma.hbm_to_vmem [thread:$0]  %s6823_s8, 512, %s118_s0, [#allocation17], %s5717_s19, %s5717_s19, %s5718_s1  }
  0x34   :  { %s5721_s2 = smov [#allocation19]   ;;  %s5722_s24 = smov [#allocation4]  }
  0x35   :  { %s139_s23 = sshll.u32 %s5721_s2, 4  ;;  %s35_s25 = sshll.u32 %s5722_s24, 4  ;;  %s140_s23 = int_to_ptr.vmem [resolvable:$true] %s139_s23  ;;  %s36_s25 = int_to_ptr.vmem [resolvable:$true] %s35_s25 }
  0x36   :  { %s5549_s5 = scalar_lea.vmem %s140_s23, 1024  ;;  %p5554_p7 = scmp.lt.s32.totalorder %s140_s23, %s140_s23 }
  0x37   :  { %p5550_p6 = scmp.ne.s32.totalorder %s140_s23, %s5549_s5  ;;  %p5555_p8 = scmp.lt.s32.totalorder %s5549_s5, %s5549_s5 }
  0x39   :  { %p5556_p9 = por %p5555_p8, %p5554_p7 }
  0x3b   :  { %p5557_p10 = pnand %p5556_p9, %p5550_p6 }
  0x3d   :  { %5560 = shalt.err (!%p5557_p10)
}
  0x3e   :  { %145 = dma.hbm_to_vmem [thread:$0]  %s6825_s10, 1024, %s140_s23, [#allocation20], %s5717_s19, %s5717_s19, %s5718_s1  }
  0x3f   :  { %s5569_s8 = scalar_lea.vmem %s36_s25, 256  ;;  %p5574_p12 = scmp.lt.s32.totalorder %s36_s25, %s36_s25 }
  0x40   :  { %p5570_p11 = scmp.ne.s32.totalorder %s36_s25, %s5569_s8  ;;  %p5575_p13 = scmp.lt.s32.totalorder %s5569_s8, %s5569_s8 }
  0x42   :  { %p5576_p0 = por %p5575_p13, %p5574_p12 }
  0x44   :  { %p5577_p1 = pnand %p5576_p0, %p5570_p11 }
  0x46   :  { %5580 = shalt.err (!%p5577_p1)
}
  0x47   :  { %s6838_s20 = sld [smem:[#allocation30_spill]]  ;;  %s5723_s28 = smov [#allocation9]  }
  0x48   :  { %s59_s21 = sshll.u32 %s5723_s28, 4  ;;  %s5724_s3 = smov [#allocation12]   ;;  %s60_s21 = int_to_ptr.vmem [resolvable:$true] %s59_s21 }
  0x49   :  { %s81_s30 = sshll.u32 %s5724_s3, 4  ;;  %s5589_s10 = scalar_lea.vmem %s60_s21, 512  ;;  %s82_s30 = int_to_ptr.vmem [resolvable:$true] %s81_s30 }
  0x4a   :  { %p5590_p2 = scmp.ne.s32.totalorder %s60_s21, %s5589_s10  ;;  %p5594_p3 = scmp.lt.s32.totalorder %s60_s21, %s60_s21 }
  0x4b   :  { %p5595_p4 = scmp.lt.s32.totalorder %s5589_s10, %s5589_s10 }
  0x4d   :  { %41 = dma.hbm_to_vmem [thread:$0]  %s6838_s20, 256, %s36_s25, [#allocation5], %s5717_s19, %s5717_s19, %s5718_s1  }
  0x4e   :  { %p5596_p5 = por %p5595_p4, %p5594_p3 }
  0x50   :  { %p5597_p6 = pnand %p5596_p5, %p5590_p2 }
  0x52   :  { %5600 = shalt.err (!%p5597_p6)
}
  0x53   :  { %s6839_s23 = sld [smem:[#allocation32_spill]]  ;;  %s5609_s24 = scalar_lea.vmem %s82_s30, 256 }
  0x54   :  { %p5610_p7 = scmp.ne.s32.totalorder %s82_s30, %s5609_s24  ;;  %p5614_p8 = scmp.lt.s32.totalorder %s82_s30, %s82_s30 }
  0x55   :  { %p5615_p9 = scmp.lt.s32.totalorder %s5609_s24, %s5609_s24 }
  0x57   :  { %p5616_p10 = por %p5615_p9, %p5614_p8 }
  0x59   :  { %65 = dma.hbm_to_vmem [thread:$0]  %s6839_s23, 512, %s60_s21, [#allocation8], %s5717_s19, %s5717_s19, %s5718_s1  }
  0x5a   :  { %p5617_p11 = pnand %p5616_p10, %p5610_p7 }
  0x5c   :  { %5620 = shalt.err (!%p5617_p11)
}
  0x5d   :  { %87 = dma.hbm_to_vmem [thread:$0]  %s6819_s4, 256, %s82_s30, [#allocation11], %s5717_s19, %s5717_s19, %s5718_s1  }
  0x5e   :  { %s5725_s26 = smov [#allocation15]   ;;  %s5726_s8 = smov [#allocation18]  }
  0x5f   :  { %s106_s27 = sshll.u32 %s5725_s26, 4  ;;  %s130_s29 = sshll.u32 %s5726_s8, 4  ;;  %s107_s27 = int_to_ptr.vmem [resolvable:$true] %s106_s27  ;;  %s131_s29 = int_to_ptr.vmem [resolvable:$true] %s130_s29 }
  0x60   :  { %s5629_s0 = scalar_lea.vmem %s107_s27, 16  ;;  %s5633_s20 = scalar_lea.vmem %s107_s27, 32 }
  0x61   :  { %p5630_p12 = scmp.ne.s32.totalorder %s107_s27, %s5629_s0  ;;  %p5634_p13 = scmp.lt.s32.totalorder %s107_s27, %s107_s27 }
  0x62   :  { %p5635_p0 = scmp.lt.s32.totalorder %s5633_s20, %s5629_s0 }
  0x64   :  { %p5636_p1 = por %p5635_p0, %p5634_p13 }
  0x66   :  { %p5637_p2 = pnand %p5636_p1, %p5630_p12 }
  0x68   :  { %5640 = shalt.err (!%p5637_p2)
}
  0x69   :  { %109 = dma.hbm_to_vmem [thread:$0]  %s6821_s6, 16, %s107_s27, [#allocation14]  }
  0x6a   :  { %s5649_s3 = scalar_lea.vmem %s131_s29, 16  ;;  %s5653_s4 = scalar_lea.vmem %s131_s29, 32 }
  0x6b   :  { %p5650_p3 = scmp.ne.s32.totalorder %s131_s29, %s5649_s3  ;;  %p5654_p4 = scmp.lt.s32.totalorder %s131_s29, %s131_s29 }
  0x6c   :  { %p5655_p5 = scmp.lt.s32.totalorder %s5653_s4, %s5649_s3 }
  0x6e   :  { %p5656_p6 = por %p5655_p5, %p5654_p4 }
  0x70   :  { %p5657_p7 = pnand %p5656_p6, %p5650_p3 }
  0x72   :  { %5660 = shalt.err (!%p5657_p7)
}
  0x73   :  { %133 = dma.hbm_to_vmem [thread:$0]  %s6824_s9, 16, %s131_s29, [#allocation17]  }
  0x74   :  { %s5727_s22 = smov [#allocation21]  }
  0x75   :  { %s157_s2 = sshll.u32 %s5727_s22, 4  ;;  %s158_s2 = int_to_ptr.vmem [resolvable:$true] %s157_s2 }
  0x76   :  { %s5669_s23 = scalar_lea.vmem %s158_s2, 1024  ;;  %p5674_p9 = scmp.lt.s32.totalorder %s158_s2, %s158_s2 }
  0x77   :  { %p5670_p8 = scmp.ne.s32.totalorder %s158_s2, %s5669_s23  ;;  %p5675_p10 = scmp.lt.s32.totalorder %s5669_s23, %s5669_s23 }
  0x79   :  { %p5676_p11 = por %p5675_p10, %p5674_p9 }
  0x7b   :  { %p5677_p12 = pnand %p5676_p11, %p5670_p8 }
  0x7d   :  { %5680 = shalt.err (!%p5677_p12)
}
  0x7e   :  { %163 = dma.hbm_to_vmem [thread:$0]  %s6829_s14, 1024, %s158_s2, [#allocation20], %s5717_s19, %s5717_s19, %s5718_s1  }
  0x7f   :  { %5701 = dma.done.wait [#allocation5], 256  }
  0x80   :  { %5702 = vsyncadd [#allocation5], 4294967040 }
  0x81   :  { %5703 = dma.done.wait [#allocation8], 768  }
  0x82   :  { %5704 = vsyncadd [#allocation8], 4294966528 }
  0x83   :  { %5705 = dma.done.wait [#allocation11], 272  }
  0x84   :  { %5706 = vsyncadd [#allocation11], 4294967024 }
  0x85   :  { %5707 = dma.done.wait [#allocation14], 528  }
  0x86   :  { %5708 = vsyncadd [#allocation14], 4294966768 }
  0x87   :  { %5709 = dma.done.wait [#allocation17], 528  }
  0x88   :  { %5710 = vsyncadd [#allocation17], 4294966768 }
  0x89   :  { %5711 = dma.done.wait [#allocation20], 2048  }
  0x8a   :  { %5712 = vsyncadd [#allocation20], 4294965248  ;;  %v5728_v0 = vmov 0.0   ;;  %vm5729_vm0 = vmmov 0   ;;  %v206_v1 = vld [vmem:[#allocation7 + $0x8] sm:$0xff]  ;;  %v205_v3 = vld [vmem:[#allocation7] sm:$0xff] }
  0x8b   :  { %4718 = vmatprep.subr.mxu1 %v5728_v0  ;;  %4726 = vmatprep.mubr.msk.f32.mxu1 %vm5729_vm0, %v5728_v0  ;;  %v5888_v2 = vld [vmem:[#allocation9 + $0x18] sm:$0xff]  ;;  %v5891_v4 = vld [vmem:[#allocation9 + $0x10] sm:$0xff]  ;;  %v5893_v5 = vld [vmem:[#allocation4] sm:$0xff]  ;;  %vm214_vm1 = vcmask 130048   ;;  %s5730_s9 = smov 64   ;;  %s5731_s14 = smov 32  }
  0x8c   :  { %4711 = vmatprep.subr.mxu0 %v206_v1  ;;  %4719 = vmatpush3.msra.mxu1 %v5888_v2  ;;  %v5896_v6 = vld [vmem:[#allocation4 + $0x8] sm:$0xff]  ;;  %v5906_v8 = vld [vmem:[#allocation9] sm:$0xff]  ;;  %vm403_vm2 = vcmask 254976   ;;  %vm300_vm3 = vcmask 261120   ;;  %vm512_vm4 = vcmask 257026   ;;  %vm736_vm5 = vcmask 261126  }
  0x8d   :  { %4712 = vmatpush3.msra.mxu0 %v206_v1  ;;  %4720 = vmatprep.subr.mxu1 %v5728_v0  ;;  %v5899_v7 = vld [vmem:[#allocation9 + $0x8] sm:$0xff]  ;;  %v4428_v9 = vld [vmem:[#allocation10] ss:$0 sm:$0xff]  ;;  %vm624_vm6 = vcmask 259076   ;;  %vm1366_vm7 = vcmask 523526   ;;  %vm1590_vm8 = vcmask 519426  }
  0x8e   :  { %4713 = vmatprep.subr.mxu0 %v205_v3  ;;  %4721 = vmatpush3.msra.mxu1 %v5891_v4  ;;  %vm1478_vm9 = vcmask 521476   ;;  %vm1699_vm10 = vcmask 517376   ;;  %vm2158_vm11 = vcmask 523264   ;;  %vm4117_vm12 = vcmask 517120   ;;  %s5732_s24 = smov [#allocation22]  }
  0x8f   :  { %4714 = vmatpush3.msra.mxu0 %v205_v3  ;;  %4715 = vmatprep.mubr.msk.f32.mxu0 %vm214_vm1, %v5893_v5  ;;  %vm4142_vm13 = vcmask 1041408   ;;  %s4414_s19 = sshll.u32 %s5732_s24, 4  ;;  %vm4406_vm14 = vcmask 74752   ;;  %s4415_s19 = int_to_ptr.vmem [resolvable:$true] %s4414_s19 }
  0x90   :  { %4722 = vmatprep.subr.mxu1 %v5728_v0  ;;  %4716 = vmatmul.mubr.msk.f32.vlgmr.msra.gmra.mxu0 %vm214_vm1, %v5896_v6  ;;  %p5686_p0 = scmp.lt.s32.totalorder %s4415_s19, %s4415_s19 }
  0x91   :  { %4723 = vmatpush3.msra.mxu1 %v5899_v7  ;;  %4729 = vmatprep.subr.mxu0 %v5728_v0 }
  0x92   :  { %4724 = vmatprep.subr.mxu1 %v5728_v0  ;;  %4730 = vmatpush3.msra.mxu0 %v5888_v2 }
  0x93   :  { %4725 = vmatpush3.msra.mxu1 %v5906_v8  ;;  %4731 = vmatprep.subr.mxu0 %v5728_v0 }
  0x94   :  { %4727 = vmatmul.mubr.f32.vlgmr.msra.gmra.mxu1 %v5728_v0  ;;  %4732 = vmatpush3.msra.mxu0 %v5891_v4 }
  0x95   :  { %4733 = vmatprep.subr.mxu0 %v5728_v0  ;;  %4737 = vmatprep.mubr.msk.f32.mxu0 %vm5729_vm0, %v5728_v0 }
  0x96   :  { %4734 = vmatpush3.msra.mxu0 %v5899_v7  ;;  %4740 = vmatprep.subr.mxu1 %v5728_v0 }
  0x97   :  { %4735 = vmatprep.subr.mxu0 %v5728_v0  ;;  %4741 = vmatpush3.msra.mxu1 %v5888_v2 }
  0x98   :  { %4736 = vmatpush3.msra.mxu0 %v5906_v8  ;;  %4742 = vmatprep.subr.mxu1 %v5728_v0 }
  0x99   :  { %4743 = vmatpush3.msra.mxu1 %v5891_v4  ;;  %4748 = vmatprep.mubr.msk.f32.mxu1 %vm5729_vm0, %v5728_v0 }
  0x9a   :  { %4744 = vmatprep.subr.mxu1 %v5728_v0  ;;  %4751 = vmatprep.subr.mxu0 %v5728_v0 }
  0x9b   :  { %4745 = vmatpush3.msra.mxu1 %v5899_v7 }
  0x9c   :  { %4746 = vmatprep.subr.mxu1 %v5728_v0 }
  0x9d   :  { %4747 = vmatpush3.msra.mxu1 %v5906_v8 }
  0x9e   :  { %4762 = vmatprep.subr.mxu1 %v5728_v0 }
 0x150   :  { %v4717_v10 = vpop.f32.mrf.mxu0 }
 0x151   :  { %v5934_v11 = vadd.f32 %v4717_v10, %v4428_v9 }
 0x152   :  { %v287_v12 = vpop.f32.mrf.mxu0 }
 0x153   :  { %v5936_v13 = vadd.f32 %v4428_v9, %v287_v12 }
 0x154   :  { %v370_v14 = vpop.f32.mrf.mxu1 }
 0x155   :  { %v374_v15 = vadd.f32 %v370_v14, %v5936_v13 }
 0x156   :  { %v4728_v16 = vpop.f32.mrf.mxu1 }
 0x157   :  { %5171 = vtanh.f32 %v374_v15  ;;  %v4431_v18 = vmul.f32 -1.442695, %v374_v15 }
 0x159   :  { %5173 = vpow2.f32 %v4431_v18 }
 0x164   :  { %v5172_v17 = vpop.eup %5171 }
 0x165   :  { %384 = vrot.lane.b32.xlu0 %v5172_v17, %s5730_s9 }
 0x166   :  { %v5174_v19 = vpop.eup %5173 }
 0x167   :  { %v378_v20 = vadd.f32 1.0, %v5174_v19 }
 0x169   :  { %5175 = vrcp.f32 %v378_v20 }
 0x176   :  { %v5176_v21 = vpop.eup %5175 }
 0x177   :  { %v382_v24 = vmul.f32 0.0, %v5176_v21 }
 0x1d7   :  { %v385_v22 = vpop.permute.xlu0 %384 }
 0x1d8   :  { %v387_v23 = vmul.f32 %v5176_v21, %v385_v22 }
 0x1da   :  { %389 = vrot.lane.b32.xlu0 %v387_v23, %s5731_s14 }
 0x24c   :  { %v390_v25 = vpop.permute.xlu0 %389 }
 0x24d   :  { %v392_v26 = vadd.f32 %v390_v25, %v382_v24 }
 0x24f   :  { %5177 = vtanh.f32 %v392_v26  ;;  %v489_v42 = vrot.slane %v392_v26, 6 }
 0x25c   :  { %v5178_v27 = vpop.eup %5177 }
 0x25d   :  { %395 = vrot.lane.b32.xlu1 %v5178_v27, %s5730_s9 }
 0x2cf   :  { %v396_v28 = vpop.permute.xlu1 %395 }
 0x2d0   :  { %v398_v29 = vmul.f32 %v5176_v21, %v396_v28 }
 0x2d2   :  { %400 = vrot.lane.b32.xlu1 %v398_v29, %s5731_s14 }
 0x344   :  { %v401_v30 = vpop.permute.xlu1 %400 }
 0x345   :  { %404 = vst.msk [vmem:[#allocation2] sm:$0x3] %vm403_vm2, %v401_v30  ;;  %4738 = vmatmul.mubr.msk.f32.vlgmr.msra.gmra.mxu0 %vm300_vm3, %v401_v30 }
 0x346   :  { %4752 = vmatpush3.msra.mxu0 %v5888_v2  ;;  %4759 = vmatprep.mubr.msk.f32.mxu0 %vm5729_vm0, %v5728_v0 }
 0x347   :  { %4753 = vmatprep.subr.mxu0 %v5728_v0 }
 0x348   :  { %4754 = vmatpush3.msra.mxu0 %v5891_v4 }
 0x349   :  { %4755 = vmatprep.subr.mxu0 %v5728_v0 }
 0x34a   :  { %4756 = vmatpush3.msra.mxu0 %v5899_v7 }
 0x34b   :  { %4757 = vmatprep.subr.mxu0 %v5728_v0 }
 0x34c   :  { %4758 = vmatpush3.msra.mxu0 %v5906_v8 }
 0x34d   :  { %4773 = vmatprep.subr.mxu0 %v5728_v0 }
 0x405   :  { %v473_v31 = vpop.f32.mrf.mxu0 }
 0x406   :  { %v478_v32 = vrot.slane %v473_v31, 6 }
 0x407   :  { %v4739_v33 = vpop.f32.mrf.mxu0 }
 0x408   :  { %v480_v34 = vadd.f32 %v478_v32, %v5936_v13 }
 0x40a   :  { %5179 = vtanh.f32 %v480_v34  ;;  %v4433_v36 = vmul.f32 -1.442695, %v480_v34 }
 0x40c   :  { %5181 = vpow2.f32 %v4433_v36 }
 0x417   :  { %v5180_v35 = vpop.eup %5179 }
 0x418   :  { %493 = vrot.lane.b32.xlu0 %v5180_v35, %s5730_s9 }
 0x419   :  { %v5182_v37 = vpop.eup %5181 }
 0x41a   :  { %v484_v38 = vadd.f32 1.0, %v5182_v37 }
 0x41c   :  { %5183 = vrcp.f32 %v484_v38 }
 0x429   :  { %v5184_v39 = vpop.eup %5183 }
 0x42a   :  { %v491_v43 = vmul.f32 %v5184_v39, %v489_v42 }
 0x48a   :  { %v494_v40 = vpop.permute.xlu0 %493 }
 0x48b   :  { %v496_v41 = vmul.f32 %v5184_v39, %v494_v40 }
 0x48d   :  { %498 = vrot.lane.b32.xlu1 %v496_v41, %s5731_s14 }
 0x4ff   :  { %v499_v44 = vpop.permute.xlu1 %498 }
 0x500   :  { %v501_v45 = vadd.f32 %v499_v44, %v491_v43 }
 0x502   :  { %5185 = vtanh.f32 %v501_v45  ;;  %v601_v62 = vrot.slane %v501_v45, 6 }
 0x50f   :  { %v5186_v46 = vpop.eup %5185 }
 0x510   :  { %504 = vrot.lane.b32.xlu0 %v5186_v46, %s5730_s9 }
 0x582   :  { %v505_v47 = vpop.permute.xlu0 %504 }
 0x583   :  { %v5959_v48 = vmul.f32 %v5184_v39, %v505_v47 }
 0x585   :  { %v514_v49 = vrot.slane %v5959_v48, 2 }
 0x587   :  { %515 = vrot.lane.b32.xlu1 %v514_v49, %s5731_s14 }
 0x5f9   :  { %v516_v50 = vpop.permute.xlu1 %515 }
 0x5fa   :  { %4749 = vmatmul.mubr.msk.f32.vlgmr.msra.gmra.mxu1 %vm300_vm3, %v516_v50 }
 0x5fb   :  { %4763 = vmatpush3.msra.mxu1 %v5888_v2  ;;  %4770 = vmatprep.mubr.msk.f32.mxu1 %vm5729_vm0, %v5728_v0 }
 0x5fc   :  { %4764 = vmatprep.subr.mxu1 %v5728_v0 }
 0x5fd   :  { %4765 = vmatpush3.msra.mxu1 %v5891_v4 }
 0x5fe   :  { %4766 = vmatprep.subr.mxu1 %v5728_v0 }
 0x5ff   :  { %4767 = vmatpush3.msra.mxu1 %v5899_v7 }
 0x600   :  { %4768 = vmatprep.subr.mxu1 %v5728_v0 }
 0x601   :  { %4769 = vmatpush3.msra.mxu1 %v5906_v8 }
 0x602   :  { %4784 = vmatprep.subr.mxu1 %v5728_v0 }
 0x6ba   :  { %v585_v51 = vpop.f32.mrf.mxu1 }
 0x6bb   :  { %v590_v52 = vrot.slane %v585_v51, 4 }
 0x6bc   :  { %v4750_v53 = vpop.f32.mrf.mxu1 }
 0x6bd   :  { %v592_v54 = vadd.f32 %v590_v52, %v5936_v13 }
 0x6bf   :  { %5187 = vtanh.f32 %v592_v54  ;;  %v4435_v56 = vmul.f32 -1.442695, %v592_v54 }
 0x6c1   :  { %5189 = vpow2.f32 %v4435_v56 }
 0x6cc   :  { %v5188_v55 = vpop.eup %5187 }
 0x6cd   :  { %605 = vrot.lane.b32.xlu0 %v5188_v55, %s5730_s9 }
 0x6ce   :  { %v5190_v57 = vpop.eup %5189 }
 0x6cf   :  { %v596_v58 = vadd.f32 1.0, %v5190_v57 }
 0x6d1   :  { %5191 = vrcp.f32 %v596_v58 }
 0x6de   :  { %v5192_v59 = vpop.eup %5191 }
 0x6df   :  { %v603_v63 = vmul.f32 %v5192_v59, %v601_v62 }
 0x73f   :  { %v606_v60 = vpop.permute.xlu0 %605 }
 0x740   :  { %v608_v61 = vmul.f32 %v5192_v59, %v606_v60 }
 0x742   :  { %610 = vrot.lane.b32.xlu1 %v608_v61, %s5731_s14 }
 0x7b4   :  { %v611_v1 = vpop.permute.xlu1 %610 }
 0x7b5   :  { %v613_v3 = vadd.f32 %v611_v1, %v603_v63 }
 0x7b7   :  { %5193 = vtanh.f32 %v613_v3  ;;  %v713_v27 = vrot.slane %v613_v3, 6 }
 0x7c4   :  { %v5194_v9 = vpop.eup %5193 }
 0x7c5   :  { %616 = vrot.lane.b32.xlu0 %v5194_v9, %s5730_s9 }
 0x837   :  { %v617_v10 = vpop.permute.xlu0 %616 }
 0x838   :  { %v5978_v12 = vmul.f32 %v5192_v59, %v617_v10 }
 0x83a   :  { %v626_v14 = vrot.slane %v5978_v12, 4 }
 0x83c   :  { %627 = vrot.lane.b32.xlu1 %v626_v14, %s5731_s14 }
 0x8ae   :  { %v628_v15 = vpop.permute.xlu1 %627 }
 0x8af   :  { %4760 = vmatmul.mubr.msk.f32.vlgmr.msra.gmra.mxu0 %vm300_vm3, %v628_v15 }
 0x8b0   :  { %4774 = vmatpush3.msra.mxu0 %v5888_v2  ;;  %4781 = vmatprep.mubr.msk.f32.mxu0 %vm5729_vm0, %v5728_v0 }
 0x8b1   :  { %4775 = vmatprep.subr.mxu0 %v5728_v0 }
 0x8b2   :  { %4776 = vmatpush3.msra.mxu0 %v5891_v4 }
 0x8b3   :  { %4777 = vmatprep.subr.mxu0 %v5728_v0 }
 0x8b4   :  { %4778 = vmatpush3.msra.mxu0 %v5899_v7 }
 0x8b5   :  { %4779 = vmatprep.subr.mxu0 %v5728_v0 }
 0x8b6   :  { %4780 = vmatpush3.msra.mxu0 %v5906_v8 }
 0x8b7   :  { %4795 = vmatprep.subr.mxu0 %v5728_v0 }
 0x96f   :  { %v697_v16 = vpop.f32.mrf.mxu0 }
 0x970   :  { %v702_v17 = vrot.slane %v697_v16, 2 }
 0x971   :  { %v4761_v18 = vpop.f32.mrf.mxu0 }
 0x972   :  { %v704_v19 = vadd.f32 %v702_v17, %v5936_v13 }
 0x974   :  { %5195 = vtanh.f32 %v704_v19  ;;  %v4437_v21 = vmul.f32 -1.442695, %v704_v19 }
 0x976   :  { %5197 = vpow2.f32 %v4437_v21 }
 0x981   :  { %v5196_v20 = vpop.eup %5195 }
 0x982   :  { %717 = vrot.lane.b32.xlu0 %v5196_v20, %s5730_s9 }
 0x983   :  { %v5198_v22 = vpop.eup %5197 }
 0x984   :  { %v708_v23 = vadd.f32 1.0, %v5198_v22 }
 0x986   :  { %5199 = vrcp.f32 %v708_v23 }
 0x993   :  { %v5200_v24 = vpop.eup %5199 }
 0x994   :  { %v715_v28 = vmul.f32 %v5200_v24, %v713_v27 }
 0x9f4   :  { %v718_v25 = vpop.permute.xlu0 %717 }
 0x9f5   :  { %v720_v26 = vmul.f32 %v5200_v24, %v718_v25 }
 0x9f7   :  { %722 = vrot.lane.b32.xlu1 %v720_v26, %s5731_s14 }
 0xa69   :  { %v723_v29 = vpop.permute.xlu1 %722 }
 0xa6a   :  { %v725_v30 = vadd.f32 %v723_v29, %v715_v28 }
 0xa6c   :  { %5201 = vtanh.f32 %v725_v30  ;;  %v822_v45 = vrot.slane %v725_v30, 6 }
 0xa79   :  { %v5202_v13 = vpop.eup %5201 }
 0xa7a   :  { %728 = vrot.lane.b32.xlu0 %v5202_v13, %s5730_s9  ;;  %v1177_v13 = vld [vmem:[#allocation12 + $0x8] sm:$0xff] }
 0xaec   :  { %v729_v31 = vpop.permute.xlu0 %728 }
 0xaed   :  { %v5997_v32 = vmul.f32 %v5200_v24, %v729_v31  ;;  %v1176_v31 = vld [vmem:[#allocation12] sm:$0xff] }
 0xaef   :  { %v738_v33 = vrot.slane %v5997_v32, 6 }
 0xaf1   :  { %739 = vrot.lane.b32.xlu1 %v738_v33, %s5731_s14  ;;  %v6046_v33 = vld [vmem:[#allocation13 + $0x18] sm:$0xff] }
 0xb63   :  { %v740_v34 = vpop.permute.xlu1 %739 }
 0xb64   :  { %4771 = vmatmul.mubr.msk.f32.vlgmr.msra.gmra.mxu1 %vm300_vm3, %v740_v34 }
 0xb65   :  { %4785 = vmatpush3.msra.mxu1 %v5888_v2  ;;  %4792 = vmatprep.mubr.msk.f32.mxu1 %vm5729_vm0, %v5728_v0 }
 0xb66   :  { %4786 = vmatprep.subr.mxu1 %v5728_v0 }
 0xb67   :  { %4787 = vmatpush3.msra.mxu1 %v5891_v4 }
 0xb68   :  { %4788 = vmatprep.subr.mxu1 %v5728_v0 }
 0xb69   :  { %4789 = vmatpush3.msra.mxu1 %v5899_v7 }
 0xb6a   :  { %4790 = vmatprep.subr.mxu1 %v5728_v0 }
 0xb6b   :  { %4791 = vmatpush3.msra.mxu1 %v5906_v8 }
 0xb6c   :  { %4806 = vmatprep.subr.mxu1 %v1177_v13 }
 0xc24   :  { %v809_v35 = vpop.f32.mrf.mxu1 }
 0xc25   :  { %v813_v36 = vadd.f32 %v809_v35, %v5934_v11  ;;  %v6054_v35 = vld [vmem:[#allocation13 + $0x10] sm:$0xff] }
 0xc26   :  { %v4772_v37 = vpop.f32.mrf.mxu1 }
 0xc27   :  { %5203 = vtanh.f32 %v813_v36  ;;  %v4439_v39 = vmul.f32 -1.442695, %v813_v36  ;;  %v6060_v37 = vld [vmem:[#allocation13 + $0x8] sm:$0xff] }
 0xc29   :  { %5205 = vpow2.f32 %v4439_v39 }
 0xc34   :  { %v5204_v38 = vpop.eup %5203 }
 0xc35   :  { %826 = vrot.lane.b32.xlu0 %v5204_v38, %s5730_s9  ;;  %v6065_v38 = vld [vmem:[#allocation13] sm:$0xff] }
 0xc36   :  { %v5206_v40 = vpop.eup %5205 }
 0xc37   :  { %v817_v41 = vadd.f32 1.0, %v5206_v40 }
 0xc39   :  { %5207 = vrcp.f32 %v817_v41 }
 0xc46   :  { %v5208_v42 = vpop.eup %5207 }
 0xc47   :  { %v824_v46 = vmul.f32 %v5208_v42, %v822_v45 }
 0xca7   :  { %v827_v43 = vpop.permute.xlu0 %826 }
 0xca8   :  { %v829_v44 = vmul.f32 %v5208_v42, %v827_v43 }
 0xcaa   :  { %831 = vrot.lane.b32.xlu1 %v829_v44, %s5731_s14 }
 0xd1c   :  { %v832_v47 = vpop.permute.xlu1 %831 }
 0xd1d   :  { %v834_v49 = vadd.f32 %v832_v47, %v824_v46 }
 0xd1f   :  { %5209 = vtanh.f32 %v834_v49 }
 0xd2c   :  { %v5210_v50 = vpop.eup %5209 }
 0xd2d   :  { %837 = vrot.lane.b32.xlu0 %v5210_v50, %s5730_s9 }
 0xd9f   :  { %v838_v51 = vpop.permute.xlu0 %837 }
 0xda0   :  { %v840_v52 = vmul.f32 %v5208_v42, %v838_v51  ;;  %v6095_v42 = vld [vmem:[#allocation15] ss:$0 sm:$0xff] }
 0xda2   :  { %842 = vrot.lane.b32.xlu1 %v840_v52, %s5731_s14 }
 0xe14   :  { %v843_v53 = vpop.permute.xlu1 %842 }
 0xe15   :  { %845 = vst.msk [vmem:[#allocation2 + $0x8] sm:$0x3] %vm403_vm2, %v843_v53  ;;  %4782 = vmatmul.mubr.msk.f32.vlgmr.msra.gmra.mxu0 %vm300_vm3, %v843_v53 }
 0xe16   :  { %4796 = vmatpush3.msra.mxu0 %v5888_v2  ;;  %4803 = vmatprep.mubr.msk.f32.mxu0 %vm5729_vm0, %v5728_v0 }
 0xe17   :  { %4797 = vmatprep.subr.mxu0 %v5728_v0 }
 0xe18   :  { %4798 = vmatpush3.msra.mxu0 %v5891_v4 }
 0xe19   :  { %4799 = vmatprep.subr.mxu0 %v5728_v0 }
 0xe1a   :  { %4800 = vmatpush3.msra.mxu0 %v5899_v7 }
 0xe1b   :  { %4801 = vmatprep.subr.mxu0 %v5728_v0 }
 0xe1c   :  { %4802 = vmatpush3.msra.mxu0 %v5906_v8  ;;  %v930_v8 = vrot.slane %v834_v49, 6 }
 0xe1d   :  { %4813 = vmatprep.subr.mxu0 %v5728_v0 }
 0xed5   :  { %v914_v54 = vpop.f32.mrf.mxu0 }
 0xed6   :  { %v919_v55 = vrot.slane %v914_v54, 6 }
 0xed7   :  { %v4783_v2 = vpop.f32.mrf.mxu0 }
 0xed8   :  { %v921_v56 = vadd.f32 %v919_v55, %v5934_v11 }
 0xeda   :  { %5211 = vtanh.f32 %v921_v56  ;;  %v4441_v4 = vmul.f32 -1.442695, %v921_v56 }
 0xedc   :  { %5213 = vpow2.f32 %v4441_v4 }
 0xee7   :  { %v5212_v57 = vpop.eup %5211 }
 0xee8   :  { %934 = vrot.lane.b32.xlu0 %v5212_v57, %s5730_s9 }
 0xee9   :  { %v5214_v58 = vpop.eup %5213 }
 0xeea   :  { %v925_v59 = vadd.f32 1.0, %v5214_v58 }
 0xeec   :  { %5215 = vrcp.f32 %v925_v59 }
 0xef9   :  { %v5216_v7 = vpop.eup %5215 }
 0xefa   :  { %v932_v62 = vmul.f32 %v5216_v7, %v930_v8 }
 0xf5a   :  { %v935_v60 = vpop.permute.xlu0 %934 }
 0xf5b   :  { %v937_v61 = vmul.f32 %v5216_v7, %v935_v60 }
 0xf5d   :  { %939 = vrot.lane.b32.xlu1 %v937_v61, %s5731_s14 }
 0xfcf   :  { %v940_v63 = vpop.permute.xlu1 %939 }
 0xfd0   :  { %v942_v1 = vadd.f32 %v940_v63, %v932_v62 }
 0xfd2   :  { %5217 = vtanh.f32 %v942_v1 }
 0xfdf   :  { %v5218_v3 = vpop.eup %5217 }
 0xfe0   :  { %945 = vrot.lane.b32.xlu0 %v5218_v3, %s5730_s9 }
0x1052   :  { %v946_v9 = vpop.permute.xlu0 %945 }
0x1053   :  { %v6032_v10 = vmul.f32 %v5216_v7, %v946_v9 }
0x1055   :  { %v954_v14 = vrot.slane %v6032_v10, 2 }
0x1057   :  { %955 = vrot.lane.b32.xlu1 %v954_v14, %s5731_s14 }
0x10c9   :  { %v956_v15 = vpop.permute.xlu1 %955 }
0x10ca   :  { %4793 = vmatmul.mubr.msk.f32.vlgmr.msra.gmra.mxu1 %vm300_vm3, %v956_v15 }
0x10cb   :  { %4810 = vmatprep.mubr.msk.f32.mxu1 %vm214_vm1, %v5893_v5  ;;  %v1041_v5 = vrot.slane %v942_v1, 6  ;;  %4807 = vmatpush3.msra.mxu1 %v1177_v13 }
0x10cc   :  { %4808 = vmatprep.subr.mxu1 %v1176_v31 }
0x10cd   :  { %4809 = vmatpush3.msra.mxu1 %v1176_v31 }
0x10ce   :  { %4811 = vmatmul.mubr.msk.f32.vlgmr.msra.gmra.mxu1 %vm214_vm1, %v5896_v6  ;;  %4824 = vmatprep.subr.mxu1 %v5728_v0 }
0x10cf   :  { %4825 = vmatpush3.msra.mxu1 %v6046_v33  ;;  %4832 = vmatprep.mubr.msk.f32.mxu1 %vm5729_vm0, %v5728_v0 }
0x10d0   :  { %4826 = vmatprep.subr.mxu1 %v5728_v0 }
0x10d1   :  { %4827 = vmatpush3.msra.mxu1 %v6054_v35 }
0x10d2   :  { %4828 = vmatprep.subr.mxu1 %v5728_v0 }
0x10d3   :  { %4829 = vmatpush3.msra.mxu1 %v6060_v37 }
0x10d4   :  { %4830 = vmatprep.subr.mxu1 %v5728_v0 }
0x10d5   :  { %4831 = vmatpush3.msra.mxu1 %v6065_v38 }
0x10d6   :  { %4846 = vmatprep.subr.mxu1 %v5728_v0 }
0x118a   :  { %v1025_v16 = vpop.f32.mrf.mxu1 }
0x118b   :  { %v1030_v17 = vrot.slane %v1025_v16, 4 }
0x118c   :  { %v4794_v18 = vpop.f32.mrf.mxu1 }
0x118d   :  { %v1032_v19 = vadd.f32 %v1030_v17, %v5934_v11 }
0x118e   :  { %v4812_v43 = vpop.f32.mrf.mxu1 }
0x118f   :  { %5219 = vtanh.f32 %v1032_v19  ;;  %v4443_v21 = vmul.f32 -1.442695, %v1032_v19  ;;  %v6098_v44 = vadd.f32 %v4812_v43, %v6095_v42 }
0x1190   :  { %v6119_v8 = vpop.f32.mrf.mxu1 }
0x1191   :  { %5221 = vpow2.f32 %v4443_v21 }
0x119c   :  { %v5220_v20 = vpop.eup %5219 }
0x119d   :  { %1045 = vrot.lane.b32.xlu0 %v5220_v20, %s5730_s9 }
0x119e   :  { %v5222_v22 = vpop.eup %5221 }
0x119f   :  { %v1036_v23 = vadd.f32 1.0, %v5222_v22 }
0x11a1   :  { %5223 = vrcp.f32 %v1036_v23 }
0x11ae   :  { %v5224_v24 = vpop.eup %5223 }
0x11af   :  { %v1043_v27 = vmul.f32 %v5224_v24, %v1041_v5 }
0x120f   :  { %v1046_v25 = vpop.permute.xlu0 %1045 }
0x1210   :  { %v1048_v26 = vmul.f32 %v5224_v24, %v1046_v25 }
0x1212   :  { %1050 = vrot.lane.b32.xlu1 %v1048_v26, %s5731_s14 }
0x1284   :  { %v1051_v28 = vpop.permute.xlu1 %1050 }
0x1285   :  { %v6042_v29 = vadd.f32 %v1051_v28, %v1043_v27 }
0x1287   :  { %5225 = vtanh.f32 %v6042_v29 }
0x1294   :  { %v5226_v30 = vpop.eup %5225 }
0x1295   :  { %1056 = vrot.lane.b32.xlu0 %v5226_v30, %s5730_s9 }
0x1307   :  { %v1057_v34 = vpop.permute.xlu0 %1056 }
0x1308   :  { %v6057_v36 = vmul.f32 %v5224_v24, %v1057_v34 }
0x130a   :  { %v1065_v6 = vrot.slane %v6057_v36, 4 }
0x130c   :  { %1066 = vrot.lane.b32.xlu1 %v1065_v6, %s5731_s14 }
0x137e   :  { %v1067_v39 = vpop.permute.xlu1 %1066 }
0x137f   :  { %4804 = vmatmul.mubr.msk.f32.vlgmr.msra.gmra.mxu0 %vm300_vm3, %v1067_v39 }
0x1380   :  { %4814 = vmatpush3.msra.mxu0 %v6046_v33  ;;  %4821 = vmatprep.mubr.msk.f32.mxu0 %vm5729_vm0, %v5728_v0 }
0x1381   :  { %4815 = vmatprep.subr.mxu0 %v5728_v0 }
0x1382   :  { %4816 = vmatpush3.msra.mxu0 %v6054_v35 }
0x1383   :  { %4817 = vmatprep.subr.mxu0 %v5728_v0 }
0x1384   :  { %4818 = vmatpush3.msra.mxu0 %v6060_v37 }
0x1385   :  { %4819 = vmatprep.subr.mxu0 %v5728_v0 }
0x1386   :  { %4820 = vmatpush3.msra.mxu0 %v6065_v38 }
0x1387   :  { %4822 = vmatmul.mubr.f32.vlgmr.msra.gmra.mxu0 %v5728_v0  ;;  %4835 = vmatprep.subr.mxu0 %v5728_v0 }
0x1388   :  { %4836 = vmatpush3.msra.mxu0 %v6046_v33  ;;  %4843 = vmatprep.mubr.msk.f32.mxu0 %vm5729_vm0, %v5728_v0 }
0x1389   :  { %4837 = vmatprep.subr.mxu0 %v5728_v0 }
0x138a   :  { %4838 = vmatpush3.msra.mxu0 %v6054_v35 }
0x138b   :  { %4839 = vmatprep.subr.mxu0 %v5728_v0 }
0x138c   :  { %4840 = vmatpush3.msra.mxu0 %v6060_v37 }
0x138d   :  { %4841 = vmatprep.subr.mxu0 %v5728_v0 }
0x138e   :  { %4842 = vmatpush3.msra.mxu0 %v6065_v38 }
0x138f   :  { %4857 = vmatprep.subr.mxu0 %v5728_v0 }
0x143f   :  { %v6093_v40 = vpop.f32.mrf.mxu0 }
0x1441   :  { %v4805_v41 = vpop.f32.mrf.mxu0 }
0x1447   :  { %v1330_v45 = vpop.f32.mrf.mxu0 }
0x1448   :  { %v1335_v46 = vrot.slane %v1330_v45, 2 }
0x1449   :  { %v4823_v47 = vpop.f32.mrf.mxu0 }
0x144a   :  { %v1337_v49 = vadd.f32 %v1335_v46, %v6098_v44 }
0x144c   :  { %5227 = vtanh.f32 %v1337_v49  ;;  %v4449_v51 = vmul.f32 -1.442695, %v1337_v49 }
0x144e   :  { %5229 = vpow2.f32 %v4449_v51 }
0x1459   :  { %v5228_v50 = vpop.eup %5227 }
0x145a   :  { %1347 = vrot.lane.b32.xlu0 %v5228_v50, %s5730_s9 }
0x145b   :  { %v5230_v52 = vpop.eup %5229 }
0x145c   :  { %v1341_v53 = vadd.f32 1.0, %v5230_v52 }
0x145e   :  { %5231 = vrcp.f32 %v1341_v53 }
0x146b   :  { %v5232_v54 = vpop.eup %5231 }
0x146c   :  { %v1345_v56 = vmul.f32 0.0, %v5232_v54 }
0x14cc   :  { %v1348_v55 = vpop.permute.xlu0 %1347 }
0x14cd   :  { %v1350_v2 = vmul.f32 %v5232_v54, %v1348_v55 }
0x14cf   :  { %1352 = vrot.lane.b32.xlu1 %v1350_v2, %s5731_s14 }
0x1541   :  { %v1353_v57 = vpop.permute.xlu1 %1352 }
0x1542   :  { %v1355_v4 = vadd.f32 %v1353_v57, %v1345_v56 }
0x1544   :  { %5233 = vtanh.f32 %v1355_v4  ;;  %v1455_v20 = vrot.slane %v1355_v4, 2 }
0x1551   :  { %v5234_v58 = vpop.eup %5233 }
0x1552   :  { %1358 = vrot.lane.b32.xlu0 %v5234_v58, %s5730_s9 }
0x15c4   :  { %v1359_v59 = vpop.permute.xlu0 %1358 }
0x15c5   :  { %v6104_v7 = vmul.f32 %v5232_v54, %v1359_v59 }
0x15c7   :  { %v1368_v60 = vrot.slane %v6104_v7, 6 }
0x15c9   :  { %1369 = vrot.lane.b32.xlu1 %v1368_v60, %s5731_s14 }
0x163b   :  { %v1370_v61 = vpop.permute.xlu1 %1369 }
0x163c   :  { %4833 = vmatmul.mubr.msk.f32.vlgmr.msra.gmra.mxu1 %vm300_vm3, %v1370_v61 }
0x163d   :  { %4847 = vmatpush3.msra.mxu1 %v6046_v33  ;;  %4854 = vmatprep.mubr.msk.f32.mxu1 %vm5729_vm0, %v5728_v0 }
0x163e   :  { %4848 = vmatprep.subr.mxu1 %v5728_v0 }
0x163f   :  { %4849 = vmatpush3.msra.mxu1 %v6054_v35 }
0x1640   :  { %4850 = vmatprep.subr.mxu1 %v5728_v0 }
0x1641   :  { %4851 = vmatpush3.msra.mxu1 %v6060_v37 }
0x1642   :  { %4852 = vmatprep.subr.mxu1 %v5728_v0 }
0x1643   :  { %4853 = vmatpush3.msra.mxu1 %v6065_v38 }
0x1644   :  { %4868 = vmatprep.subr.mxu1 %v5728_v0 }
0x16fc   :  { %v1439_v62 = vpop.f32.mrf.mxu1 }
0x16fd   :  { %v1444_v63 = vrot.slane %v1439_v62, 4 }
0x16fe   :  { %v4834_v1 = vpop.f32.mrf.mxu1 }
0x16ff   :  { %v1446_v3 = vadd.f32 %v1444_v63, %v6098_v44 }
0x1701   :  { %5235 = vtanh.f32 %v1446_v3  ;;  %v4451_v14 = vmul.f32 -1.442695, %v1446_v3 }
0x1703   :  { %5237 = vpow2.f32 %v4451_v14 }
0x170e   :  { %v5236_v9 = vpop.eup %5235 }
0x170f   :  { %1459 = vrot.lane.b32.xlu0 %v5236_v9, %s5730_s9 }
0x1710   :  { %v5238_v15 = vpop.eup %5237 }
0x1711   :  { %v1450_v16 = vadd.f32 1.0, %v5238_v15 }
0x1713   :  { %5239 = vrcp.f32 %v1450_v16 }
0x1720   :  { %v5240_v17 = vpop.eup %5239 }
0x1721   :  { %v1457_v21 = vmul.f32 %v5240_v17, %v1455_v20  ;;  %v6179_v20 = vadd.f32 %v6095_v42, %v6119_v8 }
0x1781   :  { %v1460_v18 = vpop.permute.xlu0 %1459 }
0x1782   :  { %v1462_v19 = vmul.f32 %v5240_v17, %v1460_v18 }
0x1784   :  { %1464 = vrot.lane.b32.xlu1 %v1462_v19, %s5731_s14 }
0x17f6   :  { %v1465_v22 = vpop.permute.xlu1 %1464 }
0x17f7   :  { %v1467_v23 = vadd.f32 %v1465_v22, %v1457_v21 }
0x17f9   :  { %5241 = vtanh.f32 %v1467_v23  ;;  %v1567_v47 = vrot.slane %v1467_v23, 2 }
0x1806   :  { %v5242_v24 = vpop.eup %5241 }
0x1807   :  { %1470 = vrot.lane.b32.xlu0 %v5242_v24, %s5730_s9 }
0x1879   :  { %v1471_v25 = vpop.permute.xlu0 %1470 }
0x187a   :  { %v6125_v26 = vmul.f32 %v5240_v17, %v1471_v25 }
0x187c   :  { %v1480_v5 = vrot.slane %v6125_v26, 4 }
0x187e   :  { %1481 = vrot.lane.b32.xlu1 %v1480_v5, %s5731_s14 }
0x18f0   :  { %v1482_v27 = vpop.permute.xlu1 %1481 }
0x18f1   :  { %4844 = vmatmul.mubr.msk.f32.vlgmr.msra.gmra.mxu0 %vm300_vm3, %v1482_v27 }
0x18f2   :  { %4858 = vmatpush3.msra.mxu0 %v6046_v33  ;;  %4865 = vmatprep.mubr.msk.f32.mxu0 %vm5729_vm0, %v5728_v0 }
0x18f3   :  { %4859 = vmatprep.subr.mxu0 %v5728_v0 }
0x18f4   :  { %4860 = vmatpush3.msra.mxu0 %v6054_v35 }
0x18f5   :  { %4861 = vmatprep.subr.mxu0 %v5728_v0 }
0x18f6   :  { %4862 = vmatpush3.msra.mxu0 %v6060_v37 }
0x18f7   :  { %4863 = vmatprep.subr.mxu0 %v5728_v0 }
0x18f8   :  { %4864 = vmatpush3.msra.mxu0 %v6065_v38 }
0x18f9   :  { %4879 = vmatprep.subr.mxu0 %v5728_v0 }
0x19b1   :  { %v1551_v28 = vpop.f32.mrf.mxu0 }
0x19b2   :  { %v1556_v30 = vrot.slane %v1551_v28, 6 }
0x19b3   :  { %v4845_v13 = vpop.f32.mrf.mxu0 }
0x19b4   :  { %v1558_v31 = vadd.f32 %v1556_v30, %v6098_v44 }
0x19b6   :  { %5243 = vtanh.f32 %v1558_v31  ;;  %v4453_v6 = vmul.f32 -1.442695, %v1558_v31 }
0x19b8   :  { %5245 = vpow2.f32 %v4453_v6 }
0x19c3   :  { %v5244_v34 = vpop.eup %5243 }
0x19c4   :  { %1571 = vrot.lane.b32.xlu0 %v5244_v34, %s5730_s9 }
0x19c5   :  { %v5246_v39 = vpop.eup %5245 }
0x19c6   :  { %v1562_v41 = vadd.f32 1.0, %v5246_v39 }
0x19c8   :  { %5247 = vrcp.f32 %v1562_v41 }
0x19d5   :  { %v5248_v43 = vpop.eup %5247 }
0x19d6   :  { %v1569_v49 = vmul.f32 %v5248_v43, %v1567_v47 }
0x1a36   :  { %v1572_v45 = vpop.permute.xlu0 %1571 }
0x1a37   :  { %v1574_v46 = vmul.f32 %v5248_v43, %v1572_v45 }
0x1a39   :  { %1576 = vrot.lane.b32.xlu1 %v1574_v46, %s5731_s14 }
0x1aab   :  { %v1577_v50 = vpop.permute.xlu1 %1576 }
0x1aac   :  { %v1579_v51 = vadd.f32 %v1577_v50, %v1569_v49 }
0x1aae   :  { %5249 = vtanh.f32 %v1579_v51  ;;  %v1676_v3 = vrot.slane %v1579_v51, 2 }
0x1abb   :  { %v5250_v52 = vpop.eup %5249 }
0x1abc   :  { %1582 = vrot.lane.b32.xlu0 %v5250_v52, %s5730_s9 }
0x1b2e   :  { %v1583_v53 = vpop.permute.xlu0 %1582 }
0x1b2f   :  { %v6144_v54 = vmul.f32 %v5248_v43, %v1583_v53 }
0x1b31   :  { %v1592_v55 = vrot.slane %v6144_v54, 2 }
0x1b33   :  { %1593 = vrot.lane.b32.xlu1 %v1592_v55, %s5731_s14 }
0x1ba5   :  { %v1594_v2 = vpop.permute.xlu1 %1593 }
0x1ba6   :  { %4855 = vmatmul.mubr.msk.f32.vlgmr.msra.gmra.mxu1 %vm300_vm3, %v1594_v2 }
0x1ba7   :  { %4869 = vmatpush3.msra.mxu1 %v6046_v33  ;;  %4876 = vmatprep.mubr.msk.f32.mxu1 %vm5729_vm0, %v5728_v0 }
0x1ba8   :  { %4870 = vmatprep.subr.mxu1 %v5728_v0 }
0x1ba9   :  { %4871 = vmatpush3.msra.mxu1 %v6054_v35 }
0x1baa   :  { %4872 = vmatprep.subr.mxu1 %v5728_v0 }
0x1bab   :  { %4873 = vmatpush3.msra.mxu1 %v6060_v37 }
0x1bac   :  { %4874 = vmatprep.subr.mxu1 %v5728_v0 }
0x1bad   :  { %4875 = vmatpush3.msra.mxu1 %v6065_v38 }
0x1bae   :  { %4890 = vmatprep.subr.mxu1 %v5728_v0 }
0x1c66   :  { %v1663_v56 = vpop.f32.mrf.mxu1 }
0x1c67   :  { %v1667_v57 = vadd.f32 %v1663_v56, %v6098_v44 }
0x1c68   :  { %v4856_v4 = vpop.f32.mrf.mxu1 }
0x1c69   :  { %5251 = vtanh.f32 %v1667_v57  ;;  %v4455_v59 = vmul.f32 -1.442695, %v1667_v57 }
0x1c6b   :  { %5253 = vpow2.f32 %v4455_v59 }
0x1c76   :  { %v5252_v58 = vpop.eup %5251 }
0x1c77   :  { %1680 = vrot.lane.b32.xlu0 %v5252_v58, %s5730_s9 }
0x1c78   :  { %v5254_v60 = vpop.eup %5253 }
0x1c79   :  { %v1671_v61 = vadd.f32 1.0, %v5254_v60 }
0x1c7b   :  { %5255 = vrcp.f32 %v1671_v61 }
0x1c88   :  { %v5256_v62 = vpop.eup %5255 }
0x1c89   :  { %v1678_v9 = vmul.f32 %v5256_v62, %v1676_v3 }
0x1ce9   :  { %v1681_v63 = vpop.permute.xlu0 %1680 }
0x1cea   :  { %v1683_v1 = vmul.f32 %v5256_v62, %v1681_v63 }
0x1cec   :  { %1685 = vrot.lane.b32.xlu1 %v1683_v1, %s5731_s14 }
0x1d5e   :  { %v1686_v14 = vpop.permute.xlu1 %1685 }
0x1d5f   :  { %v1688_v15 = vadd.f32 %v1686_v14, %v1678_v9 }
0x1d61   :  { %5257 = vtanh.f32 %v1688_v15  ;;  %v1787_v42 = vrot.slane %v1688_v15, 2 }
0x1d6e   :  { %v5258_v44 = vpop.eup %5257 }
0x1d6f   :  { %1691 = vrot.lane.b32.xlu0 %v5258_v44, %s5730_s9 }
0x1de1   :  { %v1692_v16 = vpop.permute.xlu0 %1691 }
0x1de2   :  { %v6163_v17 = vmul.f32 %v5256_v62, %v1692_v16 }
0x1de4   :  { %1701 = vrot.lane.b32.xlu1 %v6163_v17, %s5731_s14 }
0x1e56   :  { %v1702_v18 = vpop.permute.xlu1 %1701 }
0x1e57   :  { %4866 = vmatmul.mubr.msk.f32.vlgmr.msra.gmra.mxu0 %vm300_vm3, %v1702_v18 }
0x1e58   :  { %4880 = vmatpush3.msra.mxu0 %v6046_v33  ;;  %4887 = vmatprep.mubr.msk.f32.mxu0 %vm5729_vm0, %v5728_v0 }
0x1e59   :  { %4881 = vmatprep.subr.mxu0 %v5728_v0 }
0x1e5a   :  { %4882 = vmatpush3.msra.mxu0 %v6054_v35 }
0x1e5b   :  { %4883 = vmatprep.subr.mxu0 %v5728_v0 }
0x1e5c   :  { %4884 = vmatpush3.msra.mxu0 %v6060_v37 }
0x1e5d   :  { %4885 = vmatprep.subr.mxu0 %v5728_v0 }
0x1e5e   :  { %4886 = vmatpush3.msra.mxu0 %v6065_v38 }
0x1f17   :  { %v1771_v19 = vpop.f32.mrf.mxu0 }
0x1f18   :  { %v1776_v21 = vrot.slane %v1771_v19, 2 }
0x1f19   :  { %v4867_v22 = vpop.f32.mrf.mxu0 }
0x1f1a   :  { %v1778_v23 = vadd.f32 %v1776_v21, %v6179_v20  ;;  %v1141_v22 = vrot.slane %v6093_v40, 2 }
0x1f1c   :  { %5259 = vtanh.f32 %v1778_v23  ;;  %v4457_v25 = vmul.f32 -1.442695, %v1778_v23 }
0x1f1e   :  { %5261 = vpow2.f32 %v4457_v25 }
0x1f29   :  { %v5260_v24 = vpop.eup %5259 }
0x1f2a   :  { %1791 = vrot.lane.b32.xlu0 %v5260_v24, %s5730_s9 }
0x1f2b   :  { %v5262_v5 = vpop.eup %5261 }
0x1f2c   :  { %v1782_v27 = vadd.f32 1.0, %v5262_v5  ;;  %v1143_v5 = vadd.f32 %v1141_v22, %v5934_v11 }
0x1f2e   :  { %5263 = vrcp.f32 %v1782_v27 }
0x1f3b   :  { %v5264_v28 = vpop.eup %5263 }
0x1f3c   :  { %v1789_v8 = vmul.f32 %v5264_v28, %v1787_v42 }
0x1f9c   :  { %v1792_v30 = vpop.permute.xlu0 %1791 }
0x1f9d   :  { %v1794_v13 = vmul.f32 %v5264_v28, %v1792_v30  ;;  %v4445_v30 = vmul.f32 -1.442695, %v1143_v5 }
0x1f9f   :  { %1796 = vrot.lane.b32.xlu1 %v1794_v13, %s5731_s14 }
0x2011   :  { %v1797_v31 = vpop.permute.xlu1 %1796 }
0x2012   :  { %v1799_v34 = vadd.f32 %v1797_v31, %v1789_v8 }
0x2014   :  { %5265 = vtanh.f32 %v1799_v34 }
0x2021   :  { %v5266_v6 = vpop.eup %5265 }
0x2022   :  { %1802 = vrot.lane.b32.xlu0 %v5266_v6, %s5730_s9 }
0x2094   :  { %v1803_v39 = vpop.permute.xlu0 %1802 }
0x2095   :  { %v6185_v41 = vmul.f32 %v5264_v28, %v1803_v39  ;;  %v1152_v39 = vrot.slane %v6042_v29, 6 }
0x2097   :  { %v1811_v43 = vrot.slane %v6185_v41, 6 }
0x2099   :  { %1812 = vrot.lane.b32.xlu1 %v1811_v43, %s5731_s14 }
0x210b   :  { %v1813_v45 = vpop.permute.xlu1 %1812 }
0x210c   :  { %4877 = vmatmul.mubr.msk.f32.vlgmr.msra.gmra.mxu1 %vm300_vm3, %v1813_v45 }
0x210d   :  { %4891 = vmatpush3.msra.mxu1 %v6046_v33  ;;  %4898 = vmatprep.mubr.msk.f32.mxu1 %vm5729_vm0, %v5728_v0 }
0x210e   :  { %4892 = vmatprep.subr.mxu1 %v5728_v0 }
0x210f   :  { %4893 = vmatpush3.msra.mxu1 %v6054_v35 }
0x2110   :  { %4894 = vmatprep.subr.mxu1 %v5728_v0 }
0x2111   :  { %4895 = vmatpush3.msra.mxu1 %v6060_v37 }
0x2112   :  { %4896 = vmatprep.subr.mxu1 %v5728_v0 }
0x2113   :  { %4897 = vmatpush3.msra.mxu1 %v6065_v38  ;;  %v1898_v38 = vrot.slane %v1799_v34, 2 }
0x2114   :  { %4920 = vmatprep.subr.mxu1 %v5728_v0 }
0x21cc   :  { %v1882_v46 = vpop.f32.mrf.mxu1 }
0x21cd   :  { %v1887_v47 = vrot.slane %v1882_v46, 4 }
0x21ce   :  { %v4878_v33 = vpop.f32.mrf.mxu1 }
0x21cf   :  { %v1889_v49 = vadd.f32 %v1887_v47, %v6179_v20 }
0x21d1   :  { %5267 = vtanh.f32 %v1889_v49  ;;  %v4459_v35 = vmul.f32 -1.442695, %v1889_v49 }
0x21d3   :  { %5269 = vpow2.f32 %v4459_v35 }
0x21de   :  { %v5268_v50 = vpop.eup %5267 }
0x21df   :  { %1902 = vrot.lane.b32.xlu0 %v5268_v50, %s5730_s9 }
0x21e0   :  { %v5270_v51 = vpop.eup %5269 }
0x21e1   :  { %v1893_v52 = vadd.f32 1.0, %v5270_v51 }
0x21e3   :  { %5271 = vrcp.f32 %v1893_v52 }
0x21f0   :  { %v5272_v37 = vpop.eup %5271 }
0x21f1   :  { %v1900_v2 = vmul.f32 %v5272_v37, %v1898_v38 }
0x2251   :  { %v1903_v53 = vpop.permute.xlu0 %1902 }
0x2252   :  { %v1905_v55 = vmul.f32 %v5272_v37, %v1903_v53 }
0x2254   :  { %1907 = vrot.lane.b32.xlu1 %v1905_v55, %s5731_s14 }
0x22c6   :  { %v1908_v56 = vpop.permute.xlu1 %1907 }
0x22c7   :  { %v1910_v57 = vadd.f32 %v1908_v56, %v1900_v2 }
0x22c9   :  { %5273 = vtanh.f32 %v1910_v57  ;;  %v2009_v21 = vrot.slane %v1910_v57, 2 }
0x22d6   :  { %v5274_v4 = vpop.eup %5273 }
0x22d7   :  { %1913 = vrot.lane.b32.xlu0 %v5274_v4, %s5730_s9 }
0x2349   :  { %v1914_v58 = vpop.permute.xlu0 %1913 }
0x234a   :  { %v6204_v59 = vmul.f32 %v5272_v37, %v1914_v58  ;;  %v2150_v58 = vld [vmem:[%s6822_s7 + $0x38] sm:$0xff] }
0x234b   :  { %4901 = vmatprep.subr.mxu0 %v2150_v58 }
0x234c   :  { %v1922_v60 = vrot.slane %v6204_v59, 4 }
0x234e   :  { %1923 = vrot.lane.b32.xlu1 %v1922_v60, %s5731_s14  ;;  %v2149_v60 = vld [vmem:[%s6822_s7 + $0x30] sm:$0xff] }
0x23c0   :  { %v1924_v61 = vpop.permute.xlu1 %1923 }
0x23c1   :  { %4888 = vmatmul.mubr.msk.f32.vlgmr.msra.gmra.mxu0 %vm300_vm3, %v1924_v61 }
0x23c2   :  { %4902 = vmatpush3.msra.mxu0 %v2150_v58 }
0x23c3   :  { %4903 = vmatprep.subr.mxu0 %v2149_v60 }
0x23c4   :  { %4904 = vmatpush3.msra.mxu0 %v2149_v60 }
0x2481   :  { %v1993_v62 = vpop.f32.mrf.mxu0 }
0x2482   :  { %v1998_v63 = vrot.slane %v1993_v62, 6  ;;  %v2146_v62 = vld [vmem:[%s6822_s7 + $0x18] sm:$0xff] }
0x2483   :  { %v4889_v1 = vpop.f32.mrf.mxu0 }
0x2484   :  { %v2000_v3 = vadd.f32 %v1998_v63, %v6179_v20  ;;  %v2144_v63 = vld [vmem:[%s6822_s7 + $0x8] sm:$0xff] }
0x2485   :  { %v6288_v1 = vld [vmem:[#allocation16 + $0x10] sm:$0xff] }
0x2486   :  { %5275 = vtanh.f32 %v2000_v3  ;;  %v4461_v14 = vmul.f32 -1.442695, %v2000_v3  ;;  %v2143_v3 = vld [vmem:[%s6822_s7] sm:$0xff] }
0x2488   :  { %5277 = vpow2.f32 %v4461_v14 }
0x2493   :  { %v5276_v9 = vpop.eup %5275 }
0x2494   :  { %2013 = vrot.lane.b32.xlu0 %v5276_v9, %s5730_s9  ;;  %v6293_v9 = vld [vmem:[#allocation16 + $0x8] sm:$0xff] }
0x2495   :  { %v5278_v15 = vpop.eup %5277 }
0x2496   :  { %v2004_v44 = vadd.f32 1.0, %v5278_v15 }
0x2498   :  { %5279 = vrcp.f32 %v2004_v44  ;;  %v6299_v44 = vld [vmem:[#allocation16] sm:$0xff] }
0x24a5   :  { %v5280_v16 = vpop.eup %5279 }
0x24a6   :  { %v2011_v23 = vmul.f32 %v5280_v16, %v2009_v21 }
0x2506   :  { %v2014_v18 = vpop.permute.xlu0 %2013 }
0x2507   :  { %v2016_v19 = vmul.f32 %v5280_v16, %v2014_v18 }
0x2509   :  { %2018 = vrot.lane.b32.xlu1 %v2016_v19, %s5731_s14 }
0x257b   :  { %v2019_v24 = vpop.permute.xlu1 %2018 }
0x257c   :  { %v6213_v25 = vadd.f32 %v2019_v24, %v2011_v23 }
0x257e   :  { %5281 = vtanh.f32 %v6213_v25  ;;  %v2117_v2 = vrot.slane %v6213_v25, 2 }
0x257f   :  { %5283 = vtanh.f32 %v1143_v5 }
0x2580   :  { %5285 = vpow2.f32 %v4445_v30 }
0x258b   :  { %v5282_v27 = vpop.eup %5281 }
0x258c   :  { %2024 = vrot.lane.b32.xlu0 %v5282_v27, %s5730_s9  ;;  %v5284_v28 = vpop.eup %5283 }
0x258d   :  { %v5286_v13 = vpop.eup %5285 }
0x258e   :  { %v1147_v42 = vadd.f32 1.0, %v5286_v13  ;;  %v4464_v13 = vld [vmem:[#allocation18] ss:$0 sm:$0xff] }
0x2590   :  { %1156 = vrot.lane.b32.xlu0 %v5284_v28, %s5730_s9  ;;  %5287 = vrcp.f32 %v1147_v42 }
0x259d   :  { %v6219_v34 = vpop.eup %5287 }
0x259e   :  { %v1154_v45 = vmul.f32 %v6219_v34, %v1152_v39 }
0x25fe   :  { %v2025_v40 = vpop.permute.xlu0 %2024 }
0x25ff   :  { %v2027_v8 = vmul.f32 %v5280_v16, %v2025_v40 }
0x2601   :  { %v2033_v31 = vrot.slane %v2027_v8, 2 }
0x2602   :  { %v1157_v11 = vpop.permute.xlu0 %1156 }
0x2603   :  { %v1159_v6 = vmul.f32 %v6219_v34, %v1157_v11  ;;  %2034 = vrot.lane.b32.xlu1 %v2033_v31, %s5731_s14 }
0x2605   :  { %1161 = vrot.lane.b32.xlu0 %v1159_v6, %s5731_s14 }
0x2675   :  { %v2035_v43 = vpop.permute.xlu1 %2034 }
0x2676   :  { %4899 = vmatmul.mubr.msk.f32.vlgmr.msra.gmra.mxu1 %vm300_vm3, %v2035_v43 }
0x2677   :  { %v1162_v46 = vpop.permute.xlu0 %1161  ;;  %4928 = vmatprep.mubr.msk.f32.mxu1 %vm5729_vm0, %v5728_v0 }
0x2678   :  { %v1164_v47 = vadd.f32 %v1162_v46, %v1154_v45 }
0x267a   :  { %5289 = vtanh.f32 %v1164_v47 }
0x2687   :  { %v5290_v33 = vpop.eup %5289 }
0x2688   :  { %1167 = vrot.lane.b32.xlu0 %v5290_v33, %s5730_s9 }
0x268c   :  { %509 = vrot.lane.b32.xlu0 %v5959_v48, %s5731_s14 }
0x2690   :  { %733 = vrot.lane.b32.xlu0 %v5997_v32, %s5731_s14 }
0x2694   :  { %1061 = vrot.lane.b32.xlu0 %v6057_v36, %s5731_s14 }
0x2698   :  { %1807 = vrot.lane.b32.xlu0 %v6185_v41, %s5730_s9 }
0x269c   :  { %2029 = vrot.lane.b32.xlu0 %v2027_v8, %s5730_s9 }
0x26a0   :  { %1363 = vrot.lane.b32.xlu0 %v6104_v7, %s5730_s9 }
0x26a4   :  { %1587 = vrot.lane.b32.xlu0 %v6144_v54, %s5730_s9 }
0x26fa   :  { %v1168_v29 = vpop.permute.xlu0 %1167 }
0x26fb   :  { %v1170_v61 = vmul.f32 %v6219_v34, %v1168_v29 }
0x26fe   :  { %v510_v48 = vpop.permute.xlu0 %509 }
0x26ff   :  { %513 = vst.msk [vmem:[#allocation2] sm:$0xc] %vm512_vm4, %v510_v48 }
0x2702   :  { %v734_v32 = vpop.permute.xlu0 %733 }
0x2703   :  { %737 = vst.msk [vmem:[#allocation2] sm:$0xc0] %vm736_vm5, %v734_v32 }
0x2706   :  { %v1062_v36 = vpop.permute.xlu0 %1061 }
0x2707   :  { %1064 = vst.msk [vmem:[#allocation2 + $0x8] sm:$0x30] %vm624_vm6, %v1062_v36 }
0x270a   :  { %v1808_v41 = vpop.permute.xlu0 %1807 }
0x270b   :  { %1810 = vst.msk [vmem:[#allocation2] sm:$0xc0] %vm1366_vm7, %v1808_v41 }
0x270e   :  { %v2030_v7 = vpop.permute.xlu0 %2029 }
0x270f   :  { %2032 = vst.msk [vmem:[#allocation2] sm:$0xc] %vm1590_vm8, %v2030_v7 }
0x2712   :  { %v1364_v16 = vpop.permute.xlu0 %1363 }
0x2716   :  { %v1588_v21 = vpop.permute.xlu0 %1587 }
0x2736   :  { %v2104_v54 = vpop.f32.mrf.mxu1 }
0x2737   :  { %v2108_v49 = vadd.f32 %v2104_v54, %v6179_v20 }
0x2738   :  { %v4900_v50 = vpop.f32.mrf.mxu1 }
0x2739   :  { %5291 = vtanh.f32 %v2108_v49  ;;  %v4463_v51 = vmul.f32 -1.442695, %v2108_v49 }
0x273b   :  { %5293 = vpow2.f32 %v4463_v51 }
0x2746   :  { %v5292_v35 = vpop.eup %5291 }
0x2747   :  { %2121 = vrot.lane.b32.xlu1 %v5292_v35, %s5730_s9 }
0x2748   :  { %v5294_v52 = vpop.eup %5293 }
0x2749   :  { %v2112_v37 = vadd.f32 1.0, %v5294_v52 }
0x274b   :  { %5295 = vrcp.f32 %v2112_v37 }
0x2758   :  { %v5296_v53 = vpop.eup %5295 }
0x2759   :  { %v2119_v56 = vmul.f32 %v5296_v53, %v2117_v2 }
0x27b9   :  { %v2122_v55 = vpop.permute.xlu1 %2121 }
0x27ba   :  { %v2124_v38 = vmul.f32 %v5296_v53, %v2122_v55 }
0x27bc   :  { %2126 = vrot.lane.b32.xlu1 %v2124_v38, %s5731_s14 }
0x282e   :  { %v2127_v57 = vpop.permute.xlu1 %2126 }
0x282f   :  { %v2129_v20 = vadd.f32 %v2127_v57, %v2119_v56 }
0x2831   :  { %5297 = vtanh.f32 %v2129_v20 }
0x283e   :  { %v5298_v4 = vpop.eup %5297 }
0x283f   :  { %2132 = vrot.lane.b32.xlu1 %v5298_v4, %s5730_s9 }
0x2843   :  { %621 = vrot.lane.b32.xlu1 %v5978_v12, %s5731_s14  ;;  %v2148_v12 = vld [vmem:[%s6822_s7 + $0x28] sm:$0xff] }
0x2844   :  { %4905 = vmatprep.subr.mxu0 %v2148_v12 }
0x2845   :  { %4906 = vmatpush3.msra.mxu0 %v2148_v12 }
0x2847   :  { %950 = vrot.lane.b32.xlu1 %v6032_v10, %s5731_s14  ;;  %v2147_v10 = vld [vmem:[%s6822_s7 + $0x20] sm:$0xff] }
0x2848   :  { %4907 = vmatprep.subr.mxu0 %v2147_v10 }
0x2849   :  { %4908 = vmatpush3.msra.mxu0 %v2147_v10 }
0x284a   :  { %4909 = vmatprep.subr.mxu0 %v2146_v62 }
0x284b   :  { %1172 = vrot.lane.b32.xlu1 %v1170_v61, %s5731_s14  ;;  %4910 = vmatpush3.msra.mxu0 %v2146_v62 }
0x284f   :  { %1918 = vrot.lane.b32.xlu1 %v6204_v59, %s5730_s9  ;;  %v6281_v59 = vld [vmem:[#allocation16 + $0x18] sm:$0xff] }
0x2850   :  { %4921 = vmatpush3.msra.mxu1 %v6281_v59 }
0x2851   :  { %4922 = vmatprep.subr.mxu1 %v5728_v0 }
0x2852   :  { %4923 = vmatpush3.msra.mxu1 %v6288_v1 }
0x2853   :  { %1475 = vrot.lane.b32.xlu1 %v6125_v26, %s5730_s9  ;;  %v2145_v26 = vld [vmem:[%s6822_s7 + $0x10] sm:$0xff]  ;;  %4924 = vmatprep.subr.mxu1 %v5728_v0 }
0x2854   :  { %4911 = vmatprep.subr.mxu0 %v2145_v26  ;;  %4925 = vmatpush3.msra.mxu1 %v6293_v9 }
0x2855   :  { %4912 = vmatpush3.msra.mxu0 %v2145_v26  ;;  %4926 = vmatprep.subr.mxu1 %v5728_v0 }
0x2856   :  { %4913 = vmatprep.subr.mxu0 %v2144_v63  ;;  %4927 = vmatpush3.msra.mxu1 %v6299_v44 }
0x2857   :  { %4914 = vmatpush3.msra.mxu0 %v2144_v63  ;;  %4929 = vmatmul.mubr.f32.vlgmr.msra.gmra.mxu1 %v5728_v0 }
0x2858   :  { %4915 = vmatprep.subr.mxu0 %v2143_v3  ;;  %4931 = vmatprep.subr.mxu1 %v5728_v0 }
0x2859   :  { %4916 = vmatpush3.msra.mxu0 %v2143_v3  ;;  %4932 = vmatpush3.msra.mxu1 %v6281_v59 }
0x285a   :  { %4942 = vmatprep.subr.mxu0 %v5728_v0  ;;  %4939 = vmatprep.mubr.msk.f32.mxu1 %vm5729_vm0, %v5728_v0 }
0x285b   :  { %4933 = vmatprep.subr.mxu1 %v5728_v0 }
0x285c   :  { %4934 = vmatpush3.msra.mxu1 %v6288_v1 }
0x285d   :  { %4935 = vmatprep.subr.mxu1 %v5728_v0 }
0x285e   :  { %4936 = vmatpush3.msra.mxu1 %v6293_v9 }
0x285f   :  { %4937 = vmatprep.subr.mxu1 %v5728_v0 }
0x2860   :  { %4938 = vmatpush3.msra.mxu1 %v6299_v44 }
0x2861   :  { %4953 = vmatprep.subr.mxu1 %v5728_v0 }
0x28b1   :  { %v2133_v14 = vpop.permute.xlu1 %2132 }
0x28b2   :  { %v2135_v15 = vmul.f32 %v5296_v53, %v2133_v14 }
0x28b4   :  { %2137 = vrot.lane.b32.xlu1 %v2135_v15, %s5730_s9 }
0x28b5   :  { %v622_v18 = vpop.permute.xlu1 %621 }
0x28b6   :  { %625 = vst.msk [vmem:[#allocation2] sm:$0x30] %vm624_vm6, %v622_v18 }
0x28b8   :  { %1696 = vrot.lane.b32.xlu1 %v6163_v17, %s5730_s9 }
0x28b9   :  { %v951_v19 = vpop.permute.xlu1 %950 }
0x28ba   :  { %953 = vst.msk [vmem:[#allocation2 + $0x8] sm:$0xc] %vm512_vm4, %v951_v19 }
0x28bb   :  { %1591 = vst.msk [vmem:[#allocation2 + $0x8] sm:$0xc] %vm1590_vm8, %v1588_v21 }
0x28bd   :  { %v1173_v22 = vpop.permute.xlu1 %1172 }
0x28be   :  { %1175 = vst.msk [vmem:[#allocation2 + $0x8] sm:$0xc0] %vm736_vm5, %v1173_v22 }
0x28bf   :  { %1367 = vst.msk [vmem:[#allocation2 + $0x8] sm:$0xc0] %vm1366_vm7, %v1364_v16 }
0x28c1   :  { %v1919_v17 = vpop.permute.xlu1 %1918 }
0x28c2   :  { %1921 = vst.msk [vmem:[#allocation2] sm:$0x30] %vm1478_vm9, %v1919_v17 }
0x28c5   :  { %v1476_v23 = vpop.permute.xlu1 %1475 }
0x28c6   :  { %1479 = vst.msk [vmem:[#allocation2 + $0x8] sm:$0x30] %vm1478_vm9, %v1476_v23 }
0x2917   :  { %v2310_v28 = vpop.f32.mrf.mxu1 }
0x2919   :  { %v4930_v30 = vpop.f32.mrf.mxu1 }
0x2926   :  { %v2138_v24 = vpop.permute.xlu1 %2137 }
0x2927   :  { %2140 = vst.msk [vmem:[#allocation2] sm:$0x3] %vm1699_vm10, %v2138_v24 }
0x292a   :  { %v1697_v25 = vpop.permute.xlu1 %1696 }
0x292b   :  { %1700 = vst.msk [vmem:[#allocation2 + $0x8] sm:$0x3] %vm1699_vm10, %v1697_v25 }
0x292e   :  { %v6327_v5 = vld [vmem:[#allocation2] sm:$0xff] }
0x292f   :  { %4917 = vmatprep.mubr.msk.f32.mxu0 %vm2158_vm11, %v6327_v5 }
0x2932   :  { %v6331_v27 = vld [vmem:[#allocation2 + $0x8] sm:$0xff] }
0x2933   :  { %4918 = vmatmul.mubr.msk.f32.vlgmr.msra.gmra.mxu0 %vm2158_vm11, %v6331_v27 }
0x2934   :  { %4943 = vmatpush3.msra.mxu0 %v6281_v59  ;;  %4950 = vmatprep.mubr.msk.f32.mxu0 %vm5729_vm0, %v5728_v0 }
0x2935   :  { %4944 = vmatprep.subr.mxu0 %v5728_v0 }
0x2936   :  { %4945 = vmatpush3.msra.mxu0 %v6288_v1 }
0x2937   :  { %4946 = vmatprep.subr.mxu0 %v5728_v0 }
0x2938   :  { %4947 = vmatpush3.msra.mxu0 %v6293_v9 }
0x2939   :  { %4948 = vmatprep.subr.mxu0 %v5728_v0 }
0x293a   :  { %4949 = vmatpush3.msra.mxu0 %v6299_v44 }
0x293b   :  { %4964 = vmatprep.subr.mxu0 %v5728_v0 }
0x29f3   :  { %v4919_v42 = vpop.f32.mrf.mxu0 }
0x29f4   :  { %v6345_v40 = vadd.f32 %v4919_v42, %v4464_v13 }
0x29f5   :  { %v2231_v8 = vpop.f32.mrf.mxu0 }
0x29f6   :  { %v6347_v31 = vadd.f32 %v4464_v13, %v2231_v8 }
0x29f8   :  { %v2314_v34 = vadd.f32 %v2310_v28, %v6347_v31 }
0x29fa   :  { %5299 = vtanh.f32 %v2314_v34  ;;  %v4467_v6 = vmul.f32 -1.442695, %v2314_v34 }
0x29fc   :  { %5301 = vpow2.f32 %v4467_v6 }
0x2a07   :  { %v5300_v11 = vpop.eup %5299 }
0x2a08   :  { %2324 = vrot.lane.b32.xlu0 %v5300_v11, %s5730_s9 }
0x2a09   :  { %v5302_v39 = vpop.eup %5301 }
0x2a0a   :  { %v2318_v43 = vadd.f32 1.0, %v5302_v39 }
0x2a0c   :  { %5303 = vrcp.f32 %v2318_v43 }
0x2a19   :  { %v5304_v45 = vpop.eup %5303 }
0x2a1a   :  { %v2322_v33 = vmul.f32 0.0, %v5304_v45 }
0x2a7a   :  { %v2325_v46 = vpop.permute.xlu0 %2324 }
0x2a7b   :  { %v2327_v47 = vmul.f32 %v5304_v45, %v2325_v46 }
0x2a7d   :  { %2329 = vrot.lane.b32.xlu1 %v2327_v47, %s5731_s14 }
0x2aef   :  { %v2330_v29 = vpop.permute.xlu1 %2329 }
0x2af0   :  { %v2332_v48 = vadd.f32 %v2330_v29, %v2322_v33 }
0x2af2   :  { %5305 = vtanh.f32 %v2332_v48  ;;  %v2428_v56 = vrot.slane %v2332_v48, 6 }
0x2aff   :  { %v5306_v32 = vpop.eup %5305 }
0x2b00   :  { %2335 = vrot.lane.b32.xlu0 %v5306_v32, %s5730_s9 }
0x2b72   :  { %v2336_v36 = vpop.permute.xlu0 %2335 }
0x2b73   :  { %v2338_v41 = vmul.f32 %v5304_v45, %v2336_v36 }
0x2b75   :  { %2340 = vrot.lane.b32.xlu1 %v2338_v41, %s5731_s14 }
0x2be7   :  { %v2341_v7 = vpop.permute.xlu1 %2340 }
0x2be8   :  { %2343 = vst.msk [vmem:[#allocation3] sm:$0x3] %vm403_vm2, %v2341_v7  ;;  %4940 = vmatmul.mubr.msk.f32.vlgmr.msra.gmra.mxu1 %vm300_vm3, %v2341_v7 }
0x2be9   :  { %4954 = vmatpush3.msra.mxu1 %v6281_v59  ;;  %4961 = vmatprep.mubr.msk.f32.mxu1 %vm5729_vm0, %v5728_v0 }
0x2bea   :  { %4955 = vmatprep.subr.mxu1 %v5728_v0 }
0x2beb   :  { %4956 = vmatpush3.msra.mxu1 %v6288_v1 }
0x2bec   :  { %4957 = vmatprep.subr.mxu1 %v5728_v0 }
0x2bed   :  { %4958 = vmatpush3.msra.mxu1 %v6293_v9 }
0x2bee   :  { %4959 = vmatprep.subr.mxu1 %v5728_v0 }
0x2bef   :  { %4960 = vmatpush3.msra.mxu1 %v6299_v44 }
0x2bf0   :  { %4975 = vmatprep.subr.mxu1 %v5728_v0 }
0x2ca8   :  { %v2412_v54 = vpop.f32.mrf.mxu1 }
0x2ca9   :  { %v2417_v49 = vrot.slane %v2412_v54, 6 }
0x2caa   :  { %v4941_v50 = vpop.f32.mrf.mxu1 }
0x2cab   :  { %v2419_v35 = vadd.f32 %v2417_v49, %v6347_v31 }
0x2cad   :  { %5307 = vtanh.f32 %v2419_v35  ;;  %v4469_v52 = vmul.f32 -1.442695, %v2419_v35 }
0x2caf   :  { %5309 = vpow2.f32 %v4469_v52 }
0x2cba   :  { %v5308_v51 = vpop.eup %5307 }
0x2cbb   :  { %2432 = vrot.lane.b32.xlu0 %v5308_v51, %s5730_s9 }
0x2cbc   :  { %v5310_v37 = vpop.eup %5309 }
0x2cbd   :  { %v2423_v53 = vadd.f32 1.0, %v5310_v37 }
0x2cbf   :  { %5311 = vrcp.f32 %v2423_v53 }
0x2ccc   :  { %v5312_v55 = vpop.eup %5311 }
0x2ccd   :  { %v2430_v57 = vmul.f32 %v5312_v55, %v2428_v56 }
0x2d2d   :  { %v2433_v38 = vpop.permute.xlu0 %2432 }
0x2d2e   :  { %v2435_v2 = vmul.f32 %v5312_v55, %v2433_v38 }
0x2d30   :  { %2437 = vrot.lane.b32.xlu1 %v2435_v2, %s5731_s14 }
0x2da2   :  { %v2438_v20 = vpop.permute.xlu1 %2437 }
0x2da3   :  { %v2440_v4 = vadd.f32 %v2438_v20, %v2430_v57 }
0x2da5   :  { %5313 = vtanh.f32 %v2440_v4  ;;  %v2540_v17 = vrot.slane %v2440_v4, 6 }
0x2db2   :  { %v5314_v58 = vpop.eup %5313 }
0x2db3   :  { %2443 = vrot.lane.b32.xlu0 %v5314_v58, %s5730_s9 }
0x2e25   :  { %v2444_v60 = vpop.permute.xlu0 %2443 }
0x2e26   :  { %v6370_v61 = vmul.f32 %v5312_v55, %v2444_v60 }
0x2e28   :  { %v2453_v12 = vrot.slane %v6370_v61, 2 }
0x2e2a   :  { %2454 = vrot.lane.b32.xlu1 %v2453_v12, %s5731_s14 }
0x2e9c   :  { %v2455_v10 = vpop.permute.xlu1 %2454 }
0x2e9d   :  { %4951 = vmatmul.mubr.msk.f32.vlgmr.msra.gmra.mxu0 %vm300_vm3, %v2455_v10 }
0x2e9e   :  { %4965 = vmatpush3.msra.mxu0 %v6281_v59  ;;  %4972 = vmatprep.mubr.msk.f32.mxu0 %vm5729_vm0, %v5728_v0 }
0x2e9f   :  { %4966 = vmatprep.subr.mxu0 %v5728_v0 }
0x2ea0   :  { %4967 = vmatpush3.msra.mxu0 %v6288_v1 }
0x2ea1   :  { %4968 = vmatprep.subr.mxu0 %v5728_v0 }
0x2ea2   :  { %4969 = vmatpush3.msra.mxu0 %v6293_v9 }
0x2ea3   :  { %4970 = vmatprep.subr.mxu0 %v5728_v0 }
0x2ea4   :  { %4971 = vmatpush3.msra.mxu0 %v6299_v44 }
0x2ea5   :  { %4986 = vmatprep.subr.mxu0 %v5728_v0 }
0x2f5d   :  { %v2524_v62 = vpop.f32.mrf.mxu0 }
0x2f5e   :  { %v2529_v26 = vrot.slane %v2524_v62, 4 }
0x2f5f   :  { %v4952_v63 = vpop.f32.mrf.mxu0 }
0x2f60   :  { %v2531_v3 = vadd.f32 %v2529_v26, %v6347_v31 }
0x2f62   :  { %5315 = vtanh.f32 %v2531_v3  ;;  %v4471_v15 = vmul.f32 -1.442695, %v2531_v3 }
0x2f64   :  { %5317 = vpow2.f32 %v4471_v15 }
0x2f6f   :  { %v5316_v14 = vpop.eup %5315 }
0x2f70   :  { %2544 = vrot.lane.b32.xlu0 %v5316_v14, %s5730_s9 }
0x2f71   :  { %v5318_v16 = vpop.eup %5317 }
0x2f72   :  { %v2535_v18 = vadd.f32 1.0, %v5318_v16 }
0x2f74   :  { %5319 = vrcp.f32 %v2535_v18 }
0x2f81   :  { %v5320_v19 = vpop.eup %5319 }
0x2f82   :  { %v2542_v23 = vmul.f32 %v5320_v19, %v2540_v17 }
0x2fe2   :  { %v2545_v21 = vpop.permute.xlu0 %2544 }
0x2fe3   :  { %v2547_v22 = vmul.f32 %v5320_v19, %v2545_v21 }
0x2fe5   :  { %2549 = vrot.lane.b32.xlu1 %v2547_v22, %s5731_s14 }
0x3057   :  { %v2550_v24 = vpop.permute.xlu1 %2549 }
0x3058   :  { %v2552_v25 = vadd.f32 %v2550_v24, %v2542_v23 }
0x305a   :  { %5321 = vtanh.f32 %v2552_v25  ;;  %v2652_v32 = vrot.slane %v2552_v25, 6  ;;  %v3126_v25 = vld [vmem:[#allocation19 + $0x38] sm:$0xff] }
0x3067   :  { %v5322_v28 = vpop.eup %5321 }
0x3068   :  { %2555 = vrot.lane.b32.xlu0 %v5322_v28, %s5730_s9 }
0x30da   :  { %v2556_v30 = vpop.permute.xlu0 %2555 }
0x30db   :  { %v6389_v13 = vmul.f32 %v5320_v19, %v2556_v30 }
0x30dd   :  { %v2565_v42 = vrot.slane %v6389_v13, 4 }
0x30df   :  { %2566 = vrot.lane.b32.xlu1 %v2565_v42, %s5731_s14 }
0x3151   :  { %v2567_v8 = vpop.permute.xlu1 %2566 }
0x3152   :  { %4962 = vmatmul.mubr.msk.f32.vlgmr.msra.gmra.mxu1 %vm300_vm3, %v2567_v8 }
0x3153   :  { %4976 = vmatpush3.msra.mxu1 %v6281_v59  ;;  %4983 = vmatprep.mubr.msk.f32.mxu1 %vm5729_vm0, %v5728_v0 }
0x3154   :  { %4977 = vmatprep.subr.mxu1 %v5728_v0 }
0x3155   :  { %4978 = vmatpush3.msra.mxu1 %v6288_v1 }
0x3156   :  { %4979 = vmatprep.subr.mxu1 %v5728_v0 }
0x3157   :  { %4980 = vmatpush3.msra.mxu1 %v6293_v9 }
0x3158   :  { %4981 = vmatprep.subr.mxu1 %v5728_v0 }
0x3159   :  { %4982 = vmatpush3.msra.mxu1 %v6299_v44 }
0x315a   :  { %4997 = vmatprep.subr.mxu1 %v5728_v0 }
0x3212   :  { %v2636_v34 = vpop.f32.mrf.mxu1 }
0x3213   :  { %v2641_v11 = vrot.slane %v2636_v34, 2 }
0x3214   :  { %v4963_v6 = vpop.f32.mrf.mxu1 }
0x3215   :  { %v2643_v39 = vadd.f32 %v2641_v11, %v6347_v31  ;;  %v3125_v11 = vld [vmem:[#allocation19 + $0x30] sm:$0xff]  ;;  %v3124_v6 = vld [vmem:[#allocation19 + $0x28] sm:$0xff] }
0x3217   :  { %5323 = vtanh.f32 %v2643_v39  ;;  %v4473_v45 = vmul.f32 -1.442695, %v2643_v39  ;;  %v3123_v39 = vld [vmem:[#allocation19 + $0x20] sm:$0xff] }
0x3219   :  { %5325 = vpow2.f32 %v4473_v45  ;;  %v3121_v45 = vld [vmem:[#allocation19 + $0x10] sm:$0xff] }
0x3224   :  { %v5324_v43 = vpop.eup %5323 }
0x3225   :  { %2656 = vrot.lane.b32.xlu0 %v5324_v43, %s5730_s9  ;;  %v3122_v43 = vld [vmem:[#allocation19 + $0x18] sm:$0xff] }
0x3226   :  { %v5326_v46 = vpop.eup %5325 }
0x3227   :  { %v2647_v47 = vadd.f32 1.0, %v5326_v46  ;;  %v3120_v46 = vld [vmem:[#allocation19 + $0x8] sm:$0xff] }
0x3229   :  { %5327 = vrcp.f32 %v2647_v47  ;;  %v3119_v47 = vld [vmem:[#allocation19] sm:$0xff] }
0x3236   :  { %v5328_v33 = vpop.eup %5327 }
0x3237   :  { %v2654_v36 = vmul.f32 %v5328_v33, %v2652_v32 }
0x3297   :  { %v2657_v29 = vpop.permute.xlu0 %2656 }
0x3298   :  { %v2659_v48 = vmul.f32 %v5328_v33, %v2657_v29 }
0x329a   :  { %2661 = vrot.lane.b32.xlu1 %v2659_v48, %s5731_s14 }
0x330c   :  { %v2662_v41 = vpop.permute.xlu1 %2661 }
0x330d   :  { %v2664_v7 = vadd.f32 %v2662_v41, %v2654_v36 }
0x330f   :  { %5329 = vtanh.f32 %v2664_v7  ;;  %v2761_v4 = vrot.slane %v2664_v7, 6 }
0x331c   :  { %v5330_v31 = vpop.eup %5329 }
0x331d   :  { %2667 = vrot.lane.b32.xlu0 %v5330_v31, %s5730_s9 }
0x338f   :  { %v2668_v54 = vpop.permute.xlu0 %2667 }
0x3390   :  { %v6408_v49 = vmul.f32 %v5328_v33, %v2668_v54 }
0x3392   :  { %v2677_v50 = vrot.slane %v6408_v49, 6 }
0x3394   :  { %2678 = vrot.lane.b32.xlu1 %v2677_v50, %s5731_s14 }
0x3406   :  { %v2679_v35 = vpop.permute.xlu1 %2678 }
0x3407   :  { %4973 = vmatmul.mubr.msk.f32.vlgmr.msra.gmra.mxu0 %vm300_vm3, %v2679_v35 }
0x3408   :  { %4987 = vmatpush3.msra.mxu0 %v6281_v59  ;;  %4994 = vmatprep.mubr.msk.f32.mxu0 %vm5729_vm0, %v5728_v0 }
0x3409   :  { %4988 = vmatprep.subr.mxu0 %v5728_v0 }
0x340a   :  { %4989 = vmatpush3.msra.mxu0 %v6288_v1 }
0x340b   :  { %4990 = vmatprep.subr.mxu0 %v5728_v0 }
0x340c   :  { %4991 = vmatpush3.msra.mxu0 %v6293_v9 }
0x340d   :  { %4992 = vmatprep.subr.mxu0 %v5728_v0 }
0x340e   :  { %4993 = vmatpush3.msra.mxu0 %v6299_v44 }
0x340f   :  { %5008 = vmatprep.subr.mxu0 %v3126_v25 }
0x34c7   :  { %v2748_v51 = vpop.f32.mrf.mxu0 }
0x34c8   :  { %v2752_v52 = vadd.f32 %v2748_v51, %v6345_v40 }
0x34c9   :  { %v4974_v37 = vpop.f32.mrf.mxu0 }
0x34ca   :  { %5331 = vtanh.f32 %v2752_v52  ;;  %v4475_v55 = vmul.f32 -1.442695, %v2752_v52 }
0x34cc   :  { %5333 = vpow2.f32 %v4475_v55  ;;  %v6471_v55 = vld [vmem:[%s6826_s11 + $0x10] sm:$0xff] }
0x34d7   :  { %v5332_v53 = vpop.eup %5331 }
0x34d8   :  { %2765 = vrot.lane.b32.xlu0 %v5332_v53, %s5730_s9  ;;  %v6465_v53 = vld [vmem:[%s6826_s11 + $0x18] sm:$0xff] }
0x34d9   :  { %v5334_v38 = vpop.eup %5333 }
0x34da   :  { %v2756_v2 = vadd.f32 1.0, %v5334_v38  ;;  %v6478_v38 = vld [vmem:[%s6826_s11 + $0x8] sm:$0xff] }
0x34dc   :  { %5335 = vrcp.f32 %v2756_v2  ;;  %v6485_v2 = vld [vmem:[%s6826_s11] sm:$0xff] }
0x34e9   :  { %v5336_v56 = vpop.eup %5335 }
0x34ea   :  { %v2763_v58 = vmul.f32 %v5336_v56, %v2761_v4 }
0x354a   :  { %v2766_v57 = vpop.permute.xlu0 %2765 }
0x354b   :  { %v2768_v20 = vmul.f32 %v5336_v56, %v2766_v57 }
0x354d   :  { %2770 = vrot.lane.b32.xlu1 %v2768_v20, %s5731_s14 }
0x35bf   :  { %v2771_v60 = vpop.permute.xlu1 %2770 }
0x35c0   :  { %v2773_v12 = vadd.f32 %v2771_v60, %v2763_v58 }
0x35c2   :  { %5337 = vtanh.f32 %v2773_v12 }
0x35cf   :  { %v5338_v10 = vpop.eup %5337 }
0x35d0   :  { %2776 = vrot.lane.b32.xlu0 %v5338_v10, %s5730_s9  ;;  %v6521_v10 = vld [vmem:[%s6827_s12] ss:$0 sm:$0xff] }
0x3642   :  { %v2777_v62 = vpop.permute.xlu0 %2776 }
0x3643   :  { %v2779_v26 = vmul.f32 %v5336_v56, %v2777_v62 }
0x3645   :  { %2781 = vrot.lane.b32.xlu1 %v2779_v26, %s5731_s14 }
0x36b7   :  { %v2782_v63 = vpop.permute.xlu1 %2781 }
0x36b8   :  { %2785 = vst.msk [vmem:[#allocation3 + $0x8] sm:$0x3] %vm403_vm2, %v2782_v63  ;;  %4984 = vmatmul.mubr.msk.f32.vlgmr.msra.gmra.mxu1 %vm300_vm3, %v2782_v63 }
0x36b9   :  { %4998 = vmatpush3.msra.mxu1 %v6281_v59  ;;  %5005 = vmatprep.mubr.msk.f32.mxu1 %vm5729_vm0, %v5728_v0 }
0x36ba   :  { %4999 = vmatprep.subr.mxu1 %v5728_v0 }
0x36bb   :  { %5000 = vmatpush3.msra.mxu1 %v6288_v1 }
0x36bc   :  { %5001 = vmatprep.subr.mxu1 %v5728_v0 }
0x36bd   :  { %5002 = vmatpush3.msra.mxu1 %v6293_v9 }
0x36be   :  { %5003 = vmatprep.subr.mxu1 %v5728_v0 }
0x36bf   :  { %5004 = vmatpush3.msra.mxu1 %v6299_v44  ;;  %v2870_v44 = vrot.slane %v2773_v12, 6 }
0x36c0   :  { %5027 = vmatprep.subr.mxu1 %v5728_v0 }
0x3778   :  { %v2854_v3 = vpop.f32.mrf.mxu1 }
0x3779   :  { %v2859_v14 = vrot.slane %v2854_v3, 6 }
0x377a   :  { %v4985_v59 = vpop.f32.mrf.mxu1 }
0x377b   :  { %v2861_v15 = vadd.f32 %v2859_v14, %v6345_v40 }
0x377d   :  { %5339 = vtanh.f32 %v2861_v15  ;;  %v4477_v1 = vmul.f32 -1.442695, %v2861_v15 }
0x377f   :  { %5341 = vpow2.f32 %v4477_v1 }
0x378a   :  { %v5340_v16 = vpop.eup %5339 }
0x378b   :  { %2874 = vrot.lane.b32.xlu0 %v5340_v16, %s5730_s9 }
0x378c   :  { %v5342_v18 = vpop.eup %5341 }
0x378d   :  { %v2865_v19 = vadd.f32 1.0, %v5342_v18 }
0x378f   :  { %5343 = vrcp.f32 %v2865_v19 }
0x379c   :  { %v5344_v9 = vpop.eup %5343 }
0x379d   :  { %v2872_v17 = vmul.f32 %v5344_v9, %v2870_v44 }
0x37fd   :  { %v2875_v21 = vpop.permute.xlu0 %2874 }
0x37fe   :  { %v2877_v22 = vmul.f32 %v5344_v9, %v2875_v21 }
0x3800   :  { %2879 = vrot.lane.b32.xlu1 %v2877_v22, %s5731_s14 }
0x3872   :  { %v2880_v23 = vpop.permute.xlu1 %2879 }
0x3873   :  { %v2882_v24 = vadd.f32 %v2880_v23, %v2872_v17 }
0x3875   :  { %5345 = vtanh.f32 %v2882_v24  ;;  %v2982_v50 = vrot.slane %v2882_v24, 6 }
0x3882   :  { %v5346_v28 = vpop.eup %5345 }
0x3883   :  { %2885 = vrot.lane.b32.xlu0 %v5346_v28, %s5730_s9 }
0x38f5   :  { %v2886_v30 = vpop.permute.xlu0 %2885 }
0x38f6   :  { %v6443_v42 = vmul.f32 %v5344_v9, %v2886_v30 }
0x38f8   :  { %v2895_v8 = vrot.slane %v6443_v42, 2 }
0x38fa   :  { %2896 = vrot.lane.b32.xlu1 %v2895_v8, %s5731_s14 }
0x396c   :  { %v2897_v34 = vpop.permute.xlu1 %2896 }
0x396d   :  { %4995 = vmatmul.mubr.msk.f32.vlgmr.msra.gmra.mxu0 %vm300_vm3, %v2897_v34 }
0x396e   :  { %5009 = vmatpush3.msra.mxu0 %v3126_v25  ;;  %5024 = vmatprep.mubr.msk.f32.mxu0 %vm2158_vm11, %v6327_v5 }
0x396f   :  { %5010 = vmatprep.subr.mxu0 %v3125_v11 }
0x3970   :  { %5011 = vmatpush3.msra.mxu0 %v3125_v11 }
0x3971   :  { %5012 = vmatprep.subr.mxu0 %v3124_v6 }
0x3972   :  { %5013 = vmatpush3.msra.mxu0 %v3124_v6 }
0x3973   :  { %5014 = vmatprep.subr.mxu0 %v3123_v39 }
0x3974   :  { %5015 = vmatpush3.msra.mxu0 %v3123_v39 }
0x3975   :  { %5016 = vmatprep.subr.mxu0 %v3122_v43 }
0x3976   :  { %5017 = vmatpush3.msra.mxu0 %v3122_v43 }
0x3977   :  { %5018 = vmatprep.subr.mxu0 %v3121_v45 }
0x3978   :  { %5019 = vmatpush3.msra.mxu0 %v3121_v45 }
0x3979   :  { %5020 = vmatprep.subr.mxu0 %v3120_v46 }
0x397a   :  { %5021 = vmatpush3.msra.mxu0 %v3120_v46 }
0x397b   :  { %5022 = vmatprep.subr.mxu0 %v3119_v47 }
0x397c   :  { %5023 = vmatpush3.msra.mxu0 %v3119_v47 }
0x397d   :  { %5025 = vmatmul.mubr.msk.f32.vlgmr.msra.gmra.mxu0 %vm2158_vm11, %v6331_v27  ;;  %5049 = vmatprep.subr.mxu0 %v5728_v0 }
0x397e   :  { %5057 = vmatprep.mubr.msk.f32.mxu0 %vm5729_vm0, %v5728_v0  ;;  %5050 = vmatpush3.msra.mxu0 %v6465_v53 }
0x397f   :  { %5051 = vmatprep.subr.mxu0 %v5728_v0 }
0x3980   :  { %5052 = vmatpush3.msra.mxu0 %v6471_v55 }
0x3981   :  { %5053 = vmatprep.subr.mxu0 %v5728_v0 }
0x3982   :  { %5054 = vmatpush3.msra.mxu0 %v6478_v38 }
0x3983   :  { %5055 = vmatprep.subr.mxu0 %v5728_v0 }
0x3984   :  { %5056 = vmatpush3.msra.mxu0 %v6485_v2 }
0x3985   :  { %5071 = vmatprep.subr.mxu0 %v5728_v0 }
0x3a2d   :  { %v2966_v5 = vpop.f32.mrf.mxu0 }
0x3a2e   :  { %v2971_v33 = vrot.slane %v2966_v5, 4 }
0x3a2f   :  { %v4996_v29 = vpop.f32.mrf.mxu0 }
0x3a30   :  { %v2973_v48 = vadd.f32 %v2971_v33, %v6345_v40 }
0x3a32   :  { %5347 = vtanh.f32 %v2973_v48  ;;  %v4479_v36 = vmul.f32 -1.442695, %v2973_v48 }
0x3a34   :  { %5349 = vpow2.f32 %v4479_v36 }
0x3a3d   :  { %v5026_v12 = vpop.f32.mrf.mxu0 }
0x3a3e   :  { %v6524_v26 = vadd.f32 %v5026_v12, %v6521_v10 }
0x3a3f   :  { %v5348_v32 = vpop.eup %5347 }
0x3a40   :  { %2986 = vrot.lane.b32.xlu0 %v5348_v32, %s5730_s9 }
0x3a41   :  { %v5350_v41 = vpop.eup %5349 }
0x3a42   :  { %v2977_v7 = vadd.f32 1.0, %v5350_v41 }
0x3a44   :  { %5351 = vrcp.f32 %v2977_v7 }
0x3a51   :  { %v5352_v27 = vpop.eup %5351 }
0x3a52   :  { %v2984_v35 = vmul.f32 %v5352_v27, %v2982_v50 }
0x3ab2   :  { %v2987_v31 = vpop.permute.xlu0 %2986 }
0x3ab3   :  { %v2989_v54 = vmul.f32 %v5352_v27, %v2987_v31 }
0x3ab5   :  { %2991 = vrot.lane.b32.xlu1 %v2989_v54, %s5731_s14  ;;  %v6564_v54 = vpop.f32.mrf.mxu0 }
0x3b27   :  { %v2992_v51 = vpop.permute.xlu1 %2991 }
0x3b28   :  { %v6458_v52 = vadd.f32 %v2992_v51, %v2984_v35 }
0x3b2a   :  { %5353 = vtanh.f32 %v6458_v52 }
0x3b37   :  { %v5354_v37 = vpop.eup %5353 }
0x3b38   :  { %2997 = vrot.lane.b32.xlu0 %v5354_v37, %s5730_s9 }
0x3baa   :  { %v2998_v56 = vpop.permute.xlu0 %2997 }
0x3bab   :  { %v6490_v57 = vmul.f32 %v5352_v27, %v2998_v56 }
0x3bad   :  { %v3007_v20 = vrot.slane %v6490_v57, 4 }
0x3baf   :  { %3008 = vrot.lane.b32.xlu1 %v3007_v20, %s5731_s14 }
0x3c21   :  { %v3009_v4 = vpop.permute.xlu1 %3008 }
0x3c22   :  { %5006 = vmatmul.mubr.msk.f32.vlgmr.msra.gmra.mxu1 %vm300_vm3, %v3009_v4 }
0x3c23   :  { %5028 = vmatpush3.msra.mxu1 %v6465_v53  ;;  %5035 = vmatprep.mubr.msk.f32.mxu1 %vm5729_vm0, %v5728_v0 }
0x3c24   :  { %5029 = vmatprep.subr.mxu1 %v5728_v0 }
0x3c25   :  { %5030 = vmatpush3.msra.mxu1 %v6471_v55 }
0x3c26   :  { %5031 = vmatprep.subr.mxu1 %v5728_v0 }
0x3c27   :  { %5032 = vmatpush3.msra.mxu1 %v6478_v38 }
0x3c28   :  { %5033 = vmatprep.subr.mxu1 %v5728_v0 }
0x3c29   :  { %5034 = vmatpush3.msra.mxu1 %v6485_v2 }
0x3c2a   :  { %5036 = vmatmul.mubr.f32.vlgmr.msra.gmra.mxu1 %v5728_v0  ;;  %5038 = vmatprep.subr.mxu1 %v5728_v0 }
0x3c2b   :  { %5039 = vmatpush3.msra.mxu1 %v6465_v53  ;;  %5046 = vmatprep.mubr.msk.f32.mxu1 %vm5729_vm0, %v5728_v0 }
0x3c2c   :  { %5040 = vmatprep.subr.mxu1 %v5728_v0 }
0x3c2d   :  { %5041 = vmatpush3.msra.mxu1 %v6471_v55 }
0x3c2e   :  { %5042 = vmatprep.subr.mxu1 %v5728_v0 }
0x3c2f   :  { %5043 = vmatpush3.msra.mxu1 %v6478_v38 }
0x3c30   :  { %5044 = vmatprep.subr.mxu1 %v5728_v0 }
0x3c31   :  { %5045 = vmatpush3.msra.mxu1 %v6485_v2 }
0x3c32   :  { %5060 = vmatprep.subr.mxu1 %v5728_v0 }
0x3ce2   :  { %v6516_v58 = vpop.f32.mrf.mxu1 }
0x3ce4   :  { %v5007_v60 = vpop.f32.mrf.mxu1 }
0x3cea   :  { %v3279_v62 = vpop.f32.mrf.mxu1 }
0x3ceb   :  { %v3284_v63 = vrot.slane %v3279_v62, 2 }
0x3cec   :  { %v5037_v3 = vpop.f32.mrf.mxu1 }
0x3ced   :  { %v3286_v14 = vadd.f32 %v3284_v63, %v6524_v26 }
0x3cef   :  { %5355 = vtanh.f32 %v3286_v14  ;;  %v4485_v15 = vmul.f32 -1.442695, %v3286_v14 }
0x3cf1   :  { %5357 = vpow2.f32 %v4485_v15 }
0x3cfc   :  { %v5356_v59 = vpop.eup %5355 }
0x3cfd   :  { %3296 = vrot.lane.b32.xlu0 %v5356_v59, %s5730_s9 }
0x3cfe   :  { %v5358_v16 = vpop.eup %5357 }
0x3cff   :  { %v3290_v1 = vadd.f32 1.0, %v5358_v16 }
0x3d01   :  { %5359 = vrcp.f32 %v3290_v1 }
0x3d0e   :  { %v5360_v18 = vpop.eup %5359 }
0x3d0f   :  { %v3294_v21 = vmul.f32 0.0, %v5360_v18 }
0x3d6f   :  { %v3297_v19 = vpop.permute.xlu0 %3296 }
0x3d70   :  { %v3299_v9 = vmul.f32 %v5360_v18, %v3297_v19 }
0x3d72   :  { %3301 = vrot.lane.b32.xlu1 %v3299_v9, %s5731_s14 }
0x3de4   :  { %v3302_v22 = vpop.permute.xlu1 %3301 }
0x3de5   :  { %v3304_v44 = vadd.f32 %v3302_v22, %v3294_v21 }
0x3de7   :  { %5361 = vtanh.f32 %v3304_v44  ;;  %v3403_v33 = vrot.slane %v3304_v44, 2 }
0x3df4   :  { %v5362_v17 = vpop.eup %5361 }
0x3df5   :  { %3307 = vrot.lane.b32.xlu0 %v5362_v17, %s5730_s9 }
0x3e67   :  { %v3308_v23 = vpop.permute.xlu0 %3307 }
0x3e68   :  { %v6530_v24 = vmul.f32 %v5360_v18, %v3308_v23 }
0x3e6a   :  { %v3316_v25 = vrot.slane %v6530_v24, 6 }
0x3e6c   :  { %3317 = vrot.lane.b32.xlu1 %v3316_v25, %s5731_s14 }
0x3ede   :  { %v3318_v28 = vpop.permute.xlu1 %3317 }
0x3edf   :  { %5047 = vmatmul.mubr.msk.f32.vlgmr.msra.gmra.mxu1 %vm300_vm3, %v3318_v28 }
0x3ee0   :  { %5061 = vmatpush3.msra.mxu1 %v6465_v53  ;;  %5068 = vmatprep.mubr.msk.f32.mxu1 %vm5729_vm0, %v5728_v0 }
0x3ee1   :  { %5062 = vmatprep.subr.mxu1 %v5728_v0 }
0x3ee2   :  { %5063 = vmatpush3.msra.mxu1 %v6471_v55 }
0x3ee3   :  { %5064 = vmatprep.subr.mxu1 %v5728_v0 }
0x3ee4   :  { %5065 = vmatpush3.msra.mxu1 %v6478_v38 }
0x3ee5   :  { %5066 = vmatprep.subr.mxu1 %v5728_v0 }
0x3ee6   :  { %5067 = vmatpush3.msra.mxu1 %v6485_v2 }
0x3ee7   :  { %5082 = vmatprep.subr.mxu1 %v5728_v0 }
0x3f9f   :  { %v3387_v30 = vpop.f32.mrf.mxu1 }
0x3fa0   :  { %v3392_v8 = vrot.slane %v3387_v30, 4 }
0x3fa1   :  { %v5048_v34 = vpop.f32.mrf.mxu1 }
0x3fa2   :  { %v3394_v11 = vadd.f32 %v3392_v8, %v6524_v26 }
0x3fa4   :  { %5363 = vtanh.f32 %v3394_v11  ;;  %v4487_v39 = vmul.f32 -1.442695, %v3394_v11 }
0x3fa6   :  { %5365 = vpow2.f32 %v4487_v39 }
0x3fb1   :  { %v5364_v6 = vpop.eup %5363 }
0x3fb2   :  { %3407 = vrot.lane.b32.xlu0 %v5364_v6, %s5730_s9 }
0x3fb3   :  { %v5366_v43 = vpop.eup %5365 }
0x3fb4   :  { %v3398_v45 = vadd.f32 1.0, %v5366_v43 }
0x3fb6   :  { %5367 = vrcp.f32 %v3398_v45 }
0x3fc3   :  { %v5368_v46 = vpop.eup %5367 }
0x3fc4   :  { %v3405_v29 = vmul.f32 %v5368_v46, %v3403_v33  ;;  %v6606_v33 = vadd.f32 %v6521_v10, %v6564_v54 }
0x4024   :  { %v3408_v47 = vpop.permute.xlu0 %3407 }
0x4025   :  { %v3410_v5 = vmul.f32 %v5368_v46, %v3408_v47 }
0x4027   :  { %3412 = vrot.lane.b32.xlu1 %v3410_v5, %s5731_s14 }
0x4099   :  { %v3413_v48 = vpop.permute.xlu1 %3412 }
0x409a   :  { %v3415_v32 = vadd.f32 %v3413_v48, %v3405_v29 }
0x409c   :  { %5369 = vtanh.f32 %v3415_v32  ;;  %v3514_v3 = vrot.slane %v3415_v32, 2 }
0x40a9   :  { %v5370_v36 = vpop.eup %5369 }
0x40aa   :  { %3418 = vrot.lane.b32.xlu0 %v5370_v36, %s5730_s9 }
0x411c   :  { %v3419_v41 = vpop.permute.xlu0 %3418 }
0x411d   :  { %v6549_v7 = vmul.f32 %v5368_v46, %v3419_v41 }
0x411f   :  { %v3427_v27 = vrot.slane %v6549_v7, 4 }
0x4121   :  { %3428 = vrot.lane.b32.xlu1 %v3427_v27, %s5731_s14 }
0x4193   :  { %v3429_v31 = vpop.permute.xlu1 %3428 }
0x4194   :  { %5058 = vmatmul.mubr.msk.f32.vlgmr.msra.gmra.mxu0 %vm300_vm3, %v3429_v31 }
0x4195   :  { %5072 = vmatpush3.msra.mxu0 %v6465_v53  ;;  %5079 = vmatprep.mubr.msk.f32.mxu0 %vm5729_vm0, %v5728_v0 }
0x4196   :  { %5073 = vmatprep.subr.mxu0 %v5728_v0 }
0x4197   :  { %5074 = vmatpush3.msra.mxu0 %v6471_v55 }
0x4198   :  { %5075 = vmatprep.subr.mxu0 %v5728_v0 }
0x4199   :  { %5076 = vmatpush3.msra.mxu0 %v6478_v38 }
0x419a   :  { %5077 = vmatprep.subr.mxu0 %v5728_v0 }
0x419b   :  { %5078 = vmatpush3.msra.mxu0 %v6485_v2 }
0x419c   :  { %5093 = vmatprep.subr.mxu0 %v5728_v0 }
0x4254   :  { %v3498_v50 = vpop.f32.mrf.mxu0 }
0x4255   :  { %v3503_v35 = vrot.slane %v3498_v50, 6 }
0x4256   :  { %v5059_v51 = vpop.f32.mrf.mxu0 }
0x4257   :  { %v3505_v37 = vadd.f32 %v3503_v35, %v6524_v26 }
0x4259   :  { %5371 = vtanh.f32 %v3505_v37  ;;  %v4489_v20 = vmul.f32 -1.442695, %v3505_v37 }
0x425b   :  { %5373 = vpow2.f32 %v4489_v20 }
0x4266   :  { %v5372_v56 = vpop.eup %5371 }
0x4267   :  { %3518 = vrot.lane.b32.xlu0 %v5372_v56, %s5730_s9 }
0x4268   :  { %v5374_v4 = vpop.eup %5373 }
0x4269   :  { %v3509_v60 = vadd.f32 1.0, %v5374_v4 }
0x426b   :  { %5375 = vrcp.f32 %v3509_v60 }
0x4278   :  { %v5376_v12 = vpop.eup %5375 }
0x4279   :  { %v3516_v14 = vmul.f32 %v5376_v12, %v3514_v3 }
0x42d9   :  { %v3519_v62 = vpop.permute.xlu0 %3518 }
0x42da   :  { %v3521_v63 = vmul.f32 %v5376_v12, %v3519_v62 }
0x42dc   :  { %3523 = vrot.lane.b32.xlu1 %v3521_v63, %s5731_s14 }
0x434e   :  { %v3524_v59 = vpop.permute.xlu1 %3523 }
0x434f   :  { %v3526_v15 = vadd.f32 %v3524_v59, %v3516_v14 }
0x4351   :  { %5377 = vtanh.f32 %v3526_v15  ;;  %v3622_v11 = vrot.slane %v3526_v15, 2 }
0x435e   :  { %v5378_v16 = vpop.eup %5377 }
0x435f   :  { %3529 = vrot.lane.b32.xlu0 %v5378_v16, %s5730_s9 }
0x43d1   :  { %v3530_v1 = vpop.permute.xlu0 %3529 }
0x43d2   :  { %v6570_v18 = vmul.f32 %v5376_v12, %v3530_v1 }
0x43d4   :  { %v3538_v19 = vrot.slane %v6570_v18, 2 }
0x43d6   :  { %3539 = vrot.lane.b32.xlu1 %v3538_v19, %s5731_s14 }
0x4448   :  { %v3540_v9 = vpop.permute.xlu1 %3539 }
0x4449   :  { %5069 = vmatmul.mubr.msk.f32.vlgmr.msra.gmra.mxu1 %vm300_vm3, %v3540_v9 }
0x444a   :  { %5083 = vmatpush3.msra.mxu1 %v6465_v53  ;;  %5090 = vmatprep.mubr.msk.f32.mxu1 %vm5729_vm0, %v5728_v0 }
0x444b   :  { %5084 = vmatprep.subr.mxu1 %v5728_v0 }
0x444c   :  { %5085 = vmatpush3.msra.mxu1 %v6471_v55 }
0x444d   :  { %5086 = vmatprep.subr.mxu1 %v5728_v0 }
0x444e   :  { %5087 = vmatpush3.msra.mxu1 %v6478_v38 }
0x444f   :  { %5088 = vmatprep.subr.mxu1 %v5728_v0 }
0x4450   :  { %5089 = vmatpush3.msra.mxu1 %v6485_v2 }
0x4451   :  { %5104 = vmatprep.subr.mxu1 %v5728_v0 }
0x4509   :  { %v3609_v21 = vpop.f32.mrf.mxu1 }
0x450a   :  { %v3613_v22 = vadd.f32 %v3609_v21, %v6524_v26 }
0x450b   :  { %v5070_v44 = vpop.f32.mrf.mxu1 }
0x450c   :  { %5379 = vtanh.f32 %v3613_v22  ;;  %v4491_v23 = vmul.f32 -1.442695, %v3613_v22 }
0x450e   :  { %5381 = vpow2.f32 %v4491_v23 }
0x4519   :  { %v5380_v17 = vpop.eup %5379 }
0x451a   :  { %3626 = vrot.lane.b32.xlu0 %v5380_v17, %s5730_s9 }
0x451b   :  { %v5382_v25 = vpop.eup %5381 }
0x451c   :  { %v3617_v28 = vadd.f32 1.0, %v5382_v25 }
0x451e   :  { %5383 = vrcp.f32 %v3617_v28 }
0x452b   :  { %v5384_v30 = vpop.eup %5383 }
0x452c   :  { %v3624_v6 = vmul.f32 %v5384_v30, %v3622_v11 }
0x458c   :  { %v3627_v8 = vpop.permute.xlu0 %3626 }
0x458d   :  { %v3629_v34 = vmul.f32 %v5384_v30, %v3627_v8 }
0x458f   :  { %3631 = vrot.lane.b32.xlu1 %v3629_v34, %s5731_s14 }
0x4601   :  { %v3632_v39 = vpop.permute.xlu1 %3631 }
0x4602   :  { %v3634_v43 = vadd.f32 %v3632_v39, %v3624_v6 }
0x4604   :  { %5385 = vtanh.f32 %v3634_v43  ;;  %v3732_v10 = vrot.slane %v3634_v43, 2 }
0x4611   :  { %v5386_v26 = vpop.eup %5385 }
0x4612   :  { %3637 = vrot.lane.b32.xlu0 %v5386_v26, %s5730_s9 }
0x4684   :  { %v3638_v45 = vpop.permute.xlu0 %3637 }
0x4685   :  { %v6589_v46 = vmul.f32 %v5384_v30, %v3638_v45 }
0x4687   :  { %3646 = vrot.lane.b32.xlu1 %v6589_v46, %s5731_s14 }
0x46f9   :  { %v3647_v47 = vpop.permute.xlu1 %3646 }
0x46fa   :  { %5080 = vmatmul.mubr.msk.f32.vlgmr.msra.gmra.mxu0 %vm300_vm3, %v3647_v47 }
0x46fb   :  { %5094 = vmatpush3.msra.mxu0 %v6465_v53  ;;  %5101 = vmatprep.mubr.msk.f32.mxu0 %vm5729_vm0, %v5728_v0 }
0x46fc   :  { %5095 = vmatprep.subr.mxu0 %v5728_v0 }
0x46fd   :  { %5096 = vmatpush3.msra.mxu0 %v6471_v55 }
0x46fe   :  { %5097 = vmatprep.subr.mxu0 %v5728_v0 }
0x46ff   :  { %5098 = vmatpush3.msra.mxu0 %v6478_v38 }
0x4700   :  { %5099 = vmatprep.subr.mxu0 %v5728_v0 }
0x4701   :  { %5100 = vmatpush3.msra.mxu0 %v6485_v2 }
0x4702   :  { %5115 = vmatprep.subr.mxu0 %v5728_v0 }
0x47ba   :  { %v3716_v5 = vpop.f32.mrf.mxu0 }
0x47bb   :  { %v3721_v29 = vrot.slane %v3716_v5, 2 }
0x47bc   :  { %v5081_v48 = vpop.f32.mrf.mxu0 }
0x47bd   :  { %v3723_v32 = vadd.f32 %v3721_v29, %v6606_v33  ;;  %v3083_v48 = vrot.slane %v6516_v58, 2 }
0x47bf   :  { %5387 = vtanh.f32 %v3723_v32  ;;  %v4493_v41 = vmul.f32 -1.442695, %v3723_v32 }
0x47c1   :  { %5389 = vpow2.f32 %v4493_v41 }
0x47cc   :  { %v5388_v36 = vpop.eup %5387 }
0x47cd   :  { %3736 = vrot.lane.b32.xlu0 %v5388_v36, %s5730_s9 }
0x47ce   :  { %v5390_v27 = vpop.eup %5389 }
0x47cf   :  { %v3727_v31 = vadd.f32 1.0, %v5390_v27  ;;  %v3085_v27 = vadd.f32 %v3083_v48, %v6345_v40 }
0x47d1   :  { %5391 = vrcp.f32 %v3727_v31 }
0x47de   :  { %v5392_v50 = vpop.eup %5391 }
0x47df   :  { %v3734_v54 = vmul.f32 %v5392_v50, %v3732_v10 }
0x483f   :  { %v3737_v35 = vpop.permute.xlu0 %3736 }
0x4840   :  { %v3739_v51 = vmul.f32 %v5392_v50, %v3737_v35  ;;  %v4481_v35 = vmul.f32 -1.442695, %v3085_v27 }
0x4842   :  { %3741 = vrot.lane.b32.xlu1 %v3739_v51, %s5731_s14 }
0x48b4   :  { %v3742_v37 = vpop.permute.xlu1 %3741 }
0x48b5   :  { %v3744_v56 = vadd.f32 %v3742_v37, %v3734_v54 }
0x48b7   :  { %5393 = vtanh.f32 %v3744_v56 }
0x48c4   :  { %v5394_v20 = vpop.eup %5393 }
0x48c5   :  { %3747 = vrot.lane.b32.xlu0 %v5394_v20, %s5730_s9 }
0x4937   :  { %v3748_v4 = vpop.permute.xlu0 %3747 }
0x4938   :  { %v6612_v60 = vmul.f32 %v5392_v50, %v3748_v4  ;;  %v3094_v4 = vrot.slane %v6458_v52, 6 }
0x493a   :  { %v3756_v12 = vrot.slane %v6612_v60, 6 }
0x493c   :  { %3757 = vrot.lane.b32.xlu1 %v3756_v12, %s5731_s14 }
0x49ae   :  { %v3758_v62 = vpop.permute.xlu1 %3757 }
0x49af   :  { %5091 = vmatmul.mubr.msk.f32.vlgmr.msra.gmra.mxu1 %vm300_vm3, %v3758_v62 }
0x49b0   :  { %5105 = vmatpush3.msra.mxu1 %v6465_v53  ;;  %5112 = vmatprep.mubr.msk.f32.mxu1 %vm5729_vm0, %v5728_v0 }
0x49b1   :  { %5106 = vmatprep.subr.mxu1 %v5728_v0 }
0x49b2   :  { %5107 = vmatpush3.msra.mxu1 %v6471_v55 }
0x49b3   :  { %5108 = vmatprep.subr.mxu1 %v5728_v0 }
0x49b4   :  { %5109 = vmatpush3.msra.mxu1 %v6478_v38 }
0x49b5   :  { %5110 = vmatprep.subr.mxu1 %v5728_v0 }
0x49b6   :  { %5111 = vmatpush3.msra.mxu1 %v6485_v2  ;;  %v3843_v2 = vrot.slane %v3744_v56, 2 }
0x49b7   :  { %5134 = vmatprep.subr.mxu1 %v5728_v0 }
0x4a6f   :  { %v3827_v63 = vpop.f32.mrf.mxu1 }
0x4a70   :  { %v3832_v3 = vrot.slane %v3827_v63, 4 }
0x4a71   :  { %v5092_v53 = vpop.f32.mrf.mxu1 }
0x4a72   :  { %v3834_v14 = vadd.f32 %v3832_v3, %v6606_v33 }
0x4a74   :  { %5395 = vtanh.f32 %v3834_v14  ;;  %v4495_v55 = vmul.f32 -1.442695, %v3834_v14 }
0x4a76   :  { %5397 = vpow2.f32 %v4495_v55 }
0x4a81   :  { %v5396_v59 = vpop.eup %5395 }
0x4a82   :  { %3847 = vrot.lane.b32.xlu0 %v5396_v59, %s5730_s9 }
0x4a83   :  { %v5398_v15 = vpop.eup %5397 }
0x4a84   :  { %v3838_v16 = vadd.f32 1.0, %v5398_v15 }
0x4a86   :  { %5399 = vrcp.f32 %v3838_v16 }
0x4a93   :  { %v5400_v38 = vpop.eup %5399 }
0x4a94   :  { %v3845_v9 = vmul.f32 %v5400_v38, %v3843_v2 }
0x4af4   :  { %v3848_v1 = vpop.permute.xlu0 %3847 }
0x4af5   :  { %v3850_v19 = vmul.f32 %v5400_v38, %v3848_v1 }
0x4af7   :  { %3852 = vrot.lane.b32.xlu1 %v3850_v19, %s5731_s14 }
0x4b69   :  { %v3853_v21 = vpop.permute.xlu1 %3852 }
0x4b6a   :  { %v3855_v22 = vadd.f32 %v3853_v21, %v3845_v9 }
0x4b6c   :  { %5401 = vtanh.f32 %v3855_v22  ;;  %v3954_v29 = vrot.slane %v3855_v22, 2 }
0x4b79   :  { %v5402_v44 = vpop.eup %5401 }
0x4b7a   :  { %3858 = vrot.lane.b32.xlu0 %v5402_v44, %s5730_s9 }
0x4bec   :  { %v3859_v17 = vpop.permute.xlu0 %3858 }
0x4bed   :  { %v6631_v23 = vmul.f32 %v5400_v38, %v3859_v17 }
0x4bef   :  { %v3867_v25 = vrot.slane %v6631_v23, 4 }
0x4bf1   :  { %3868 = vrot.lane.b32.xlu1 %v3867_v25, %s5731_s14 }
0x4c63   :  { %v3869_v28 = vpop.permute.xlu1 %3868 }
0x4c64   :  { %5102 = vmatmul.mubr.msk.f32.vlgmr.msra.gmra.mxu0 %vm300_vm3, %v3869_v28 }
0x4c65   :  { %5131 = vmatprep.mubr.msk.f32.mxu0 %vm5729_vm0, %v5728_v0 }
0x4d24   :  { %v3938_v30 = vpop.f32.mrf.mxu0 }
0x4d25   :  { %v3943_v8 = vrot.slane %v3938_v30, 6 }
0x4d26   :  { %v5103_v34 = vpop.f32.mrf.mxu0 }
0x4d27   :  { %v3945_v11 = vadd.f32 %v3943_v8, %v6606_v33 }
0x4d29   :  { %5403 = vtanh.f32 %v3945_v11  ;;  %v4497_v39 = vmul.f32 -1.442695, %v3945_v11 }
0x4d2b   :  { %5405 = vpow2.f32 %v4497_v39 }
0x4d36   :  { %v5404_v6 = vpop.eup %5403 }
0x4d37   :  { %3958 = vrot.lane.b32.xlu0 %v5404_v6, %s5730_s9 }
0x4d38   :  { %v5406_v43 = vpop.eup %5405 }
0x4d39   :  { %v3949_v26 = vadd.f32 1.0, %v5406_v43 }
0x4d3b   :  { %5407 = vrcp.f32 %v3949_v26 }
0x4d48   :  { %v5408_v45 = vpop.eup %5407 }
0x4d49   :  { %v3956_v32 = vmul.f32 %v5408_v45, %v3954_v29 }
0x4da9   :  { %v3959_v47 = vpop.permute.xlu0 %3958 }
0x4daa   :  { %v3961_v5 = vmul.f32 %v5408_v45, %v3959_v47  ;;  %v4500_v47 = vld [vmem:[%s6828_s13] ss:$0 sm:$0xff] }
0x4dac   :  { %3963 = vrot.lane.b32.xlu1 %v3961_v5, %s5731_s14 }
0x4e1e   :  { %v3964_v36 = vpop.permute.xlu1 %3963 }
0x4e1f   :  { %v6642_v41 = vadd.f32 %v3964_v36, %v3956_v32 }
0x4e21   :  { %5409 = vtanh.f32 %v6642_v41  ;;  %v4062_v22 = vrot.slane %v6642_v41, 2 }
0x4e22   :  { %5411 = vtanh.f32 %v3085_v27 }
0x4e23   :  { %5413 = vpow2.f32 %v4481_v35 }
0x4e2e   :  { %v5410_v31 = vpop.eup %5409 }
0x4e2f   :  { %3969 = vrot.lane.b32.xlu0 %v5410_v31, %s5730_s9  ;;  %v5412_v50 = vpop.eup %5411 }
0x4e30   :  { %v5414_v51 = vpop.eup %5413 }
0x4e31   :  { %v3089_v10 = vadd.f32 1.0, %v5414_v51 }
0x4e33   :  { %3098 = vrot.lane.b32.xlu0 %v5412_v50, %s5730_s9  ;;  %5415 = vrcp.f32 %v3089_v10 }
0x4e40   :  { %v5416_v56 = vpop.eup %5415 }
0x4e41   :  { %v3096_v62 = vmul.f32 %v5416_v56, %v3094_v4 }
0x4ea1   :  { %v3970_v58 = vpop.permute.xlu0 %3969 }
0x4ea2   :  { %v3972_v54 = vmul.f32 %v5408_v45, %v3970_v58 }
0x4ea4   :  { %v3978_v37 = vrot.slane %v3972_v54, 2 }
0x4ea5   :  { %v3099_v20 = vpop.permute.xlu0 %3098 }
0x4ea6   :  { %v3101_v40 = vmul.f32 %v5416_v56, %v3099_v20  ;;  %3979 = vrot.lane.b32.xlu1 %v3978_v37, %s5731_s14 }
0x4ea8   :  { %3103 = vrot.lane.b32.xlu0 %v3101_v40, %s5731_s14 }
0x4f18   :  { %v3980_v12 = vpop.permute.xlu1 %3979 }
0x4f19   :  { %5113 = vmatmul.mubr.msk.f32.vlgmr.msra.gmra.mxu1 %vm300_vm3, %v3980_v12 }
0x4f1a   :  { %v3104_v63 = vpop.permute.xlu0 %3103  ;;  %5150 = vmatprep.mubr.msk.f32.mxu1 %vm5729_vm0, %v5728_v0 }
0x4f1b   :  { %v3106_v3 = vadd.f32 %v3104_v63, %v3096_v62 }
0x4f1d   :  { %5417 = vtanh.f32 %v3106_v3 }
0x4f2a   :  { %v5418_v53 = vpop.eup %5417 }
0x4f2b   :  { %3109 = vrot.lane.b32.xlu0 %v5418_v53, %s5730_s9 }
0x4f2f   :  { %2448 = vrot.lane.b32.xlu0 %v6370_v61, %s5731_s14 }
0x4f33   :  { %2672 = vrot.lane.b32.xlu0 %v6408_v49, %s5731_s14 }
0x4f37   :  { %3002 = vrot.lane.b32.xlu0 %v6490_v57, %s5731_s14 }
0x4f3b   :  { %3312 = vrot.lane.b32.xlu0 %v6530_v24, %s5730_s9 }
0x4f3f   :  { %3534 = vrot.lane.b32.xlu0 %v6570_v18, %s5730_s9 }
0x4f43   :  { %3752 = vrot.lane.b32.xlu0 %v6612_v60, %s5730_s9 }
0x4f47   :  { %3974 = vrot.lane.b32.xlu0 %v3972_v54, %s5730_s9 }
0x4f9d   :  { %v3110_v52 = vpop.permute.xlu0 %3109 }
0x4f9e   :  { %v3112_v28 = vmul.f32 %v5416_v56, %v3110_v52 }
0x4fa1   :  { %v2449_v14 = vpop.permute.xlu0 %2448 }
0x4fa2   :  { %2452 = vst.msk [vmem:[#allocation3] sm:$0xc] %vm512_vm4, %v2449_v14 }
0x4fa5   :  { %v2673_v61 = vpop.permute.xlu0 %2672 }
0x4fa6   :  { %2676 = vst.msk [vmem:[#allocation3] sm:$0xc0] %vm736_vm5, %v2673_v61 }
0x4fa9   :  { %v3003_v49 = vpop.permute.xlu0 %3002 }
0x4faa   :  { %3006 = vst.msk [vmem:[#allocation3 + $0x8] sm:$0x30] %vm624_vm6, %v3003_v49  ;;  %v4237_v49 = vld [vmem:[#allocation21 + $0x38] sm:$0xff] }
0x4fab   :  { %5116 = vmatpush3.msra.mxu0 %v4237_v49 }
0x4fac   :  { %5117 = vmatprep.subr.mxu0 %v5728_v0 }
0x4fad   :  { %v3313_v57 = vpop.permute.xlu0 %3312 }
0x4fb1   :  { %v3535_v24 = vpop.permute.xlu0 %3534 }
0x4fb5   :  { %v3753_v59 = vpop.permute.xlu0 %3752 }
0x4fb6   :  { %3755 = vst.msk [vmem:[#allocation3] sm:$0xc0] %vm1366_vm7, %v3753_v59  ;;  %v4234_v59 = vld [vmem:[#allocation21 + $0x20] sm:$0xff] }
0x4fb9   :  { %v3975_v18 = vpop.permute.xlu0 %3974 }
0x4fba   :  { %3977 = vst.msk [vmem:[#allocation3] sm:$0xc] %vm1590_vm8, %v3975_v18  ;;  %v4233_v18 = vld [vmem:[#allocation21 + $0x18] sm:$0xff] }
0x4fbd   :  { %v6707_v43 = vld [vmem:[#allocation3 + $0x6] sm:$0x3] }
0x4fd9   :  { %v4049_v60 = vpop.f32.mrf.mxu1 }
0x4fda   :  { %v4053_v55 = vadd.f32 %v4049_v60, %v6606_v33  ;;  %v4232_v60 = vld [vmem:[#allocation21 + $0x10] sm:$0xff] }
0x4fdb   :  { %v5114_v15 = vpop.f32.mrf.mxu1 }
0x4fdc   :  { %5419 = vtanh.f32 %v4053_v55  ;;  %v4499_v38 = vmul.f32 -1.442695, %v4053_v55  ;;  %v4231_v55 = vld [vmem:[#allocation21 + $0x8] sm:$0xff]  ;;  %v4230_v15 = vld [vmem:[#allocation21] sm:$0xff] }
0x4fde   :  { %5421 = vpow2.f32 %v4499_v38  ;;  %v4324_v38 = vld [vmem:[%s6831_s16 + $0x30] sm:$0xff] }
0x4fe9   :  { %v5420_v16 = vpop.eup %5419 }
0x4fea   :  { %4066 = vrot.lane.b32.xlu1 %v5420_v16, %s5730_s9  ;;  %v4325_v16 = vld [vmem:[%s6831_s16 + $0x38] sm:$0xff] }
0x4feb   :  { %v5422_v1 = vpop.eup %5421  ;;  %5135 = vmatpush3.msra.mxu1 %v4325_v16 }
0x4fec   :  { %v4057_v19 = vadd.f32 1.0, %v5422_v1  ;;  %5136 = vmatprep.subr.mxu1 %v5728_v0  ;;  %v4323_v1 = vld [vmem:[%s6831_s16 + $0x28] sm:$0xff] }
0x4fed   :  { %5137 = vmatpush3.msra.mxu1 %v4324_v38 }
0x4fee   :  { %5423 = vrcp.f32 %v4057_v19  ;;  %5138 = vmatprep.subr.mxu1 %v5728_v0  ;;  %v4322_v19 = vld [vmem:[%s6831_s16 + $0x20] sm:$0xff] }
0x4fef   :  { %5139 = vmatpush3.msra.mxu1 %v4323_v1 }
0x4ff0   :  { %5140 = vmatprep.subr.mxu1 %v5728_v0 }
0x4ff1   :  { %5141 = vmatpush3.msra.mxu1 %v4322_v19 }
0x4ff2   :  { %5142 = vmatprep.subr.mxu1 %v5728_v0 }
0x4ffb   :  { %v5424_v2 = vpop.eup %5423 }
0x4ffc   :  { %v4064_v44 = vmul.f32 %v5424_v2, %v4062_v22 }
0x505c   :  { %v4067_v9 = vpop.permute.xlu1 %4066 }
0x505d   :  { %v4069_v21 = vmul.f32 %v5424_v2, %v4067_v9  ;;  %v4320_v9 = vld [vmem:[%s6831_s16 + $0x10] sm:$0xff] }
0x505f   :  { %4071 = vrot.lane.b32.xlu1 %v4069_v21, %s5731_s14 }
0x50d1   :  { %v4072_v17 = vpop.permute.xlu1 %4071 }
0x50d2   :  { %v4074_v33 = vadd.f32 %v4072_v17, %v4064_v44 }
0x50d4   :  { %5425 = vtanh.f32 %v4074_v33 }
0x50e1   :  { %v5426_v25 = vpop.eup %5425 }
0x50e2   :  { %4077 = vrot.lane.b32.xlu1 %v5426_v25, %s5730_s9 }
0x50e6   :  { %2560 = vrot.lane.b32.xlu1 %v6389_v13, %s5731_s14 }
0x50ea   :  { %2890 = vrot.lane.b32.xlu1 %v6443_v42, %s5731_s14 }
0x50ee   :  { %3114 = vrot.lane.b32.xlu1 %v3112_v28, %s5731_s14 }
0x50f2   :  { %3423 = vrot.lane.b32.xlu1 %v6549_v7, %s5730_s9  ;;  %v6695_v7 = vld [vmem:[#allocation3 + $0x2] sm:$0x3] }
0x50f3   :  { %5427 = vtanh.f32 %v6695_v7 }
0x50f6   :  { %3642 = vrot.lane.b32.xlu1 %v6589_v46, %s5730_s9 }
0x50fa   :  { %3863 = vrot.lane.b32.xlu1 %v6631_v23, %s5730_s9 }
0x5100   :  { %v5428_v26 = vpop.eup %5427 }
0x5101   :  { %v4110_v5 = vmul.f32 %v5428_v26, %v4500_v47 }
0x5103   :  { %v4121_v48 = vsel %vm4117_vm12, %v4110_v5, 0.0 }
0x5154   :  { %v4078_v30 = vpop.permute.xlu1 %4077 }
0x5155   :  { %v4080_v8 = vmul.f32 %v5424_v2, %v4078_v30  ;;  %v4321_v2 = vld [vmem:[%s6831_s16 + $0x18] sm:$0xff] }
0x5156   :  { %5143 = vmatpush3.msra.mxu1 %v4321_v2 }
0x5157   :  { %4082 = vrot.lane.b32.xlu1 %v4080_v8, %s5730_s9  ;;  %5144 = vmatprep.subr.mxu1 %v5728_v0 }
0x5158   :  { %v2561_v13 = vpop.permute.xlu1 %2560  ;;  %5145 = vmatpush3.msra.mxu1 %v4320_v9 }
0x5159   :  { %2564 = vst.msk [vmem:[#allocation3] sm:$0x30] %vm624_vm6, %v2561_v13  ;;  %5146 = vmatprep.subr.mxu1 %v5728_v0 }
0x515c   :  { %v2891_v42 = vpop.permute.xlu1 %2890 }
0x515d   :  { %2894 = vst.msk [vmem:[#allocation3 + $0x8] sm:$0xc] %vm512_vm4, %v2891_v42 }
0x515e   :  { %3537 = vst.msk [vmem:[#allocation3 + $0x8] sm:$0xc] %vm1590_vm8, %v3535_v24  ;;  %v4235_v24 = vld [vmem:[#allocation21 + $0x28] sm:$0xff] }
0x5160   :  { %v3115_v34 = vpop.permute.xlu1 %3114 }
0x5161   :  { %3118 = vst.msk [vmem:[#allocation3 + $0x8] sm:$0xc0] %vm736_vm5, %v3115_v34 }
0x5162   :  { %3315 = vst.msk [vmem:[#allocation3 + $0x8] sm:$0xc0] %vm1366_vm7, %v3313_v57  ;;  %v4236_v57 = vld [vmem:[#allocation21 + $0x30] sm:$0xff] }
0x5163   :  { %5118 = vmatpush3.msra.mxu0 %v4236_v57 }
0x5164   :  { %v3424_v46 = vpop.permute.xlu1 %3423  ;;  %5119 = vmatprep.subr.mxu0 %v5728_v0 }
0x5165   :  { %3426 = vst.msk [vmem:[#allocation3 + $0x8] sm:$0x30] %vm1478_vm9, %v3424_v46  ;;  %v6716_v29 = vld [vmem:[#allocation3 + $0xa] sm:$0x3]  ;;  %5120 = vmatpush3.msra.mxu0 %v4235_v24 }
0x5166   :  { %5121 = vmatprep.subr.mxu0 %v5728_v0 }
0x5167   :  { %5122 = vmatpush3.msra.mxu0 %v4234_v59 }
0x5168   :  { %v3643_v23 = vpop.permute.xlu1 %3642  ;;  %5123 = vmatprep.subr.mxu0 %v5728_v0 }
0x5169   :  { %3645 = vst.msk [vmem:[#allocation3 + $0x8] sm:$0x3] %vm1699_vm10, %v3643_v23  ;;  %v6726_v12 = vld [vmem:[#allocation3 + $0xe] sm:$0x3]  ;;  %5124 = vmatpush3.msra.mxu0 %v4233_v18 }
0x516a   :  { %5125 = vmatprep.subr.mxu0 %v5728_v0 }
0x516b   :  { %5126 = vmatpush3.msra.mxu0 %v4232_v60 }
0x516c   :  { %v3864_v11 = vpop.permute.xlu1 %3863  ;;  %v6701_v6 = vld [vmem:[#allocation3 + $0xc] sm:$0x3]  ;;  %5127 = vmatprep.subr.mxu0 %v5728_v0 }
0x516d   :  { %3866 = vst.msk [vmem:[#allocation3] sm:$0x30] %vm1478_vm9, %v3864_v11  ;;  %5429 = vtanh.f32 %v6701_v6  ;;  %5128 = vmatpush3.msra.mxu0 %v4231_v55 }
0x516e   :  { %5129 = vmatprep.subr.mxu0 %v5728_v0 }
0x516f   :  { %5130 = vmatpush3.msra.mxu0 %v4230_v15 }
0x5170   :  { %v6703_v39 = vld [vmem:[#allocation3 + $0x8] sm:$0x3] }
0x5171   :  { %5431 = vtanh.f32 %v6703_v39 }
0x5172   :  { %5433 = vtanh.f32 %v6707_v43 }
0x5174   :  { %v6709_v45 = vld [vmem:[#allocation3 + $0x4] sm:$0x3] }
0x5175   :  { %5435 = vtanh.f32 %v6709_v45 }
0x5176   :  { %5437 = vtanh.f32 %v6716_v29 }
0x5177   :  { %5439 = vtanh.f32 %v6726_v12 }
0x517a   :  { %v5430_v32 = vpop.eup %5429 }
0x517b   :  { %4122 = vadd.xlane.f32.xlu1 %v4121_v48  ;;  %v4115_v50 = vmul.f32 %v5430_v32, %v4500_v47 }
0x517d   :  { %v4136_v10 = vsel %vm4117_vm12, %v4115_v50, 0.0 }
0x517e   :  { %v5432_v36 = vpop.eup %5431 }
0x517f   :  { %v4113_v41 = vmul.f32 %v5432_v36, %v4500_v47  ;;  %v5434_v27 = vpop.eup %5433 }
0x5180   :  { %v4112_v54 = vmul.f32 %v5434_v27, %v4500_v47 }
0x5181   :  { %v4130_v31 = vsel %vm4117_vm12, %v4113_v41, 0.0 }
0x5182   :  { %v5436_v35 = vpop.eup %5435  ;;  %4131 = vadd.xlane.f32.xlu1 %v4130_v31  ;;  %v4127_v56 = vsel %vm4117_vm12, %v4112_v54, 0.0 }
0x5183   :  { %v4111_v51 = vmul.f32 %v5436_v35, %v4500_v47  ;;  %v5438_v37 = vpop.eup %5437 }
0x5184   :  { %v4114_v20 = vmul.f32 %v5438_v37, %v4500_v47  ;;  %v5440_v63 = vpop.eup %5439 }
0x5185   :  { %v4124_v58 = vsel %vm4117_vm12, %v4111_v51, 0.0  ;;  %v4116_v14 = vmul.f32 %v5440_v63, %v4500_v47 }
0x5186   :  { %4137 = vadd.xlane.f32.xlu1 %v4136_v10  ;;  %4125 = vadd.xlane.f32.xlu0 %v4124_v58  ;;  %v4133_v40 = vsel %vm4117_vm12, %v4114_v20, 0.0 }
0x5187   :  { %v4139_v61 = vsel %vm4117_vm12, %v4116_v14, 0.0 }
0x518a   :  { %4128 = vadd.xlane.f32.xlu0 %v4127_v56 }
0x518e   :  { %4134 = vadd.xlane.f32.xlu0 %v4133_v40 }
0x51c9   :  { %v4083_v4 = vpop.permute.xlu1 %4082 }
0x51ca   :  { %4085 = vst.msk [vmem:[#allocation3] sm:$0x3] %vm1699_vm10, %v4083_v4 }
0x51d1   :  { %v6728_v62 = vld [vmem:[#allocation3] sm:$0x3] }
0x51d2   :  { %5441 = vtanh.f32 %v6728_v62 }
0x51df   :  { %v5442_v3 = vpop.eup %5441 }
0x51e0   :  { %v4109_v53 = vmul.f32 %v5442_v3, %v4500_v47 }
0x51e2   :  { %v4118_v52 = vsel %vm4117_vm12, %v4109_v53, 0.0 }
0x51e3   :  { %4119 = vadd.xlane.f32.xlu0 %v4118_v52 }
0x51e7   :  { %4140 = vadd.xlane.f32.xlu0 %v4139_v61 }
0x5204   :  { %v4123_v22 = vpop.xlane.xlu1 %4122 }
0x5205   :  { %v4144_v11 = vsel %vm4142_vm13, %v4123_v22, -inf }
0x520b   :  { %v4132_v17 = vpop.xlane.xlu1 %4131 }
0x520c   :  { %v4147_v8 = vsel %vm4142_vm13, %v4132_v17, -inf }
0x520f   :  { %v4126_v21 = vpop.xlane.xlu0 %4125  ;;  %v4138_v25 = vpop.xlane.xlu1 %4137 }
0x5210   :  { %v4145_v13 = vsel %vm4142_vm13, %v4126_v21, -inf  ;;  %v4151_v42 = vsel %vm4142_vm13, %v4138_v25, -inf }
0x5211   :  { %v4152_v5 = vmax.f32 %v4145_v13, %v4151_v42 }
0x5213   :  { %v4129_v44 = vpop.xlane.xlu0 %4128 }
0x5214   :  { %v4146_v26 = vsel %vm4142_vm13, %v4129_v44, -inf }
0x5217   :  { %v4135_v33 = vpop.xlane.xlu0 %4134 }
0x5218   :  { %v4149_v34 = vsel %vm4142_vm13, %v4135_v33, -inf }
0x5219   :  { %v4150_v48 = vmax.f32 %v4144_v11, %v4149_v34 }
0x526c   :  { %v4120_v28 = vpop.xlane.xlu0 %4119 }
0x526d   :  { %v4143_v30 = vsel %vm4142_vm13, %v4120_v28, -inf }
0x526e   :  { %v4148_v46 = vmax.f32 %v4143_v30, %v4147_v8 }
0x5270   :  { %v4141_v23 = vpop.xlane.xlu0 %4140  ;;  %v4155_v36 = vmax.f32 %v4148_v46, %v4150_v48 }
0x5271   :  { %v4153_v47 = vsel %vm4142_vm13, %v4141_v23, -inf }
0x5272   :  { %v4154_v32 = vmax.f32 %v4146_v26, %v4153_v47 }
0x5274   :  { %v4156_v41 = vmax.f32 %v4152_v5, %v4154_v32 }
0x5276   :  { %v4157_v27 = vmax.f32 %v4155_v36, %v4156_v41 }
0x5278   :  { %v4158_v31 = vsub.f32 %v4120_v28, %v4157_v27  ;;  %v4159_v50 = vsub.f32 %v4123_v22, %v4157_v27  ;;  %v4160_v35 = vsub.f32 %v4126_v21, %v4157_v27  ;;  %v4161_v51 = vsub.f32 %v4129_v44, %v4157_v27 }
0x5279   :  { %v4162_v10 = vsub.f32 %v4132_v17, %v4157_v27  ;;  %v4163_v56 = vsub.f32 %v4135_v33, %v4157_v27  ;;  %v4164_v40 = vsub.f32 %v4138_v25, %v4157_v27  ;;  %v4165_v63 = vsub.f32 %v4141_v23, %v4157_v27 }
0x527a   :  { %v4166_v58 = vmul.f32 1.442695, %v4158_v31  ;;  %v4168_v54 = vmul.f32 1.442695, %v4159_v50  ;;  %v4170_v37 = vmul.f32 1.442695, %v4160_v35 }
0x527b   :  { %v4172_v20 = vmul.f32 1.442695, %v4161_v51  ;;  %v4174_v4 = vmul.f32 1.442695, %v4162_v10  ;;  %v4176_v3 = vmul.f32 1.442695, %v4163_v56 }
0x527c   :  { %5443 = vpow2.f32 %v4166_v58  ;;  %v4178_v53 = vmul.f32 1.442695, %v4164_v40  ;;  %v4180_v52 = vmul.f32 1.442695, %v4165_v63 }
0x527d   :  { %5445 = vpow2.f32 %v4168_v54 }
0x527e   :  { %5447 = vpow2.f32 %v4170_v37 }
0x527f   :  { %5449 = vpow2.f32 %v4172_v20 }
0x5280   :  { %5451 = vpow2.f32 %v4174_v4  ;;  %v4501_v4 = vld [vmem:[%s6830_s15] ss:$0 sm:$0xff] }
0x5281   :  { %5453 = vpow2.f32 %v4176_v3 }
0x5282   :  { %5455 = vpow2.f32 %v4178_v53 }
0x5283   :  { %5457 = vpow2.f32 %v4180_v52  ;;  %v4503_v52 = vld [vmem:[%s6832_s17] ss:$0 sm:$0xff] }
0x5289   :  { %v5444_v14 = vpop.eup %5443 }
0x528a   :  { %v5446_v61 = vpop.eup %5445  ;;  %v4182_v49 = vsel %vm4142_vm13, %v5444_v14, 0.0 }
0x528b   :  { %v5448_v57 = vpop.eup %5447  ;;  %v4183_v24 = vsel %vm4142_vm13, %v5446_v61, 0.0 }
0x528c   :  { %v5450_v59 = vpop.eup %5449  ;;  %v4184_v18 = vadd.f32 %v4183_v24, %v4182_v49  ;;  %v4185_v60 = vsel %vm4142_vm13, %v5448_v57, 0.0 }
0x528d   :  { %v5452_v55 = vpop.eup %5451  ;;  %v4187_v16 = vsel %vm4142_vm13, %v5450_v59, 0.0 }
0x528e   :  { %v4186_v15 = vadd.f32 %v4185_v60, %v4184_v18  ;;  %v5454_v38 = vpop.eup %5453  ;;  %v4189_v19 = vsel %vm4142_vm13, %v5452_v55, 0.0 }
0x528f   :  { %v5456_v2 = vpop.eup %5455  ;;  %v4191_v21 = vsel %vm4142_vm13, %v5454_v38, 0.0 }
0x5290   :  { %v4188_v1 = vadd.f32 %v4187_v16, %v4186_v15  ;;  %v5458_v22 = vpop.eup %5457  ;;  %v4193_v17 = vsel %vm4142_vm13, %v5456_v2, 0.0 }
0x5291   :  { %v4195_v25 = vsel %vm4142_vm13, %v5458_v22, 0.0 }
0x5292   :  { %v4190_v9 = vadd.f32 %v4189_v19, %v4188_v1 }
0x5294   :  { %v4192_v44 = vadd.f32 %v4191_v21, %v4190_v9 }
0x5296   :  { %v4194_v33 = vadd.f32 %v4193_v17, %v4192_v44 }
0x5298   :  { %v4196_v28 = vadd.f32 %v4195_v25, %v4194_v33 }
0x529a   :  { %5459 = vrcp.f32 %v4196_v28 }
0x52a7   :  { %v5460_v30 = vpop.eup %5459 }
0x52a8   :  { %v4198_v8 = vmul.f32 %v5460_v30, %v5444_v14  ;;  %v4199_v13 = vmul.f32 %v5460_v30, %v5446_v61  ;;  %v4200_v42 = vmul.f32 %v5460_v30, %v5448_v57  ;;  %v4201_v34 = vmul.f32 %v5460_v30, %v5450_v59 }
0x52a9   :  { %v4202_v46 = vmul.f32 %v5460_v30, %v5452_v55  ;;  %v4203_v47 = vmul.f32 %v5460_v30, %v5454_v38  ;;  %v4204_v41 = vmul.f32 %v5460_v30, %v5456_v2  ;;  %v4205_v35 = vmul.f32 %v5460_v30, %v5458_v22 }
0x52aa   :  { %v4206_v23 = vmul.f32 %v4198_v8, %v6728_v62  ;;  %v4207_v11 = vmul.f32 %v4199_v13, %v6695_v7  ;;  %v4208_v26 = vmul.f32 %v4200_v42, %v6709_v45  ;;  %v4209_v5 = vmul.f32 %v4201_v34, %v6707_v43 }
0x52ab   :  { %v4210_v27 = vmul.f32 %v4202_v46, %v6703_v39  ;;  %v4211_v62 = vmul.f32 %v4203_v47, %v6716_v29  ;;  %v4212_v51 = vmul.f32 %v4204_v41, %v6701_v6  ;;  %v4213_v58 = vmul.f32 %v4205_v35, %v6726_v12  ;;  %v4319_v6 = vld [vmem:[%s6831_s16 + $0x8] sm:$0xff]  ;;  %v4318_v12 = vld [vmem:[%s6831_s16] sm:$0xff]  ;;  %s5681_s16 = scalar_lea.vmem %s4415_s19, 32 }
0x52ac   :  { %v4214_v48 = vsel %vm4117_vm12, %v4206_v23, 0.0  ;;  %v4215_v32 = vsel %vm4117_vm12, %v4207_v11, 0.0  ;;  %v4217_v31 = vsel %vm4117_vm12, %v4208_v26, 0.0  ;;  %v4219_v7 = vsel %vm4117_vm12, %v4209_v5, 0.0  ;;  %5147 = vmatpush3.msra.mxu1 %v4319_v6  ;;  %p5682_p13 = scmp.ne.s32.totalorder %s4415_s19, %s5681_s16  ;;  %p5687_p1 = scmp.lt.s32.totalorder %s5681_s16, %s5681_s16 }
0x52ad   :  { %v4216_v36 = vadd.f32 %v4215_v32, %v4214_v48  ;;  %v4221_v43 = vsel %vm4117_vm12, %v4210_v27, 0.0  ;;  %v4223_v54 = vsel %vm4117_vm12, %v4211_v62, 0.0  ;;  %v4225_v39 = vsel %vm4117_vm12, %v4212_v51, 0.0  ;;  %5148 = vmatprep.subr.mxu1 %v5728_v0 }
0x52ae   :  { %v4227_v20 = vsel %vm4117_vm12, %v4213_v58, 0.0  ;;  %5149 = vmatpush3.msra.mxu1 %v4318_v12  ;;  %p5688_p2 = por %p5687_p1, %p5686_p0 }
0x52af   :  { %v4218_v50 = vadd.f32 %v4217_v31, %v4216_v36 }
0x52b0   :  { %p5689_p3 = pnand %p5688_p2, %p5682_p13 }
0x52b1   :  { %v4220_v45 = vadd.f32 %v4219_v7, %v4218_v50 }
0x52b3   :  { %v4222_v10 = vadd.f32 %v4221_v43, %v4220_v45 }
0x52b5   :  { %v4224_v37 = vadd.f32 %v4223_v54, %v4222_v10 }
0x52b7   :  { %v4226_v56 = vadd.f32 %v4225_v39, %v4224_v37 }
0x52b9   :  { %v4228_v40 = vadd.f32 %v4227_v20, %v4226_v56 }
0x52bb   :  { %v4229_v29 = vmax.f32 %v4228_v40, 0.0 }
0x52bd   :  { %5132 = vmatmul.mubr.msk.f32.vlgmr.msra.gmra.mxu0 %vm2158_vm11, %v4229_v29 }
0x537d   :  { %v4314_v63 = vpop.f32.mrf.mxu0 }
0x537e   :  { %v4315_v3 = vadd.f32 %v4501_v4, %v4314_v63 }
0x537f   :  { %v5133_v53 = vpop.f32.mrf.mxu0 }
0x5380   :  { %5151 = vmatmul.mubr.msk.f32.vlgmr.msra.gmra.mxu1 %vm2158_vm11, %v4315_v3 }
0x5440   :  { %v4402_v14 = vpop.f32.mrf.mxu1 }
0x5441   :  { %v4403_v61 = vadd.f32 %v4503_v52, %v4402_v14 }
0x5442   :  { %v5152_v0 = vpop.f32.mrf.mxu1 }
0x5443   :  { %4407 = vst.msk [vmem:[#allocation22] sm:$0x3] %vm4406_vm14, %v4403_v61 }
0x5444   :  { %5692 = shalt.err (!%p5689_p3)
}
0x5445   :  { %4417 = dma.vmem_to_hbm [thread:$0]  %s4415_s19, 32, %s6833_s18, [#allocation6]  }
0x5446   :  { %5713 = dma.done.wait [#allocation6], 32  }
0x5447   :  { %5714 = vsyncadd [#allocation6], 4294967264 }
0x5448   :  { %4421 = vsyncpa [#allocation5], 1 }
0x5449   :  { %4422 = vsyncpa [#allocation8], 1 }
0x544a   :  { %4423 = vsyncpa [#allocation11], 1 }
0x544b   :  { %4424 = vsyncpa [#allocation14], 1 }
0x544c   :  { %4425 = vsyncpa [#allocation17], 1 }
0x544d   :  { %4426 = vsyncpa [#allocation20], 1 }
0x544e   :  { %4427 = vsyncpa [#allocation6], 1 }

</bundles_post_ra>
